<compile_context>
chip_gen: v7x
topology: tpu7x:2x2x1
jax: 0.10.0
libtpu: 0.0.40
codegen_flags: <defaults>
</compile_context>

<pallas_src>
import functools

import jax
import jax.numpy as jnp
from jax import lax
from jax.experimental import pallas as pl
from jax.experimental.pallas import tpu as pltpu


def _round_up(x, m):
    return ((x + m - 1) // m) * m


# ----------------------------------------------------------------------------
# Fused Pallas kernel: LSTM1 -> LSTM2 -> FC head
# ----------------------------------------------------------------------------
def _fused_lstm_model_kernel(x_ref, m_ref,
                             wih1_ref, whh1_ref, b1_ref,
                             wih2_ref, whh2_ref, b2_ref,
                             fc1w_ref, fc1b_ref, fc2w_ref, fc2b_ref,
                             out_ref,
                             g_sc, o1_sc,
                             *, seq_len, batch_pad, hidden_pad):
    T, B, H = seq_len, batch_pad, hidden_pad

    # ---- LSTM layer 1: hoisted input projection (one big MXU matmul) --------
    # g_sc holds the precomputed gate slab for all T timesteps: (T*B, 4H).
    g_sc[...] = (jnp.dot(x_ref[...], wih1_ref[...],
                         preferred_element_type=jnp.float32) + b1_ref[...])

    def run_recurrence(whh_ref, out_to):
        """Sequential part only: gates_t = slab_t + h @ W_hh; masked carry."""
        def step(t, carry):
            h, c = carry
            row = pl.multiple_of(t * B, B)                   # sublane-aligned
            gates = (g_sc[pl.ds(row, B), :]
                     + jnp.dot(h, whh_ref[...],
                               preferred_element_type=jnp.float32))
            m = m_ref[pl.ds(row, B), :]                      # (B, 1) validity
            i_g = jax.nn.sigmoid(gates[:, 0 * H:1 * H])
            f_g = jax.nn.sigmoid(gates[:, 1 * H:2 * H])
            g_g = jnp.tanh(gates[:, 2 * H:3 * H])
            o_g = jax.nn.sigmoid(gates[:, 3 * H:4 * H])
            c_new = f_g * c + i_g * g_g
            h_new = o_g * jnp.tanh(c_new)
            if out_to is not None:                           # lane-dense store
                out_to[pl.ds(row, B), :] = h_new * m
            # pack_padded semantics: carry state through padded steps.
            c = m * c_new + (1.0 - m) * c
            h = m * h_new + (1.0 - m) * h
            return h, c

        zeros = jnp.zeros((B, H), jnp.float32)
        return lax.fori_loop(0, T, step, (zeros, zeros), unroll=True)

    run_recurrence(whh1_ref, out_to=o1_sc)       # layer-1 outputs stay in VMEM

    # ---- LSTM layer 2: hoisted input projection, reusing the gate slab ------
    g_sc[...] = (jnp.dot(o1_sc[...], wih2_ref[...],
                         preferred_element_type=jnp.float32) + b2_ref[...])
    h2, _ = run_recurrence(whh2_ref, out_to=None)

    # ---- FC head epilogue (fused; no HBM round-trip for hidden state) -------
    a1 = jnp.maximum(jnp.dot(h2, fc1w_ref[...],
                             preferred_element_type=jnp.float32) + fc1b_ref[...],
                     0.0)
    out_ref[...] = (jnp.dot(a1, fc2w_ref[...],
                            preferred_element_type=jnp.float32)
                    + fc2b_ref[...]).astype(out_ref.dtype)


# ----------------------------------------------------------------------------
# Padding helpers (zero-padding is exact for LSTM + ReLU MLP)
# ----------------------------------------------------------------------------
def _pad_gate_weight(w, in_pad, H, H_pad):
    """(in_dim, 4H) -> (in_pad, 4*H_pad), preserving PyTorch [i,f,g,o] blocks."""
    in_dim = w.shape[0]
    w4 = w.reshape(in_dim, 4, H)
    w4 = jnp.pad(w4, ((0, in_pad - in_dim), (0, 0), (0, H_pad - H)))
    return w4.reshape(in_pad, 4 * H_pad)


def _pad_gate_bias(b, H, H_pad):
    b4 = b.reshape(1, 4, H)
    b4 = jnp.pad(b4, ((0, 0), (0, 0), (0, H_pad - H)))
    return b4.reshape(1, 4 * H_pad)


def _pad2d(a, rows, cols):
    return jnp.pad(a, ((0, rows - a.shape[0]), (0, cols - a.shape[1])))


# ----------------------------------------------------------------------------
# Public wrapper
# ----------------------------------------------------------------------------
def lstm_model_forward(x_btd, params, mask=None):
    """Pallas implementation of LSTMModel.forward (bidirectional=False, eval)."""
    B, T, D = x_btd.shape
    H = params["w_hh1"].shape[0]
    F = params["fc1_w"].shape[1]
    C = params["fc2_w"].shape[1]

    # NOTE: sum(x)!=0 can misclassify a valid all-zero-sum step as padding;
    # pass `mask` explicitly when available (same caveat as the PyTorch model).
    if mask is None:
        mask = jnp.sum(x_btd, axis=2) != 0                       # (B, T) bool
    lengths = jnp.sum(mask.astype(jnp.int32), axis=1)            # (B,)
    t_idx = jnp.arange(T, dtype=jnp.int32)[:, None]              # (T, 1)
    step_mask = (t_idx < lengths[None, :]).astype(jnp.float32)   # (T, B)

    # (8,128)-aligned padded sizes.
    B_pad = _round_up(B, 8)
    D_pad = _round_up(D, 128)
    H_pad = _round_up(H, 128)
    F_pad = _round_up(F, 128)
    C_pad = _round_up(C, 128)
    TB = T * B_pad
    G = 4 * H_pad

    # Time-major, padded, flattened to (T*B_pad, D_pad) for the hoisted matmul.
    x_tbd = jnp.transpose(x_btd, (1, 0, 2)).astype(jnp.float32)
    x_tbd = jnp.pad(x_tbd, ((0, 0), (0, B_pad - B), (0, D_pad - D)))
    x2d = x_tbd.reshape(TB, D_pad)
    m2d = jnp.pad(step_mask, ((0, 0), (0, B_pad - B))).reshape(TB, 1)

    # Padded weights (gate blocks padded per-gate so [i,f,g,o] order survives).
    wih1 = _pad_gate_weight(params["w_ih1"], D_pad, H, H_pad)
    whh1 = _pad_gate_weight(params["w_hh1"], H_pad, H, H_pad)
    b1 = _pad_gate_bias(params["b1"], H, H_pad)
    wih2 = _pad_gate_weight(params["w_ih2"], H_pad, H, H_pad)
    whh2 = _pad_gate_weight(params["w_hh2"], H_pad, H, H_pad)
    b2 = _pad_gate_bias(params["b2"], H, H_pad)
    fc1w = _pad2d(params["fc1_w"], H_pad, F_pad)
    fc1b = _pad2d(params["fc1_b"], 1, F_pad)
    fc2w = _pad2d(params["fc2_w"], F_pad, C_pad)
    fc2b = _pad2d(params["fc2_b"], 1, C_pad)

    kernel = functools.partial(_fused_lstm_model_kernel,
                               seq_len=T, batch_pad=B_pad, hidden_pad=H_pad)

    out_pad = pl.pallas_call(
        kernel,
        out_shape=jax.ShapeDtypeStruct((B_pad, C_pad), jnp.float32),
        grid_spec=pltpu.PrefetchScalarGridSpec(
            num_scalar_prefetch=0,
            grid=(1,),
            in_specs=[
                pl.BlockSpec((TB, D_pad), lambda i: (0, 0)),     # x (flattened)
                pl.BlockSpec((TB, 1), lambda i: (0, 0)),         # step mask
                pl.BlockSpec((D_pad, G), lambda i: (0, 0)),      # W_ih1
                pl.BlockSpec((H_pad, G), lambda i: (0, 0)),      # W_hh1
                pl.BlockSpec((1, G), lambda i: (0, 0)),          # b1
                pl.BlockSpec((H_pad, G), lambda i: (0, 0)),      # W_ih2
                pl.BlockSpec((H_pad, G), lambda i: (0, 0)),      # W_hh2
                pl.BlockSpec((1, G), lambda i: (0, 0)),          # b2
                pl.BlockSpec((H_pad, F_pad), lambda i: (0, 0)),  # fc1_w
                pl.BlockSpec((1, F_pad), lambda i: (0, 0)),      # fc1_b
                pl.BlockSpec((F_pad, C_pad), lambda i: (0, 0)),  # fc2_w
                pl.BlockSpec((1, C_pad), lambda i: (0, 0)),      # fc2_b
            ],
            out_specs=pl.BlockSpec((B_pad, C_pad), lambda i: (0, 0)),
            scratch_shapes=[
                pltpu.VMEM((TB, G), jnp.float32),       # shared gate slab
                pltpu.VMEM((TB, H_pad), jnp.float32),   # layer-1 outputs
            ],
        ),
        compiler_params=pltpu.CompilerParams(
            dimension_semantics=("arbitrary",),
        ),
        # TODO(synk): for very large H (e.g. 1024) or long T, tile the 4H gate
        # dim / time dim across grid axes and cast weights to bf16 to stay
        # inside v7x's 64 MiB VMEM.
    )(x2d, m2d, wih1, whh1, b1, wih2, whh2, b2, fc1w, fc1b, fc2w, fc2b)

    return out_pad[:B, :C]


# ----------------------------------------------------------------------------
# Pure-JAX reference (for correctness check)
# ----------------------------------------------------------------------------
def _lstm_layer_ref(x_tbd, step_mask_tb1, w_ih, w_hh, bias):
    T, B, D = x_tbd.shape
    H = w_hh.shape[0]

    def step(carry, inp):
        h, c = carry
        x_t, m_t = inp
        gates = x_t @ w_ih + h @ w_hh + bias
        i_g = jax.nn.sigmoid(gates[:, :H])
        f_g = jax.nn.sigmoid(gates[:, H:2 * H])
        g_g = jnp.tanh(gates[:, 2 * H:3 * H])
        o_g = jax.nn.sigmoid(gates[:, 3 * H:])
        c_new = f_g * c + i_g * g_g
        h_new = o_g * jnp.tanh(c_new)
        c2 = m_t * c_new + (1.0 - m_t) * c
        h2 = m_t * h_new + (1.0 - m_t) * h
        return (h2, c2), h_new * m_t

    init = (jnp.zeros((B, H), jnp.float32), jnp.zeros((B, H), jnp.float32))
    (h_f, _), outs = lax.scan(step, init, (x_tbd, step_mask_tb1))
    return outs, h_f


def lstm_model_ref(x_btd, params):
    B, T, D = x_btd.shape
    mask = jnp.sum(x_btd, axis=2) != 0
    lengths = jnp.sum(mask.astype(jnp.int32), axis=1)
    t_idx = jnp.arange(T, dtype=jnp.int32)[:, None]
    step_mask = (t_idx < lengths[None, :]).astype(jnp.float32)[:, :, None]
    x_tbd = jnp.transpose(x_btd, (1, 0, 2)).astype(jnp.float32)
    out1, _ = _lstm_layer_ref(x_tbd, step_mask,
                              params["w_ih1"], params["w_hh1"], params["b1"])
    _, h2 = _lstm_layer_ref(out1, step_mask,
                            params["w_ih2"], params["w_hh2"], params["b2"])
    a1 = jnp.maximum(h2 @ params["fc1_w"] + params["fc1_b"], 0.0)
    return a1 @ params["fc2_w"] + params["fc2_b"]


# ----------------------------------------------------------------------------
# Deterministic parameter init (shapes follow nn.LSTM / nn.Linear)
# ----------------------------------------------------------------------------
def init_params(key, input_dim, hidden_dim, num_classes, fc_hidden=256):
    H = hidden_dim
    k_lstm = 1.0 / jnp.sqrt(H)
    keys = jax.random.split(key, 12)
    u = lambda k, shape, bound: jax.random.uniform(k, shape, jnp.float32, -bound, bound)

    return {
        # layer 1: W_ih (D, 4H) = PyTorch weight_ih_l0.T, W_hh (H, 4H), bias = b_ih + b_hh
        "w_ih1": u(keys[0], (input_dim, 4 * H), k_lstm),
        "w_hh1": u(keys[1], (H, 4 * H), k_lstm),
        "b1":    u(keys[2], (1, 4 * H), k_lstm) + u(keys[3], (1, 4 * H), k_lstm),
        # layer 2: input size = hidden_dim (unidirectional)
        "w_ih2": u(keys[4], (H, 4 * H), k_lstm),
        "w_hh2": u(keys[5], (H, 4 * H), k_lstm),
        "b2":    u(keys[6], (1, 4 * H), k_lstm) + u(keys[7], (1, 4 * H), k_lstm),
        # fc1: (H, 256), fc2: (256, num_classes)
        "fc1_w": u(keys[8], (H, fc_hidden), 1.0 / jnp.sqrt(H)),
        "fc1_b": u(keys[9], (1, fc_hidden), 1.0 / jnp.sqrt(H)),
        "fc2_w": u(keys[10], (fc_hidden, num_classes), 1.0 / jnp.sqrt(fc_hidden)),
        "fc2_b": u(keys[11], (1, num_classes), 1.0 / jnp.sqrt(fc_hidden)),
    }


# ----------------------------------------------------------------------------
if __name__ == "__main__":
    B, T, D = 4, 8, 16          # batch, sequence length, input_dim
    HIDDEN, NUM_CLASSES = 32, 4

    key = jax.random.PRNGKey(0)
    k_x, k_p = jax.random.split(key)
    params = init_params(k_p, D, HIDDEN, NUM_CLASSES)

    x = jax.random.normal(k_x, (B, T, D), dtype=jnp.float32)
    # Variable-length sequences (zero padding -> mask = sum != 0).
    lengths = jnp.array([8, 5, 8, 3], dtype=jnp.int32)
    pad = (jnp.arange(T)[None, :] < lengths[:, None]).astype(jnp.float32)  # (B, T)
    x = x * pad[:, :, None]

    out = jax.jit(functools.partial(lstm_model_forward, params=params))(x)
    out = jax.block_until_ready(out)

    ref = lstm_model_ref(x, params)
    assert out.shape == (B, NUM_CLASSES), out.shape
    assert jnp.allclose(out, ref, rtol=1e-3, atol=5e-4), (
        f"mismatch: max abs err {jnp.max(jnp.abs(out - ref))}")

    print("KERNEL_OK")
</pallas_src>

<mosaic_0001>
module attributes {stable_mosaic.version = 11 : i64} {
  func.func @_fused_lstm_model_kernel(%arg0: i32, %arg1: memref<64x128xf32, #tpu.memory_space<vmem>>, %arg2: memref<64x1xf32, #tpu.memory_space<vmem>>, %arg3: memref<128x512xf32, #tpu.memory_space<vmem>>, %arg4: memref<128x512xf32, #tpu.memory_space<vmem>>, %arg5: memref<1x512xf32, #tpu.memory_space<vmem>>, %arg6: memref<128x512xf32, #tpu.memory_space<vmem>>, %arg7: memref<128x512xf32, #tpu.memory_space<vmem>>, %arg8: memref<1x512xf32, #tpu.memory_space<vmem>>, %arg9: memref<128x256xf32, #tpu.memory_space<vmem>>, %arg10: memref<1x256xf32, #tpu.memory_space<vmem>>, %arg11: memref<256x128xf32, #tpu.memory_space<vmem>>, %arg12: memref<1x128xf32, #tpu.memory_space<vmem>>, %arg13: memref<8x128xf32, #tpu.memory_space<vmem>>, %arg14: memref<64x512xf32, #tpu.memory_space<vmem>>, %arg15: memref<64x128xf32, #tpu.memory_space<vmem>>) attributes {dimension_semantics = [#tpu.dimension_semantics<arbitrary>], iteration_bounds = array<i64: 1>, scalar_prefetch = 0 : i64, scratch_operands = 2 : i64, tpu.core_type = #tpu.core_type<tc>, window_params = [{pipeline_mode = #tpu.pipeline_mode<synchronous>, transform_indices = @transform_0, window_bounds = array<i64: 64, 128>}, {pipeline_mode = #tpu.pipeline_mode<synchronous>, transform_indices = @transform_1, window_bounds = array<i64: 64, 1>}, {pipeline_mode = #tpu.pipeline_mode<synchronous>, transform_indices = @transform_2, window_bounds = array<i64: 128, 512>}, {pipeline_mode = #tpu.pipeline_mode<synchronous>, transform_indices = @transform_3, window_bounds = array<i64: 128, 512>}, {pipeline_mode = #tpu.pipeline_mode<synchronous>, transform_indices = @transform_4, window_bounds = array<i64: 1, 512>}, {pipeline_mode = #tpu.pipeline_mode<synchronous>, transform_indices = @transform_5, window_bounds = array<i64: 128, 512>}, {pipeline_mode = #tpu.pipeline_mode<synchronous>, transform_indices = @transform_6, window_bounds = array<i64: 128, 512>}, {pipeline_mode = #tpu.pipeline_mode<synchronous>, transform_indices = @transform_7, window_bounds = array<i64: 1, 512>}, {pipeline_mode = #tpu.pipeline_mode<synchronous>, transform_indices = @transform_8, window_bounds = array<i64: 128, 256>}, {pipeline_mode = #tpu.pipeline_mode<synchronous>, transform_indices = @transform_9, window_bounds = array<i64: 1, 256>}, {pipeline_mode = #tpu.pipeline_mode<synchronous>, transform_indices = @transform_10, window_bounds = array<i64: 256, 128>}, {pipeline_mode = #tpu.pipeline_mode<synchronous>, transform_indices = @transform_11, window_bounds = array<i64: 1, 128>}, {pipeline_mode = #tpu.pipeline_mode<synchronous>, transform_indices = @transform_12, window_bounds = array<i64: 8, 128>}]} {
    %c0 = arith.constant 0 : index
    %c0_0 = arith.constant 0 : index
    %0 = vector.load %arg1[%c0, %c0_0] : memref<64x128xf32, #tpu.memory_space<vmem>>, vector<64x128xf32>
    %c0_1 = arith.constant 0 : index
    %c0_2 = arith.constant 0 : index
    %1 = vector.load %arg3[%c0_1, %c0_2] : memref<128x512xf32, #tpu.memory_space<vmem>>, vector<128x512xf32>
    %cst = arith.constant dense<0.000000e+00> : vector<64x512xf32>
    %2 = tpu.matmul %0, %1, %cst {dimension_numbers = #tpu.dot_dimension_numbers<[1], [0], [0], [1], [0, 0, 1, 1], [], []>} : vector<64x128xf32>, vector<128x512xf32>, vector<64x512xf32> -> vector<64x512xf32>
    %c0_3 = arith.constant 0 : index
    %c0_4 = arith.constant 0 : index
    %3 = vector.load %arg5[%c0_3, %c0_4] : memref<1x512xf32, #tpu.memory_space<vmem>>, vector<1x512xf32>
    %4 = vector.broadcast %3 : vector<1x512xf32> to vector<64x512xf32>
    %5 = arith.addf %2, %4 : vector<64x512xf32>
    %c0_5 = arith.constant 0 : index
    %c0_6 = arith.constant 0 : index
    %6 = vector.load %arg14[%c0_5, %c0_6] : memref<64x512xf32, #tpu.memory_space<vmem>>, vector<64x512xf32>
    tpu.vector_store %arg14[%c0_5, %c0_6], %5 {strides = array<i32>} : memref<64x512xf32, #tpu.memory_space<vmem>>, vector<64x512xf32>,
    %cst_7 = arith.constant 0.000000e+00 : f32
    %7 = vector.broadcast %cst_7 : f32 to vector<8x128xf32>
    %c0_i32 = arith.constant 0 : i32
    %c8_i32 = arith.constant 8 : i32
    %8 = arith.muli %c0_i32, %c8_i32 : i32
    %9 = tpu.assume_multiple %8, 8 : i32
    %10 = arith.index_cast %9 : i32 to index
    %c0_8 = arith.constant 0 : index
    %11 = vector.load %arg14[%10, %c0_8] : memref<64x512xf32, #tpu.memory_space<vmem>>, vector<8x512xf32>
    %c0_9 = arith.constant 0 : index
    %c0_10 = arith.constant 0 : index
    %12 = vector.load %arg4[%c0_9, %c0_10] : memref<128x512xf32, #tpu.memory_space<vmem>>, vector<128x512xf32>
    %cst_11 = arith.constant dense<0.000000e+00> : vector<8x512xf32>
    %13 = tpu.matmul %7, %12, %cst_11 {dimension_numbers = #tpu.dot_dimension_numbers<[1], [0], [0], [1], [0, 0, 1, 1], [], []>} : vector<8x128xf32>, vector<128x512xf32>, vector<8x512xf32> -> vector<8x512xf32>
    %14 = arith.addf %11, %13 : vector<8x512xf32>
    %15 = arith.index_cast %9 : i32 to index
    %c0_12 = arith.constant 0 : index
    %16 = vector.load %arg2[%15, %c0_12] : memref<64x1xf32, #tpu.memory_space<vmem>>, vector<8x1xf32>
    %17 = vector.extract_strided_slice %14 {offsets = [0, 0], sizes = [8, 128], strides = [1, 1]} : vector<8x512xf32> to vector<8x128xf32>
    %18 = arith.negf %17 : vector<8x128xf32>
    %19 = math.exp %18 : vector<8x128xf32>
    %cst_13 = arith.constant 1.000000e+00 : f32
    %20 = vector.broadcast %cst_13 : f32 to vector<8x128xf32>
    %21 = arith.addf %20, %19 : vector<8x128xf32>
    %22 = arith.divf %20, %21 : vector<8x128xf32>
    %23 = vector.extract_strided_slice %14 {offsets = [0, 128], sizes = [8, 128], strides = [1, 1]} : vector<8x512xf32> to vector<8x128xf32>
    %24 = arith.negf %23 : vector<8x128xf32>
    %25 = math.exp %24 : vector<8x128xf32>
    %cst_14 = arith.constant 1.000000e+00 : f32
    %26 = vector.broadcast %cst_14 : f32 to vector<8x128xf32>
    %27 = arith.addf %26, %25 : vector<8x128xf32>
    %28 = arith.divf %26, %27 : vector<8x128xf32>
    %29 = vector.extract_strided_slice %14 {offsets = [0, 256], sizes = [8, 128], strides = [1, 1]} : vector<8x512xf32> to vector<8x128xf32>
    %30 = math.tanh %29 : vector<8x128xf32>
    %31 = vector.extract_strided_slice %14 {offsets = [0, 384], sizes = [8, 128], strides = [1, 1]} : vector<8x512xf32> to vector<8x128xf32>
    %32 = arith.negf %31 : vector<8x128xf32>
    %33 = math.exp %32 : vector<8x128xf32>
    %cst_15 = arith.constant 1.000000e+00 : f32
    %34 = vector.broadcast %cst_15 : f32 to vector<8x128xf32>
    %35 = arith.addf %34, %33 : vector<8x128xf32>
    %36 = arith.divf %34, %35 : vector<8x128xf32>
    %37 = arith.mulf %28, %7 : vector<8x128xf32>
    %38 = arith.mulf %22, %30 : vector<8x128xf32>
    %39 = arith.addf %37, %38 : vector<8x128xf32>
    %40 = math.tanh %39 : vector<8x128xf32>
    %41 = arith.mulf %36, %40 : vector<8x128xf32>
    %42 = vector.broadcast %16 : vector<8x1xf32> to vector<8x128xf32>
    %43 = arith.mulf %41, %42 : vector<8x128xf32>
    %44 = arith.index_cast %9 : i32 to index
    %c0_16 = arith.constant 0 : index
    %45 = vector.load %arg15[%44, %c0_16] : memref<64x128xf32, #tpu.memory_space<vmem>>, vector<8x128xf32>
    tpu.vector_store %arg15[%44, %c0_16], %43 {strides = array<i32>} : memref<64x128xf32, #tpu.memory_space<vmem>>, vector<8x128xf32>,
    %46 = vector.broadcast %16 : vector<8x1xf32> to vector<8x128xf32>
    %47 = arith.mulf %46, %39 : vector<8x128xf32>
    %cst_17 = arith.constant 1.000000e+00 : f32
    %48 = vector.broadcast %cst_17 : f32 to vector<8x1xf32>
    %49 = arith.subf %48, %16 : vector<8x1xf32>
    %50 = vector.broadcast %49 : vector<8x1xf32> to vector<8x128xf32>
    %51 = arith.mulf %50, %7 : vector<8x128xf32>
    %52 = arith.addf %47, %51 : vector<8x128xf32>
    %53 = vector.broadcast %16 : vector<8x1xf32> to vector<8x128xf32>
    %54 = arith.mulf %53, %41 : vector<8x128xf32>
    %cst_18 = arith.constant 1.000000e+00 : f32
    %55 = vector.broadcast %cst_18 : f32 to vector<8x1xf32>
    %56 = arith.subf %55, %16 : vector<8x1xf32>
    %57 = vector.broadcast %56 : vector<8x1xf32> to vector<8x128xf32>
    %58 = arith.mulf %57, %7 : vector<8x128xf32>
    %59 = arith.addf %54, %58 : vector<8x128xf32>
    %c1_i32 = arith.constant 1 : i32
    %c8_i32_19 = arith.constant 8 : i32
    %60 = arith.muli %c1_i32, %c8_i32_19 : i32
    %61 = tpu.assume_multiple %60, 8 : i32
    %62 = arith.index_cast %61 : i32 to index
    %c0_20 = arith.constant 0 : index
    %63 = vector.load %arg14[%62, %c0_20] : memref<64x512xf32, #tpu.memory_space<vmem>>, vector<8x512xf32>
    %c0_21 = arith.constant 0 : index
    %c0_22 = arith.constant 0 : index
    %64 = vector.load %arg4[%c0_21, %c0_22] : memref<128x512xf32, #tpu.memory_space<vmem>>, vector<128x512xf32>
    %cst_23 = arith.constant dense<0.000000e+00> : vector<8x512xf32>
    %65 = tpu.matmul %59, %64, %cst_23 {dimension_numbers = #tpu.dot_dimension_numbers<[1], [0], [0], [1], [0, 0, 1, 1], [], []>} : vector<8x128xf32>, vector<128x512xf32>, vector<8x512xf32> -> vector<8x512xf32>
    %66 = arith.addf %63, %65 : vector<8x512xf32>
    %67 = arith.index_cast %61 : i32 to index
    %c0_24 = arith.constant 0 : index
    %68 = vector.load %arg2[%67, %c0_24] : memref<64x1xf32, #tpu.memory_space<vmem>>, vector<8x1xf32>
    %69 = vector.extract_strided_slice %66 {offsets = [0, 0], sizes = [8, 128], strides = [1, 1]} : vector<8x512xf32> to vector<8x128xf32>
    %70 = arith.negf %69 : vector<8x128xf32>
    %71 = math.exp %70 : vector<8x128xf32>
    %cst_25 = arith.constant 1.000000e+00 : f32
    %72 = vector.broadcast %cst_25 : f32 to vector<8x128xf32>
    %73 = arith.addf %72, %71 : vector<8x128xf32>
    %74 = arith.divf %72, %73 : vector<8x128xf32>
    %75 = vector.extract_strided_slice %66 {offsets = [0, 128], sizes = [8, 128], strides = [1, 1]} : vector<8x512xf32> to vector<8x128xf32>
    %76 = arith.negf %75 : vector<8x128xf32>
    %77 = math.exp %76 : vector<8x128xf32>
    %cst_26 = arith.constant 1.000000e+00 : f32
    %78 = vector.broadcast %cst_26 : f32 to vector<8x128xf32>
    %79 = arith.addf %78, %77 : vector<8x128xf32>
    %80 = arith.divf %78, %79 : vector<8x128xf32>
    %81 = vector.extract_strided_slice %66 {offsets = [0, 256], sizes = [8, 128], strides = [1, 1]} : vector<8x512xf32> to vector<8x128xf32>
    %82 = math.tanh %81 : vector<8x128xf32>
    %83 = vector.extract_strided_slice %66 {offsets = [0, 384], sizes = [8, 128], strides = [1, 1]} : vector<8x512xf32> to vector<8x128xf32>
    %84 = arith.negf %83 : vector<8x128xf32>
    %85 = math.exp %84 : vector<8x128xf32>
    %cst_27 = arith.constant 1.000000e+00 : f32
    %86 = vector.broadcast %cst_27 : f32 to vector<8x128xf32>
    %87 = arith.addf %86, %85 : vector<8x128xf32>
    %88 = arith.divf %86, %87 : vector<8x128xf32>
    %89 = arith.mulf %80, %52 : vector<8x128xf32>
    %90 = arith.mulf %74, %82 : vector<8x128xf32>
    %91 = arith.addf %89, %90 : vector<8x128xf32>
    %92 = math.tanh %91 : vector<8x128xf32>
    %93 = arith.mulf %88, %92 : vector<8x128xf32>
    %94 = vector.broadcast %68 : vector<8x1xf32> to vector<8x128xf32>
    %95 = arith.mulf %93, %94 : vector<8x128xf32>
    %96 = arith.index_cast %61 : i32 to index
    %c0_28 = arith.constant 0 : index
    %97 = vector.load %arg15[%96, %c0_28] : memref<64x128xf32, #tpu.memory_space<vmem>>, vector<8x128xf32>
    tpu.vector_store %arg15[%96, %c0_28], %95 {strides = array<i32>} : memref<64x128xf32, #tpu.memory_space<vmem>>, vector<8x128xf32>,
    %98 = vector.broadcast %68 : vector<8x1xf32> to vector<8x128xf32>
    %99 = arith.mulf %98, %91 : vector<8x128xf32>
    %cst_29 = arith.constant 1.000000e+00 : f32
    %100 = vector.broadcast %cst_29 : f32 to vector<8x1xf32>
    %101 = arith.subf %100, %68 : vector<8x1xf32>
    %102 = vector.broadcast %101 : vector<8x1xf32> to vector<8x128xf32>
    %103 = arith.mulf %102, %52 : vector<8x128xf32>
    %104 = arith.addf %99, %103 : vector<8x128xf32>
    %105 = vector.broadcast %68 : vector<8x1xf32> to vector<8x128xf32>
    %106 = arith.mulf %105, %93 : vector<8x128xf32>
    %cst_30 = arith.constant 1.000000e+00 : f32
    %107 = vector.broadcast %cst_30 : f32 to vector<8x1xf32>
    %108 = arith.subf %107, %68 : vector<8x1xf32>
    %109 = vector.broadcast %108 : vector<8x1xf32> to vector<8x128xf32>
    %110 = arith.mulf %109, %59 : vector<8x128xf32>
    %111 = arith.addf %106, %110 : vector<8x128xf32>
    %c2_i32 = arith.constant 2 : i32
    %c8_i32_31 = arith.constant 8 : i32
    %112 = arith.muli %c2_i32, %c8_i32_31 : i32
    %113 = tpu.assume_multiple %112, 8 : i32
    %114 = arith.index_cast %113 : i32 to index
    %c0_32 = arith.constant 0 : index
    %115 = vector.load %arg14[%114, %c0_32] : memref<64x512xf32, #tpu.memory_space<vmem>>, vector<8x512xf32>
    %c0_33 = arith.constant 0 : index
    %c0_34 = arith.constant 0 : index
    %116 = vector.load %arg4[%c0_33, %c0_34] : memref<128x512xf32, #tpu.memory_space<vmem>>, vector<128x512xf32>
    %cst_35 = arith.constant dense<0.000000e+00> : vector<8x512xf32>
    %117 = tpu.matmul %111, %116, %cst_35 {dimension_numbers = #tpu.dot_dimension_numbers<[1], [0], [0], [1], [0, 0, 1, 1], [], []>} : vector<8x128xf32>, vector<128x512xf32>, vector<8x512xf32> -> vector<8x512xf32>
    %118 = arith.addf %115, %117 : vector<8x512xf32>
    %119 = arith.index_cast %113 : i32 to index
    %c0_36 = arith.constant 0 : index
    %120 = vector.load %arg2[%119, %c0_36] : memref<64x1xf32, #tpu.memory_space<vmem>>, vector<8x1xf32>
    %121 = vector.extract_strided_slice %118 {offsets = [0, 0], sizes = [8, 128], strides = [1, 1]} : vector<8x512xf32> to vector<8x128xf32>
    %122 = arith.negf %121 : vector<8x128xf32>
    %123 = math.exp %122 : vector<8x128xf32>
    %cst_37 = arith.constant 1.000000e+00 : f32
    %124 = vector.broadcast %cst_37 : f32 to vector<8x128xf32>
    %125 = arith.addf %124, %123 : vector<8x128xf32>
    %126 = arith.divf %124, %125 : vector<8x128xf32>
    %127 = vector.extract_strided_slice %118 {offsets = [0, 128], sizes = [8, 128], strides = [1, 1]} : vector<8x512xf32> to vector<8x128xf32>
    %128 = arith.negf %127 : vector<8x128xf32>
    %129 = math.exp %128 : vector<8x128xf32>
    %cst_38 = arith.constant 1.000000e+00 : f32
    %130 = vector.broadcast %cst_38 : f32 to vector<8x128xf32>
    %131 = arith.addf %130, %129 : vector<8x128xf32>
    %132 = arith.divf %130, %131 : vector<8x128xf32>
    %133 = vector.extract_strided_slice %118 {offsets = [0, 256], sizes = [8, 128], strides = [1, 1]} : vector<8x512xf32> to vector<8x128xf32>
    %134 = math.tanh %133 : vector<8x128xf32>
    %135 = vector.extract_strided_slice %118 {offsets = [0, 384], sizes = [8, 128], strides = [1, 1]} : vector<8x512xf32> to vector<8x128xf32>
    %136 = arith.negf %135 : vector<8x128xf32>
    %137 = math.exp %136 : vector<8x128xf32>
    %cst_39 = arith.constant 1.000000e+00 : f32
    %138 = vector.broadcast %cst_39 : f32 to vector<8x128xf32>
    %139 = arith.addf %138, %137 : vector<8x128xf32>
    %140 = arith.divf %138, %139 : vector<8x128xf32>
    %141 = arith.mulf %132, %104 : vector<8x128xf32>
    %142 = arith.mulf %126, %134 : vector<8x128xf32>
    %143 = arith.addf %141, %142 : vector<8x128xf32>
    %144 = math.tanh %143 : vector<8x128xf32>
    %145 = arith.mulf %140, %144 : vector<8x128xf32>
    %146 = vector.broadcast %120 : vector<8x1xf32> to vector<8x128xf32>
    %147 = arith.mulf %145, %146 : vector<8x128xf32>
    %148 = arith.index_cast %113 : i32 to index
    %c0_40 = arith.constant 0 : index
    %149 = vector.load %arg15[%148, %c0_40] : memref<64x128xf32, #tpu.memory_space<vmem>>, vector<8x128xf32>
    tpu.vector_store %arg15[%148, %c0_40], %147 {strides = array<i32>} : memref<64x128xf32, #tpu.memory_space<vmem>>, vector<8x128xf32>,
    %150 = vector.broadcast %120 : vector<8x1xf32> to vector<8x128xf32>
    %151 = arith.mulf %150, %143 : vector<8x128xf32>
    %cst_41 = arith.constant 1.000000e+00 : f32
    %152 = vector.broadcast %cst_41 : f32 to vector<8x1xf32>
    %153 = arith.subf %152, %120 : vector<8x1xf32>
    %154 = vector.broadcast %153 : vector<8x1xf32> to vector<8x128xf32>
    %155 = arith.mulf %154, %104 : vector<8x128xf32>
    %156 = arith.addf %151, %155 : vector<8x128xf32>
    %157 = vector.broadcast %120 : vector<8x1xf32> to vector<8x128xf32>
    %158 = arith.mulf %157, %145 : vector<8x128xf32>
    %cst_42 = arith.constant 1.000000e+00 : f32
    %159 = vector.broadcast %cst_42 : f32 to vector<8x1xf32>
    %160 = arith.subf %159, %120 : vector<8x1xf32>
    %161 = vector.broadcast %160 : vector<8x1xf32> to vector<8x128xf32>
    %162 = arith.mulf %161, %111 : vector<8x128xf32>
    %163 = arith.addf %158, %162 : vector<8x128xf32>
    %c3_i32 = arith.constant 3 : i32
    %c8_i32_43 = arith.constant 8 : i32
    %164 = arith.muli %c3_i32, %c8_i32_43 : i32
    %165 = tpu.assume_multiple %164, 8 : i32
    %166 = arith.index_cast %165 : i32 to index
    %c0_44 = arith.constant 0 : index
    %167 = vector.load %arg14[%166, %c0_44] : memref<64x512xf32, #tpu.memory_space<vmem>>, vector<8x512xf32>
    %c0_45 = arith.constant 0 : index
    %c0_46 = arith.constant 0 : index
    %168 = vector.load %arg4[%c0_45, %c0_46] : memref<128x512xf32, #tpu.memory_space<vmem>>, vector<128x512xf32>
    %cst_47 = arith.constant dense<0.000000e+00> : vector<8x512xf32>
    %169 = tpu.matmul %163, %168, %cst_47 {dimension_numbers = #tpu.dot_dimension_numbers<[1], [0], [0], [1], [0, 0, 1, 1], [], []>} : vector<8x128xf32>, vector<128x512xf32>, vector<8x512xf32> -> vector<8x512xf32>
    %170 = arith.addf %167, %169 : vector<8x512xf32>
    %171 = arith.index_cast %165 : i32 to index
    %c0_48 = arith.constant 0 : index
    %172 = vector.load %arg2[%171, %c0_48] : memref<64x1xf32, #tpu.memory_space<vmem>>, vector<8x1xf32>
    %173 = vector.extract_strided_slice %170 {offsets = [0, 0], sizes = [8, 128], strides = [1, 1]} : vector<8x512xf32> to vector<8x128xf32>
    %174 = arith.negf %173 : vector<8x128xf32>
    %175 = math.exp %174 : vector<8x128xf32>
    %cst_49 = arith.constant 1.000000e+00 : f32
    %176 = vector.broadcast %cst_49 : f32 to vector<8x128xf32>
    %177 = arith.addf %176, %175 : vector<8x128xf32>
    %178 = arith.divf %176, %177 : vector<8x128xf32>
    %179 = vector.extract_strided_slice %170 {offsets = [0, 128], sizes = [8, 128], strides = [1, 1]} : vector<8x512xf32> to vector<8x128xf32>
    %180 = arith.negf %179 : vector<8x128xf32>
    %181 = math.exp %180 : vector<8x128xf32>
    %cst_50 = arith.constant 1.000000e+00 : f32
    %182 = vector.broadcast %cst_50 : f32 to vector<8x128xf32>
    %183 = arith.addf %182, %181 : vector<8x128xf32>
    %184 = arith.divf %182, %183 : vector<8x128xf32>
    %185 = vector.extract_strided_slice %170 {offsets = [0, 256], sizes = [8, 128], strides = [1, 1]} : vector<8x512xf32> to vector<8x128xf32>
    %186 = math.tanh %185 : vector<8x128xf32>
    %187 = vector.extract_strided_slice %170 {offsets = [0, 384], sizes = [8, 128], strides = [1, 1]} : vector<8x512xf32> to vector<8x128xf32>
    %188 = arith.negf %187 : vector<8x128xf32>
    %189 = math.exp %188 : vector<8x128xf32>
    %cst_51 = arith.constant 1.000000e+00 : f32
    %190 = vector.broadcast %cst_51 : f32 to vector<8x128xf32>
    %191 = arith.addf %190, %189 : vector<8x128xf32>
    %192 = arith.divf %190, %191 : vector<8x128xf32>
    %193 = arith.mulf %184, %156 : vector<8x128xf32>
    %194 = arith.mulf %178, %186 : vector<8x128xf32>
    %195 = arith.addf %193, %194 : vector<8x128xf32>
    %196 = math.tanh %195 : vector<8x128xf32>
    %197 = arith.mulf %192, %196 : vector<8x128xf32>
    %198 = vector.broadcast %172 : vector<8x1xf32> to vector<8x128xf32>
    %199 = arith.mulf %197, %198 : vector<8x128xf32>
    %200 = arith.index_cast %165 : i32 to index
    %c0_52 = arith.constant 0 : index
    %201 = vector.load %arg15[%200, %c0_52] : memref<64x128xf32, #tpu.memory_space<vmem>>, vector<8x128xf32>
    tpu.vector_store %arg15[%200, %c0_52], %199 {strides = array<i32>} : memref<64x128xf32, #tpu.memory_space<vmem>>, vector<8x128xf32>,
    %202 = vector.broadcast %172 : vector<8x1xf32> to vector<8x128xf32>
    %203 = arith.mulf %202, %195 : vector<8x128xf32>
    %cst_53 = arith.constant 1.000000e+00 : f32
    %204 = vector.broadcast %cst_53 : f32 to vector<8x1xf32>
    %205 = arith.subf %204, %172 : vector<8x1xf32>
    %206 = vector.broadcast %205 : vector<8x1xf32> to vector<8x128xf32>
    %207 = arith.mulf %206, %156 : vector<8x128xf32>
    %208 = arith.addf %203, %207 : vector<8x128xf32>
    %209 = vector.broadcast %172 : vector<8x1xf32> to vector<8x128xf32>
    %210 = arith.mulf %209, %197 : vector<8x128xf32>
    %cst_54 = arith.constant 1.000000e+00 : f32
    %211 = vector.broadcast %cst_54 : f32 to vector<8x1xf32>
    %212 = arith.subf %211, %172 : vector<8x1xf32>
    %213 = vector.broadcast %212 : vector<8x1xf32> to vector<8x128xf32>
    %214 = arith.mulf %213, %163 : vector<8x128xf32>
    %215 = arith.addf %210, %214 : vector<8x128xf32>
    %c4_i32 = arith.constant 4 : i32
    %c8_i32_55 = arith.constant 8 : i32
    %216 = arith.muli %c4_i32, %c8_i32_55 : i32
    %217 = tpu.assume_multiple %216, 8 : i32
    %218 = arith.index_cast %217 : i32 to index
    %c0_56 = arith.constant 0 : index
    %219 = vector.load %arg14[%218, %c0_56] : memref<64x512xf32, #tpu.memory_space<vmem>>, vector<8x512xf32>
    %c0_57 = arith.constant 0 : index
    %c0_58 = arith.constant 0 : index
    %220 = vector.load %arg4[%c0_57, %c0_58] : memref<128x512xf32, #tpu.memory_space<vmem>>, vector<128x512xf32>
    %cst_59 = arith.constant dense<0.000000e+00> : vector<8x512xf32>
    %221 = tpu.matmul %215, %220, %cst_59 {dimension_numbers = #tpu.dot_dimension_numbers<[1], [0], [0], [1], [0, 0, 1, 1], [], []>} : vector<8x128xf32>, vector<128x512xf32>, vector<8x512xf32> -> vector<8x512xf32>
    %222 = arith.addf %219, %221 : vector<8x512xf32>
    %223 = arith.index_cast %217 : i32 to index
    %c0_60 = arith.constant 0 : index
    %224 = vector.load %arg2[%223, %c0_60] : memref<64x1xf32, #tpu.memory_space<vmem>>, vector<8x1xf32>
    %225 = vector.extract_strided_slice %222 {offsets = [0, 0], sizes = [8, 128], strides = [1, 1]} : vector<8x512xf32> to vector<8x128xf32>
    %226 = arith.negf %225 : vector<8x128xf32>
    %227 = math.exp %226 : vector<8x128xf32>
    %cst_61 = arith.constant 1.000000e+00 : f32
    %228 = vector.broadcast %cst_61 : f32 to vector<8x128xf32>
    %229 = arith.addf %228, %227 : vector<8x128xf32>
    %230 = arith.divf %228, %229 : vector<8x128xf32>
    %231 = vector.extract_strided_slice %222 {offsets = [0, 128], sizes = [8, 128], strides = [1, 1]} : vector<8x512xf32> to vector<8x128xf32>
    %232 = arith.negf %231 : vector<8x128xf32>
    %233 = math.exp %232 : vector<8x128xf32>
    %cst_62 = arith.constant 1.000000e+00 : f32
    %234 = vector.broadcast %cst_62 : f32 to vector<8x128xf32>
    %235 = arith.addf %234, %233 : vector<8x128xf32>
    %236 = arith.divf %234, %235 : vector<8x128xf32>
    %237 = vector.extract_strided_slice %222 {offsets = [0, 256], sizes = [8, 128], strides = [1, 1]} : vector<8x512xf32> to vector<8x128xf32>
    %238 = math.tanh %237 : vector<8x128xf32>
    %239 = vector.extract_strided_slice %222 {offsets = [0, 384], sizes = [8, 128], strides = [1, 1]} : vector<8x512xf32> to vector<8x128xf32>
    %240 = arith.negf %239 : vector<8x128xf32>
    %241 = math.exp %240 : vector<8x128xf32>
    %cst_63 = arith.constant 1.000000e+00 : f32
    %242 = vector.broadcast %cst_63 : f32 to vector<8x128xf32>
    %243 = arith.addf %242, %241 : vector<8x128xf32>
    %244 = arith.divf %242, %243 : vector<8x128xf32>
    %245 = arith.mulf %236, %208 : vector<8x128xf32>
    %246 = arith.mulf %230, %238 : vector<8x128xf32>
    %247 = arith.addf %245, %246 : vector<8x128xf32>
    %248 = math.tanh %247 : vector<8x128xf32>
    %249 = arith.mulf %244, %248 : vector<8x128xf32>
    %250 = vector.broadcast %224 : vector<8x1xf32> to vector<8x128xf32>
    %251 = arith.mulf %249, %250 : vector<8x128xf32>
    %252 = arith.index_cast %217 : i32 to index
    %c0_64 = arith.constant 0 : index
    %253 = vector.load %arg15[%252, %c0_64] : memref<64x128xf32, #tpu.memory_space<vmem>>, vector<8x128xf32>
    tpu.vector_store %arg15[%252, %c0_64], %251 {strides = array<i32>} : memref<64x128xf32, #tpu.memory_space<vmem>>, vector<8x128xf32>,
    %254 = vector.broadcast %224 : vector<8x1xf32> to vector<8x128xf32>
    %255 = arith.mulf %254, %247 : vector<8x128xf32>
    %cst_65 = arith.constant 1.000000e+00 : f32
    %256 = vector.broadcast %cst_65 : f32 to vector<8x1xf32>
    %257 = arith.subf %256, %224 : vector<8x1xf32>
    %258 = vector.broadcast %257 : vector<8x1xf32> to vector<8x128xf32>
    %259 = arith.mulf %258, %208 : vector<8x128xf32>
    %260 = arith.addf %255, %259 : vector<8x128xf32>
    %261 = vector.broadcast %224 : vector<8x1xf32> to vector<8x128xf32>
    %262 = arith.mulf %261, %249 : vector<8x128xf32>
    %cst_66 = arith.constant 1.000000e+00 : f32
    %263 = vector.broadcast %cst_66 : f32 to vector<8x1xf32>
    %264 = arith.subf %263, %224 : vector<8x1xf32>
    %265 = vector.broadcast %264 : vector<8x1xf32> to vector<8x128xf32>
    %266 = arith.mulf %265, %215 : vector<8x128xf32>
    %267 = arith.addf %262, %266 : vector<8x128xf32>
    %c5_i32 = arith.constant 5 : i32
    %c8_i32_67 = arith.constant 8 : i32
    %268 = arith.muli %c5_i32, %c8_i32_67 : i32
    %269 = tpu.assume_multiple %268, 8 : i32
    %270 = arith.index_cast %269 : i32 to index
    %c0_68 = arith.constant 0 : index
    %271 = vector.load %arg14[%270, %c0_68] : memref<64x512xf32, #tpu.memory_space<vmem>>, vector<8x512xf32>
    %c0_69 = arith.constant 0 : index
    %c0_70 = arith.constant 0 : index
    %272 = vector.load %arg4[%c0_69, %c0_70] : memref<128x512xf32, #tpu.memory_space<vmem>>, vector<128x512xf32>
    %cst_71 = arith.constant dense<0.000000e+00> : vector<8x512xf32>
    %273 = tpu.matmul %267, %272, %cst_71 {dimension_numbers = #tpu.dot_dimension_numbers<[1], [0], [0], [1], [0, 0, 1, 1], [], []>} : vector<8x128xf32>, vector<128x512xf32>, vector<8x512xf32> -> vector<8x512xf32>
    %274 = arith.addf %271, %273 : vector<8x512xf32>
    %275 = arith.index_cast %269 : i32 to index
    %c0_72 = arith.constant 0 : index
    %276 = vector.load %arg2[%275, %c0_72] : memref<64x1xf32, #tpu.memory_space<vmem>>, vector<8x1xf32>
    %277 = vector.extract_strided_slice %274 {offsets = [0, 0], sizes = [8, 128], strides = [1, 1]} : vector<8x512xf32> to vector<8x128xf32>
    %278 = arith.negf %277 : vector<8x128xf32>
    %279 = math.exp %278 : vector<8x128xf32>
    %cst_73 = arith.constant 1.000000e+00 : f32
    %280 = vector.broadcast %cst_73 : f32 to vector<8x128xf32>
    %281 = arith.addf %280, %279 : vector<8x128xf32>
    %282 = arith.divf %280, %281 : vector<8x128xf32>
    %283 = vector.extract_strided_slice %274 {offsets = [0, 128], sizes = [8, 128], strides = [1, 1]} : vector<8x512xf32> to vector<8x128xf32>
    %284 = arith.negf %283 : vector<8x128xf32>
    %285 = math.exp %284 : vector<8x128xf32>
    %cst_74 = arith.constant 1.000000e+00 : f32
    %286 = vector.broadcast %cst_74 : f32 to vector<8x128xf32>
    %287 = arith.addf %286, %285 : vector<8x128xf32>
    %288 = arith.divf %286, %287 : vector<8x128xf32>
    %289 = vector.extract_strided_slice %274 {offsets = [0, 256], sizes = [8, 128], strides = [1, 1]} : vector<8x512xf32> to vector<8x128xf32>
    %290 = math.tanh %289 : vector<8x128xf32>
    %291 = vector.extract_strided_slice %274 {offsets = [0, 384], sizes = [8, 128], strides = [1, 1]} : vector<8x512xf32> to vector<8x128xf32>
    %292 = arith.negf %291 : vector<8x128xf32>
    %293 = math.exp %292 : vector<8x128xf32>
    %cst_75 = arith.constant 1.000000e+00 : f32
    %294 = vector.broadcast %cst_75 : f32 to vector<8x128xf32>
    %295 = arith.addf %294, %293 : vector<8x128xf32>
    %296 = arith.divf %294, %295 : vector<8x128xf32>
    %297 = arith.mulf %288, %260 : vector<8x128xf32>
    %298 = arith.mulf %282, %290 : vector<8x128xf32>
    %299 = arith.addf %297, %298 : vector<8x128xf32>
    %300 = math.tanh %299 : vector<8x128xf32>
    %301 = arith.mulf %296, %300 : vector<8x128xf32>
    %302 = vector.broadcast %276 : vector<8x1xf32> to vector<8x128xf32>
    %303 = arith.mulf %301, %302 : vector<8x128xf32>
    %304 = arith.index_cast %269 : i32 to index
    %c0_76 = arith.constant 0 : index
    %305 = vector.load %arg15[%304, %c0_76] : memref<64x128xf32, #tpu.memory_space<vmem>>, vector<8x128xf32>
    tpu.vector_store %arg15[%304, %c0_76], %303 {strides = array<i32>} : memref<64x128xf32, #tpu.memory_space<vmem>>, vector<8x128xf32>,
    %306 = vector.broadcast %276 : vector<8x1xf32> to vector<8x128xf32>
    %307 = arith.mulf %306, %299 : vector<8x128xf32>
    %cst_77 = arith.constant 1.000000e+00 : f32
    %308 = vector.broadcast %cst_77 : f32 to vector<8x1xf32>
    %309 = arith.subf %308, %276 : vector<8x1xf32>
    %310 = vector.broadcast %309 : vector<8x1xf32> to vector<8x128xf32>
    %311 = arith.mulf %310, %260 : vector<8x128xf32>
    %312 = arith.addf %307, %311 : vector<8x128xf32>
    %313 = vector.broadcast %276 : vector<8x1xf32> to vector<8x128xf32>
    %314 = arith.mulf %313, %301 : vector<8x128xf32>
    %cst_78 = arith.constant 1.000000e+00 : f32
    %315 = vector.broadcast %cst_78 : f32 to vector<8x1xf32>
    %316 = arith.subf %315, %276 : vector<8x1xf32>
    %317 = vector.broadcast %316 : vector<8x1xf32> to vector<8x128xf32>
    %318 = arith.mulf %317, %267 : vector<8x128xf32>
    %319 = arith.addf %314, %318 : vector<8x128xf32>
    %c6_i32 = arith.constant 6 : i32
    %c8_i32_79 = arith.constant 8 : i32
    %320 = arith.muli %c6_i32, %c8_i32_79 : i32
    %321 = tpu.assume_multiple %320, 8 : i32
    %322 = arith.index_cast %321 : i32 to index
    %c0_80 = arith.constant 0 : index
    %323 = vector.load %arg14[%322, %c0_80] : memref<64x512xf32, #tpu.memory_space<vmem>>, vector<8x512xf32>
    %c0_81 = arith.constant 0 : index
    %c0_82 = arith.constant 0 : index
    %324 = vector.load %arg4[%c0_81, %c0_82] : memref<128x512xf32, #tpu.memory_space<vmem>>, vector<128x512xf32>
    %cst_83 = arith.constant dense<0.000000e+00> : vector<8x512xf32>
    %325 = tpu.matmul %319, %324, %cst_83 {dimension_numbers = #tpu.dot_dimension_numbers<[1], [0], [0], [1], [0, 0, 1, 1], [], []>} : vector<8x128xf32>, vector<128x512xf32>, vector<8x512xf32> -> vector<8x512xf32>
    %326 = arith.addf %323, %325 : vector<8x512xf32>
    %327 = arith.index_cast %321 : i32 to index
    %c0_84 = arith.constant 0 : index
    %328 = vector.load %arg2[%327, %c0_84] : memref<64x1xf32, #tpu.memory_space<vmem>>, vector<8x1xf32>
    %329 = vector.extract_strided_slice %326 {offsets = [0, 0], sizes = [8, 128], strides = [1, 1]} : vector<8x512xf32> to vector<8x128xf32>
    %330 = arith.negf %329 : vector<8x128xf32>
    %331 = math.exp %330 : vector<8x128xf32>
    %cst_85 = arith.constant 1.000000e+00 : f32
    %332 = vector.broadcast %cst_85 : f32 to vector<8x128xf32>
    %333 = arith.addf %332, %331 : vector<8x128xf32>
    %334 = arith.divf %332, %333 : vector<8x128xf32>
    %335 = vector.extract_strided_slice %326 {offsets = [0, 128], sizes = [8, 128], strides = [1, 1]} : vector<8x512xf32> to vector<8x128xf32>
    %336 = arith.negf %335 : vector<8x128xf32>
    %337 = math.exp %336 : vector<8x128xf32>
    %cst_86 = arith.constant 1.000000e+00 : f32
    %338 = vector.broadcast %cst_86 : f32 to vector<8x128xf32>
    %339 = arith.addf %338, %337 : vector<8x128xf32>
    %340 = arith.divf %338, %339 : vector<8x128xf32>
    %341 = vector.extract_strided_slice %326 {offsets = [0, 256], sizes = [8, 128], strides = [1, 1]} : vector<8x512xf32> to vector<8x128xf32>
    %342 = math.tanh %341 : vector<8x128xf32>
    %343 = vector.extract_strided_slice %326 {offsets = [0, 384], sizes = [8, 128], strides = [1, 1]} : vector<8x512xf32> to vector<8x128xf32>
    %344 = arith.negf %343 : vector<8x128xf32>
    %345 = math.exp %344 : vector<8x128xf32>
    %cst_87 = arith.constant 1.000000e+00 : f32
    %346 = vector.broadcast %cst_87 : f32 to vector<8x128xf32>
    %347 = arith.addf %346, %345 : vector<8x128xf32>
    %348 = arith.divf %346, %347 : vector<8x128xf32>
    %349 = arith.mulf %340, %312 : vector<8x128xf32>
    %350 = arith.mulf %334, %342 : vector<8x128xf32>
    %351 = arith.addf %349, %350 : vector<8x128xf32>
    %352 = math.tanh %351 : vector<8x128xf32>
    %353 = arith.mulf %348, %352 : vector<8x128xf32>
    %354 = vector.broadcast %328 : vector<8x1xf32> to vector<8x128xf32>
    %355 = arith.mulf %353, %354 : vector<8x128xf32>
    %356 = arith.index_cast %321 : i32 to index
    %c0_88 = arith.constant 0 : index
    %357 = vector.load %arg15[%356, %c0_88] : memref<64x128xf32, #tpu.memory_space<vmem>>, vector<8x128xf32>
    tpu.vector_store %arg15[%356, %c0_88], %355 {strides = array<i32>} : memref<64x128xf32, #tpu.memory_space<vmem>>, vector<8x128xf32>,
    %358 = vector.broadcast %328 : vector<8x1xf32> to vector<8x128xf32>
    %359 = arith.mulf %358, %351 : vector<8x128xf32>
    %cst_89 = arith.constant 1.000000e+00 : f32
    %360 = vector.broadcast %cst_89 : f32 to vector<8x1xf32>
    %361 = arith.subf %360, %328 : vector<8x1xf32>
    %362 = vector.broadcast %361 : vector<8x1xf32> to vector<8x128xf32>
    %363 = arith.mulf %362, %312 : vector<8x128xf32>
    %364 = arith.addf %359, %363 : vector<8x128xf32>
    %365 = vector.broadcast %328 : vector<8x1xf32> to vector<8x128xf32>
    %366 = arith.mulf %365, %353 : vector<8x128xf32>
    %cst_90 = arith.constant 1.000000e+00 : f32
    %367 = vector.broadcast %cst_90 : f32 to vector<8x1xf32>
    %368 = arith.subf %367, %328 : vector<8x1xf32>
    %369 = vector.broadcast %368 : vector<8x1xf32> to vector<8x128xf32>
    %370 = arith.mulf %369, %319 : vector<8x128xf32>
    %371 = arith.addf %366, %370 : vector<8x128xf32>
    %c7_i32 = arith.constant 7 : i32
    %c8_i32_91 = arith.constant 8 : i32
    %372 = arith.muli %c7_i32, %c8_i32_91 : i32
    %373 = tpu.assume_multiple %372, 8 : i32
    %374 = arith.index_cast %373 : i32 to index
    %c0_92 = arith.constant 0 : index
    %375 = vector.load %arg14[%374, %c0_92] : memref<64x512xf32, #tpu.memory_space<vmem>>, vector<8x512xf32>
    %c0_93 = arith.constant 0 : index
    %c0_94 = arith.constant 0 : index
    %376 = vector.load %arg4[%c0_93, %c0_94] : memref<128x512xf32, #tpu.memory_space<vmem>>, vector<128x512xf32>
    %cst_95 = arith.constant dense<0.000000e+00> : vector<8x512xf32>
    %377 = tpu.matmul %371, %376, %cst_95 {dimension_numbers = #tpu.dot_dimension_numbers<[1], [0], [0], [1], [0, 0, 1, 1], [], []>} : vector<8x128xf32>, vector<128x512xf32>, vector<8x512xf32> -> vector<8x512xf32>
    %378 = arith.addf %375, %377 : vector<8x512xf32>
    %379 = arith.index_cast %373 : i32 to index
    %c0_96 = arith.constant 0 : index
    %380 = vector.load %arg2[%379, %c0_96] : memref<64x1xf32, #tpu.memory_space<vmem>>, vector<8x1xf32>
    %381 = vector.extract_strided_slice %378 {offsets = [0, 0], sizes = [8, 128], strides = [1, 1]} : vector<8x512xf32> to vector<8x128xf32>
    %382 = arith.negf %381 : vector<8x128xf32>
    %383 = math.exp %382 : vector<8x128xf32>
    %cst_97 = arith.constant 1.000000e+00 : f32
    %384 = vector.broadcast %cst_97 : f32 to vector<8x128xf32>
    %385 = arith.addf %384, %383 : vector<8x128xf32>
    %386 = arith.divf %384, %385 : vector<8x128xf32>
    %387 = vector.extract_strided_slice %378 {offsets = [0, 128], sizes = [8, 128], strides = [1, 1]} : vector<8x512xf32> to vector<8x128xf32>
    %388 = arith.negf %387 : vector<8x128xf32>
    %389 = math.exp %388 : vector<8x128xf32>
    %cst_98 = arith.constant 1.000000e+00 : f32
    %390 = vector.broadcast %cst_98 : f32 to vector<8x128xf32>
    %391 = arith.addf %390, %389 : vector<8x128xf32>
    %392 = arith.divf %390, %391 : vector<8x128xf32>
    %393 = vector.extract_strided_slice %378 {offsets = [0, 256], sizes = [8, 128], strides = [1, 1]} : vector<8x512xf32> to vector<8x128xf32>
    %394 = math.tanh %393 : vector<8x128xf32>
    %395 = vector.extract_strided_slice %378 {offsets = [0, 384], sizes = [8, 128], strides = [1, 1]} : vector<8x512xf32> to vector<8x128xf32>
    %396 = arith.negf %395 : vector<8x128xf32>
    %397 = math.exp %396 : vector<8x128xf32>
    %cst_99 = arith.constant 1.000000e+00 : f32
    %398 = vector.broadcast %cst_99 : f32 to vector<8x128xf32>
    %399 = arith.addf %398, %397 : vector<8x128xf32>
    %400 = arith.divf %398, %399 : vector<8x128xf32>
    %401 = arith.mulf %392, %364 : vector<8x128xf32>
    %402 = arith.mulf %386, %394 : vector<8x128xf32>
    %403 = arith.addf %401, %402 : vector<8x128xf32>
    %404 = math.tanh %403 : vector<8x128xf32>
    %405 = arith.mulf %400, %404 : vector<8x128xf32>
    %406 = vector.broadcast %380 : vector<8x1xf32> to vector<8x128xf32>
    %407 = arith.mulf %405, %406 : vector<8x128xf32>
    %408 = arith.index_cast %373 : i32 to index
    %c0_100 = arith.constant 0 : index
    %409 = vector.load %arg15[%408, %c0_100] : memref<64x128xf32, #tpu.memory_space<vmem>>, vector<8x128xf32>
    tpu.vector_store %arg15[%408, %c0_100], %407 {strides = array<i32>} : memref<64x128xf32, #tpu.memory_space<vmem>>, vector<8x128xf32>,
    %410 = vector.broadcast %380 : vector<8x1xf32> to vector<8x128xf32>
    %411 = arith.mulf %410, %403 : vector<8x128xf32>
    %cst_101 = arith.constant 1.000000e+00 : f32
    %412 = vector.broadcast %cst_101 : f32 to vector<8x1xf32>
    %413 = arith.subf %412, %380 : vector<8x1xf32>
    %414 = vector.broadcast %413 : vector<8x1xf32> to vector<8x128xf32>
    %415 = arith.mulf %414, %364 : vector<8x128xf32>
    %416 = arith.addf %411, %415 : vector<8x128xf32>
    %417 = vector.broadcast %380 : vector<8x1xf32> to vector<8x128xf32>
    %418 = arith.mulf %417, %405 : vector<8x128xf32>
    %cst_102 = arith.constant 1.000000e+00 : f32
    %419 = vector.broadcast %cst_102 : f32 to vector<8x1xf32>
    %420 = arith.subf %419, %380 : vector<8x1xf32>
    %421 = vector.broadcast %420 : vector<8x1xf32> to vector<8x128xf32>
    %422 = arith.mulf %421, %371 : vector<8x128xf32>
    %423 = arith.addf %418, %422 : vector<8x128xf32>
    %c8_i32_103 = arith.constant 8 : i32
    %c0_104 = arith.constant 0 : index
    %c0_105 = arith.constant 0 : index
    %424 = vector.load %arg15[%c0_104, %c0_105] : memref<64x128xf32, #tpu.memory_space<vmem>>, vector<64x128xf32>
    %c0_106 = arith.constant 0 : index
    %c0_107 = arith.constant 0 : index
    %425 = vector.load %arg6[%c0_106, %c0_107] : memref<128x512xf32, #tpu.memory_space<vmem>>, vector<128x512xf32>
    %cst_108 = arith.constant dense<0.000000e+00> : vector<64x512xf32>
    %426 = tpu.matmul %424, %425, %cst_108 {dimension_numbers = #tpu.dot_dimension_numbers<[1], [0], [0], [1], [0, 0, 1, 1], [], []>} : vector<64x128xf32>, vector<128x512xf32>, vector<64x512xf32> -> vector<64x512xf32>
    %c0_109 = arith.constant 0 : index
    %c0_110 = arith.constant 0 : index
    %427 = vector.load %arg8[%c0_109, %c0_110] : memref<1x512xf32, #tpu.memory_space<vmem>>, vector<1x512xf32>
    %428 = vector.broadcast %427 : vector<1x512xf32> to vector<64x512xf32>
    %429 = arith.addf %426, %428 : vector<64x512xf32>
    %c0_111 = arith.constant 0 : index
    %c0_112 = arith.constant 0 : index
    %430 = vector.load %arg14[%c0_111, %c0_112] : memref<64x512xf32, #tpu.memory_space<vmem>>, vector<64x512xf32>
    tpu.vector_store %arg14[%c0_111, %c0_112], %429 {strides = array<i32>} : memref<64x512xf32, #tpu.memory_space<vmem>>, vector<64x512xf32>,
    %cst_113 = arith.constant 0.000000e+00 : f32
    %431 = vector.broadcast %cst_113 : f32 to vector<8x128xf32>
    %c0_i32_114 = arith.constant 0 : i32
    %c8_i32_115 = arith.constant 8 : i32
    %432 = arith.muli %c0_i32_114, %c8_i32_115 : i32
    %433 = tpu.assume_multiple %432, 8 : i32
    %434 = arith.index_cast %433 : i32 to index
    %c0_116 = arith.constant 0 : index
    %435 = vector.load %arg14[%434, %c0_116] : memref<64x512xf32, #tpu.memory_space<vmem>>, vector<8x512xf32>
    %c0_117 = arith.constant 0 : index
    %c0_118 = arith.constant 0 : index
    %436 = vector.load %arg7[%c0_117, %c0_118] : memref<128x512xf32, #tpu.memory_space<vmem>>, vector<128x512xf32>
    %cst_119 = arith.constant dense<0.000000e+00> : vector<8x512xf32>
    %437 = tpu.matmul %431, %436, %cst_119 {dimension_numbers = #tpu.dot_dimension_numbers<[1], [0], [0], [1], [0, 0, 1, 1], [], []>} : vector<8x128xf32>, vector<128x512xf32>, vector<8x512xf32> -> vector<8x512xf32>
    %438 = arith.addf %435, %437 : vector<8x512xf32>
    %439 = arith.index_cast %433 : i32 to index
    %c0_120 = arith.constant 0 : index
    %440 = vector.load %arg2[%439, %c0_120] : memref<64x1xf32, #tpu.memory_space<vmem>>, vector<8x1xf32>
    %441 = vector.extract_strided_slice %438 {offsets = [0, 0], sizes = [8, 128], strides = [1, 1]} : vector<8x512xf32> to vector<8x128xf32>
    %442 = arith.negf %441 : vector<8x128xf32>
    %443 = math.exp %442 : vector<8x128xf32>
    %cst_121 = arith.constant 1.000000e+00 : f32
    %444 = vector.broadcast %cst_121 : f32 to vector<8x128xf32>
    %445 = arith.addf %444, %443 : vector<8x128xf32>
    %446 = arith.divf %444, %445 : vector<8x128xf32>
    %447 = vector.extract_strided_slice %438 {offsets = [0, 128], sizes = [8, 128], strides = [1, 1]} : vector<8x512xf32> to vector<8x128xf32>
    %448 = arith.negf %447 : vector<8x128xf32>
    %449 = math.exp %448 : vector<8x128xf32>
    %cst_122 = arith.constant 1.000000e+00 : f32
    %450 = vector.broadcast %cst_122 : f32 to vector<8x128xf32>
    %451 = arith.addf %450, %449 : vector<8x128xf32>
    %452 = arith.divf %450, %451 : vector<8x128xf32>
    %453 = vector.extract_strided_slice %438 {offsets = [0, 256], sizes = [8, 128], strides = [1, 1]} : vector<8x512xf32> to vector<8x128xf32>
    %454 = math.tanh %453 : vector<8x128xf32>
    %455 = vector.extract_strided_slice %438 {offsets = [0, 384], sizes = [8, 128], strides = [1, 1]} : vector<8x512xf32> to vector<8x128xf32>
    %456 = arith.negf %455 : vector<8x128xf32>
    %457 = math.exp %456 : vector<8x128xf32>
    %cst_123 = arith.constant 1.000000e+00 : f32
    %458 = vector.broadcast %cst_123 : f32 to vector<8x128xf32>
    %459 = arith.addf %458, %457 : vector<8x128xf32>
    %460 = arith.divf %458, %459 : vector<8x128xf32>
    %461 = arith.mulf %452, %431 : vector<8x128xf32>
    %462 = arith.mulf %446, %454 : vector<8x128xf32>
    %463 = arith.addf %461, %462 : vector<8x128xf32>
    %464 = math.tanh %463 : vector<8x128xf32>
    %465 = arith.mulf %460, %464 : vector<8x128xf32>
    %466 = vector.broadcast %440 : vector<8x1xf32> to vector<8x128xf32>
    %467 = arith.mulf %466, %463 : vector<8x128xf32>
    %cst_124 = arith.constant 1.000000e+00 : f32
    %468 = vector.broadcast %cst_124 : f32 to vector<8x1xf32>
    %469 = arith.subf %468, %440 : vector<8x1xf32>
    %470 = vector.broadcast %469 : vector<8x1xf32> to vector<8x128xf32>
    %471 = arith.mulf %470, %431 : vector<8x128xf32>
    %472 = arith.addf %467, %471 : vector<8x128xf32>
    %473 = vector.broadcast %440 : vector<8x1xf32> to vector<8x128xf32>
    %474 = arith.mulf %473, %465 : vector<8x128xf32>
    %cst_125 = arith.constant 1.000000e+00 : f32
    %475 = vector.broadcast %cst_125 : f32 to vector<8x1xf32>
    %476 = arith.subf %475, %440 : vector<8x1xf32>
    %477 = vector.broadcast %476 : vector<8x1xf32> to vector<8x128xf32>
    %478 = arith.mulf %477, %431 : vector<8x128xf32>
    %479 = arith.addf %474, %478 : vector<8x128xf32>
    %c1_i32_126 = arith.constant 1 : i32
    %c8_i32_127 = arith.constant 8 : i32
    %480 = arith.muli %c1_i32_126, %c8_i32_127 : i32
    %481 = tpu.assume_multiple %480, 8 : i32
    %482 = arith.index_cast %481 : i32 to index
    %c0_128 = arith.constant 0 : index
    %483 = vector.load %arg14[%482, %c0_128] : memref<64x512xf32, #tpu.memory_space<vmem>>, vector<8x512xf32>
    %c0_129 = arith.constant 0 : index
    %c0_130 = arith.constant 0 : index
    %484 = vector.load %arg7[%c0_129, %c0_130] : memref<128x512xf32, #tpu.memory_space<vmem>>, vector<128x512xf32>
    %cst_131 = arith.constant dense<0.000000e+00> : vector<8x512xf32>
    %485 = tpu.matmul %479, %484, %cst_131 {dimension_numbers = #tpu.dot_dimension_numbers<[1], [0], [0], [1], [0, 0, 1, 1], [], []>} : vector<8x128xf32>, vector<128x512xf32>, vector<8x512xf32> -> vector<8x512xf32>
    %486 = arith.addf %483, %485 : vector<8x512xf32>
    %487 = arith.index_cast %481 : i32 to index
    %c0_132 = arith.constant 0 : index
    %488 = vector.load %arg2[%487, %c0_132] : memref<64x1xf32, #tpu.memory_space<vmem>>, vector<8x1xf32>
    %489 = vector.extract_strided_slice %486 {offsets = [0, 0], sizes = [8, 128], strides = [1, 1]} : vector<8x512xf32> to vector<8x128xf32>
    %490 = arith.negf %489 : vector<8x128xf32>
    %491 = math.exp %490 : vector<8x128xf32>
    %cst_133 = arith.constant 1.000000e+00 : f32
    %492 = vector.broadcast %cst_133 : f32 to vector<8x128xf32>
    %493 = arith.addf %492, %491 : vector<8x128xf32>
    %494 = arith.divf %492, %493 : vector<8x128xf32>
    %495 = vector.extract_strided_slice %486 {offsets = [0, 128], sizes = [8, 128], strides = [1, 1]} : vector<8x512xf32> to vector<8x128xf32>
    %496 = arith.negf %495 : vector<8x128xf32>
    %497 = math.exp %496 : vector<8x128xf32>
    %cst_134 = arith.constant 1.000000e+00 : f32
    %498 = vector.broadcast %cst_134 : f32 to vector<8x128xf32>
    %499 = arith.addf %498, %497 : vector<8x128xf32>
    %500 = arith.divf %498, %499 : vector<8x128xf32>
    %501 = vector.extract_strided_slice %486 {offsets = [0, 256], sizes = [8, 128], strides = [1, 1]} : vector<8x512xf32> to vector<8x128xf32>
    %502 = math.tanh %501 : vector<8x128xf32>
    %503 = vector.extract_strided_slice %486 {offsets = [0, 384], sizes = [8, 128], strides = [1, 1]} : vector<8x512xf32> to vector<8x128xf32>
    %504 = arith.negf %503 : vector<8x128xf32>
    %505 = math.exp %504 : vector<8x128xf32>
    %cst_135 = arith.constant 1.000000e+00 : f32
    %506 = vector.broadcast %cst_135 : f32 to vector<8x128xf32>
    %507 = arith.addf %506, %505 : vector<8x128xf32>
    %508 = arith.divf %506, %507 : vector<8x128xf32>
    %509 = arith.mulf %500, %472 : vector<8x128xf32>
    %510 = arith.mulf %494, %502 : vector<8x128xf32>
    %511 = arith.addf %509, %510 : vector<8x128xf32>
    %512 = math.tanh %511 : vector<8x128xf32>
    %513 = arith.mulf %508, %512 : vector<8x128xf32>
    %514 = vector.broadcast %488 : vector<8x1xf32> to vector<8x128xf32>
    %515 = arith.mulf %514, %511 : vector<8x128xf32>
    %cst_136 = arith.constant 1.000000e+00 : f32
    %516 = vector.broadcast %cst_136 : f32 to vector<8x1xf32>
    %517 = arith.subf %516, %488 : vector<8x1xf32>
    %518 = vector.broadcast %517 : vector<8x1xf32> to vector<8x128xf32>
    %519 = arith.mulf %518, %472 : vector<8x128xf32>
    %520 = arith.addf %515, %519 : vector<8x128xf32>
    %521 = vector.broadcast %488 : vector<8x1xf32> to vector<8x128xf32>
    %522 = arith.mulf %521, %513 : vector<8x128xf32>
    %cst_137 = arith.constant 1.000000e+00 : f32
    %523 = vector.broadcast %cst_137 : f32 to vector<8x1xf32>
    %524 = arith.subf %523, %488 : vector<8x1xf32>
    %525 = vector.broadcast %524 : vector<8x1xf32> to vector<8x128xf32>
    %526 = arith.mulf %525, %479 : vector<8x128xf32>
    %527 = arith.addf %522, %526 : vector<8x128xf32>
    %c2_i32_138 = arith.constant 2 : i32
    %c8_i32_139 = arith.constant 8 : i32
    %528 = arith.muli %c2_i32_138, %c8_i32_139 : i32
    %529 = tpu.assume_multiple %528, 8 : i32
    %530 = arith.index_cast %529 : i32 to index
    %c0_140 = arith.constant 0 : index
    %531 = vector.load %arg14[%530, %c0_140] : memref<64x512xf32, #tpu.memory_space<vmem>>, vector<8x512xf32>
    %c0_141 = arith.constant 0 : index
    %c0_142 = arith.constant 0 : index
    %532 = vector.load %arg7[%c0_141, %c0_142] : memref<128x512xf32, #tpu.memory_space<vmem>>, vector<128x512xf32>
    %cst_143 = arith.constant dense<0.000000e+00> : vector<8x512xf32>
    %533 = tpu.matmul %527, %532, %cst_143 {dimension_numbers = #tpu.dot_dimension_numbers<[1], [0], [0], [1], [0, 0, 1, 1], [], []>} : vector<8x128xf32>, vector<128x512xf32>, vector<8x512xf32> -> vector<8x512xf32>
    %534 = arith.addf %531, %533 : vector<8x512xf32>
    %535 = arith.index_cast %529 : i32 to index
    %c0_144 = arith.constant 0 : index
    %536 = vector.load %arg2[%535, %c0_144] : memref<64x1xf32, #tpu.memory_space<vmem>>, vector<8x1xf32>
    %537 = vector.extract_strided_slice %534 {offsets = [0, 0], sizes = [8, 128], strides = [1, 1]} : vector<8x512xf32> to vector<8x128xf32>
    %538 = arith.negf %537 : vector<8x128xf32>
    %539 = math.exp %538 : vector<8x128xf32>
    %cst_145 = arith.constant 1.000000e+00 : f32
    %540 = vector.broadcast %cst_145 : f32 to vector<8x128xf32>
    %541 = arith.addf %540, %539 : vector<8x128xf32>
    %542 = arith.divf %540, %541 : vector<8x128xf32>
    %543 = vector.extract_strided_slice %534 {offsets = [0, 128], sizes = [8, 128], strides = [1, 1]} : vector<8x512xf32> to vector<8x128xf32>
    %544 = arith.negf %543 : vector<8x128xf32>
    %545 = math.exp %544 : vector<8x128xf32>
    %cst_146 = arith.constant 1.000000e+00 : f32
    %546 = vector.broadcast %cst_146 : f32 to vector<8x128xf32>
    %547 = arith.addf %546, %545 : vector<8x128xf32>
    %548 = arith.divf %546, %547 : vector<8x128xf32>
    %549 = vector.extract_strided_slice %534 {offsets = [0, 256], sizes = [8, 128], strides = [1, 1]} : vector<8x512xf32> to vector<8x128xf32>
    %550 = math.tanh %549 : vector<8x128xf32>
    %551 = vector.extract_strided_slice %534 {offsets = [0, 384], sizes = [8, 128], strides = [1, 1]} : vector<8x512xf32> to vector<8x128xf32>
    %552 = arith.negf %551 : vector<8x128xf32>
    %553 = math.exp %552 : vector<8x128xf32>
    %cst_147 = arith.constant 1.000000e+00 : f32
    %554 = vector.broadcast %cst_147 : f32 to vector<8x128xf32>
    %555 = arith.addf %554, %553 : vector<8x128xf32>
    %556 = arith.divf %554, %555 : vector<8x128xf32>
    %557 = arith.mulf %548, %520 : vector<8x128xf32>
    %558 = arith.mulf %542, %550 : vector<8x128xf32>
    %559 = arith.addf %557, %558 : vector<8x128xf32>
    %560 = math.tanh %559 : vector<8x128xf32>
    %561 = arith.mulf %556, %560 : vector<8x128xf32>
    %562 = vector.broadcast %536 : vector<8x1xf32> to vector<8x128xf32>
    %563 = arith.mulf %562, %559 : vector<8x128xf32>
    %cst_148 = arith.constant 1.000000e+00 : f32
    %564 = vector.broadcast %cst_148 : f32 to vector<8x1xf32>
    %565 = arith.subf %564, %536 : vector<8x1xf32>
    %566 = vector.broadcast %565 : vector<8x1xf32> to vector<8x128xf32>
    %567 = arith.mulf %566, %520 : vector<8x128xf32>
    %568 = arith.addf %563, %567 : vector<8x128xf32>
    %569 = vector.broadcast %536 : vector<8x1xf32> to vector<8x128xf32>
    %570 = arith.mulf %569, %561 : vector<8x128xf32>
    %cst_149 = arith.constant 1.000000e+00 : f32
    %571 = vector.broadcast %cst_149 : f32 to vector<8x1xf32>
    %572 = arith.subf %571, %536 : vector<8x1xf32>
    %573 = vector.broadcast %572 : vector<8x1xf32> to vector<8x128xf32>
    %574 = arith.mulf %573, %527 : vector<8x128xf32>
    %575 = arith.addf %570, %574 : vector<8x128xf32>
    %c3_i32_150 = arith.constant 3 : i32
    %c8_i32_151 = arith.constant 8 : i32
    %576 = arith.muli %c3_i32_150, %c8_i32_151 : i32
    %577 = tpu.assume_multiple %576, 8 : i32
    %578 = arith.index_cast %577 : i32 to index
    %c0_152 = arith.constant 0 : index
    %579 = vector.load %arg14[%578, %c0_152] : memref<64x512xf32, #tpu.memory_space<vmem>>, vector<8x512xf32>
    %c0_153 = arith.constant 0 : index
    %c0_154 = arith.constant 0 : index
    %580 = vector.load %arg7[%c0_153, %c0_154] : memref<128x512xf32, #tpu.memory_space<vmem>>, vector<128x512xf32>
    %cst_155 = arith.constant dense<0.000000e+00> : vector<8x512xf32>
    %581 = tpu.matmul %575, %580, %cst_155 {dimension_numbers = #tpu.dot_dimension_numbers<[1], [0], [0], [1], [0, 0, 1, 1], [], []>} : vector<8x128xf32>, vector<128x512xf32>, vector<8x512xf32> -> vector<8x512xf32>
    %582 = arith.addf %579, %581 : vector<8x512xf32>
    %583 = arith.index_cast %577 : i32 to index
    %c0_156 = arith.constant 0 : index
    %584 = vector.load %arg2[%583, %c0_156] : memref<64x1xf32, #tpu.memory_space<vmem>>, vector<8x1xf32>
    %585 = vector.extract_strided_slice %582 {offsets = [0, 0], sizes = [8, 128], strides = [1, 1]} : vector<8x512xf32> to vector<8x128xf32>
    %586 = arith.negf %585 : vector<8x128xf32>
    %587 = math.exp %586 : vector<8x128xf32>
    %cst_157 = arith.constant 1.000000e+00 : f32
    %588 = vector.broadcast %cst_157 : f32 to vector<8x128xf32>
    %589 = arith.addf %588, %587 : vector<8x128xf32>
    %590 = arith.divf %588, %589 : vector<8x128xf32>
    %591 = vector.extract_strided_slice %582 {offsets = [0, 128], sizes = [8, 128], strides = [1, 1]} : vector<8x512xf32> to vector<8x128xf32>
    %592 = arith.negf %591 : vector<8x128xf32>
    %593 = math.exp %592 : vector<8x128xf32>
    %cst_158 = arith.constant 1.000000e+00 : f32
    %594 = vector.broadcast %cst_158 : f32 to vector<8x128xf32>
    %595 = arith.addf %594, %593 : vector<8x128xf32>
    %596 = arith.divf %594, %595 : vector<8x128xf32>
    %597 = vector.extract_strided_slice %582 {offsets = [0, 256], sizes = [8, 128], strides = [1, 1]} : vector<8x512xf32> to vector<8x128xf32>
    %598 = math.tanh %597 : vector<8x128xf32>
    %599 = vector.extract_strided_slice %582 {offsets = [0, 384], sizes = [8, 128], strides = [1, 1]} : vector<8x512xf32> to vector<8x128xf32>
    %600 = arith.negf %599 : vector<8x128xf32>
    %601 = math.exp %600 : vector<8x128xf32>
    %cst_159 = arith.constant 1.000000e+00 : f32
    %602 = vector.broadcast %cst_159 : f32 to vector<8x128xf32>
    %603 = arith.addf %602, %601 : vector<8x128xf32>
    %604 = arith.divf %602, %603 : vector<8x128xf32>
    %605 = arith.mulf %596, %568 : vector<8x128xf32>
    %606 = arith.mulf %590, %598 : vector<8x128xf32>
    %607 = arith.addf %605, %606 : vector<8x128xf32>
    %608 = math.tanh %607 : vector<8x128xf32>
    %609 = arith.mulf %604, %608 : vector<8x128xf32>
    %610 = vector.broadcast %584 : vector<8x1xf32> to vector<8x128xf32>
    %611 = arith.mulf %610, %607 : vector<8x128xf32>
    %cst_160 = arith.constant 1.000000e+00 : f32
    %612 = vector.broadcast %cst_160 : f32 to vector<8x1xf32>
    %613 = arith.subf %612, %584 : vector<8x1xf32>
    %614 = vector.broadcast %613 : vector<8x1xf32> to vector<8x128xf32>
    %615 = arith.mulf %614, %568 : vector<8x128xf32>
    %616 = arith.addf %611, %615 : vector<8x128xf32>
    %617 = vector.broadcast %584 : vector<8x1xf32> to vector<8x128xf32>
    %618 = arith.mulf %617, %609 : vector<8x128xf32>
    %cst_161 = arith.constant 1.000000e+00 : f32
    %619 = vector.broadcast %cst_161 : f32 to vector<8x1xf32>
    %620 = arith.subf %619, %584 : vector<8x1xf32>
    %621 = vector.broadcast %620 : vector<8x1xf32> to vector<8x128xf32>
    %622 = arith.mulf %621, %575 : vector<8x128xf32>
    %623 = arith.addf %618, %622 : vector<8x128xf32>
    %c4_i32_162 = arith.constant 4 : i32
    %c8_i32_163 = arith.constant 8 : i32
    %624 = arith.muli %c4_i32_162, %c8_i32_163 : i32
    %625 = tpu.assume_multiple %624, 8 : i32
    %626 = arith.index_cast %625 : i32 to index
    %c0_164 = arith.constant 0 : index
    %627 = vector.load %arg14[%626, %c0_164] : memref<64x512xf32, #tpu.memory_space<vmem>>, vector<8x512xf32>
    %c0_165 = arith.constant 0 : index
    %c0_166 = arith.constant 0 : index
    %628 = vector.load %arg7[%c0_165, %c0_166] : memref<128x512xf32, #tpu.memory_space<vmem>>, vector<128x512xf32>
    %cst_167 = arith.constant dense<0.000000e+00> : vector<8x512xf32>
    %629 = tpu.matmul %623, %628, %cst_167 {dimension_numbers = #tpu.dot_dimension_numbers<[1], [0], [0], [1], [0, 0, 1, 1], [], []>} : vector<8x128xf32>, vector<128x512xf32>, vector<8x512xf32> -> vector<8x512xf32>
    %630 = arith.addf %627, %629 : vector<8x512xf32>
    %631 = arith.index_cast %625 : i32 to index
    %c0_168 = arith.constant 0 : index
    %632 = vector.load %arg2[%631, %c0_168] : memref<64x1xf32, #tpu.memory_space<vmem>>, vector<8x1xf32>
    %633 = vector.extract_strided_slice %630 {offsets = [0, 0], sizes = [8, 128], strides = [1, 1]} : vector<8x512xf32> to vector<8x128xf32>
    %634 = arith.negf %633 : vector<8x128xf32>
    %635 = math.exp %634 : vector<8x128xf32>
    %cst_169 = arith.constant 1.000000e+00 : f32
    %636 = vector.broadcast %cst_169 : f32 to vector<8x128xf32>
    %637 = arith.addf %636, %635 : vector<8x128xf32>
    %638 = arith.divf %636, %637 : vector<8x128xf32>
    %639 = vector.extract_strided_slice %630 {offsets = [0, 128], sizes = [8, 128], strides = [1, 1]} : vector<8x512xf32> to vector<8x128xf32>
    %640 = arith.negf %639 : vector<8x128xf32>
    %641 = math.exp %640 : vector<8x128xf32>
    %cst_170 = arith.constant 1.000000e+00 : f32
    %642 = vector.broadcast %cst_170 : f32 to vector<8x128xf32>
    %643 = arith.addf %642, %641 : vector<8x128xf32>
    %644 = arith.divf %642, %643 : vector<8x128xf32>
    %645 = vector.extract_strided_slice %630 {offsets = [0, 256], sizes = [8, 128], strides = [1, 1]} : vector<8x512xf32> to vector<8x128xf32>
    %646 = math.tanh %645 : vector<8x128xf32>
    %647 = vector.extract_strided_slice %630 {offsets = [0, 384], sizes = [8, 128], strides = [1, 1]} : vector<8x512xf32> to vector<8x128xf32>
    %648 = arith.negf %647 : vector<8x128xf32>
    %649 = math.exp %648 : vector<8x128xf32>
    %cst_171 = arith.constant 1.000000e+00 : f32
    %650 = vector.broadcast %cst_171 : f32 to vector<8x128xf32>
    %651 = arith.addf %650, %649 : vector<8x128xf32>
    %652 = arith.divf %650, %651 : vector<8x128xf32>
    %653 = arith.mulf %644, %616 : vector<8x128xf32>
    %654 = arith.mulf %638, %646 : vector<8x128xf32>
    %655 = arith.addf %653, %654 : vector<8x128xf32>
    %656 = math.tanh %655 : vector<8x128xf32>
    %657 = arith.mulf %652, %656 : vector<8x128xf32>
    %658 = vector.broadcast %632 : vector<8x1xf32> to vector<8x128xf32>
    %659 = arith.mulf %658, %655 : vector<8x128xf32>
    %cst_172 = arith.constant 1.000000e+00 : f32
    %660 = vector.broadcast %cst_172 : f32 to vector<8x1xf32>
    %661 = arith.subf %660, %632 : vector<8x1xf32>
    %662 = vector.broadcast %661 : vector<8x1xf32> to vector<8x128xf32>
    %663 = arith.mulf %662, %616 : vector<8x128xf32>
    %664 = arith.addf %659, %663 : vector<8x128xf32>
    %665 = vector.broadcast %632 : vector<8x1xf32> to vector<8x128xf32>
    %666 = arith.mulf %665, %657 : vector<8x128xf32>
    %cst_173 = arith.constant 1.000000e+00 : f32
    %667 = vector.broadcast %cst_173 : f32 to vector<8x1xf32>
    %668 = arith.subf %667, %632 : vector<8x1xf32>
    %669 = vector.broadcast %668 : vector<8x1xf32> to vector<8x128xf32>
    %670 = arith.mulf %669, %623 : vector<8x128xf32>
    %671 = arith.addf %666, %670 : vector<8x128xf32>
    %c5_i32_174 = arith.constant 5 : i32
    %c8_i32_175 = arith.constant 8 : i32
    %672 = arith.muli %c5_i32_174, %c8_i32_175 : i32
    %673 = tpu.assume_multiple %672, 8 : i32
    %674 = arith.index_cast %673 : i32 to index
    %c0_176 = arith.constant 0 : index
    %675 = vector.load %arg14[%674, %c0_176] : memref<64x512xf32, #tpu.memory_space<vmem>>, vector<8x512xf32>
    %c0_177 = arith.constant 0 : index
    %c0_178 = arith.constant 0 : index
    %676 = vector.load %arg7[%c0_177, %c0_178] : memref<128x512xf32, #tpu.memory_space<vmem>>, vector<128x512xf32>
    %cst_179 = arith.constant dense<0.000000e+00> : vector<8x512xf32>
    %677 = tpu.matmul %671, %676, %cst_179 {dimension_numbers = #tpu.dot_dimension_numbers<[1], [0], [0], [1], [0, 0, 1, 1], [], []>} : vector<8x128xf32>, vector<128x512xf32>, vector<8x512xf32> -> vector<8x512xf32>
    %678 = arith.addf %675, %677 : vector<8x512xf32>
    %679 = arith.index_cast %673 : i32 to index
    %c0_180 = arith.constant 0 : index
    %680 = vector.load %arg2[%679, %c0_180] : memref<64x1xf32, #tpu.memory_space<vmem>>, vector<8x1xf32>
    %681 = vector.extract_strided_slice %678 {offsets = [0, 0], sizes = [8, 128], strides = [1, 1]} : vector<8x512xf32> to vector<8x128xf32>
    %682 = arith.negf %681 : vector<8x128xf32>
    %683 = math.exp %682 : vector<8x128xf32>
    %cst_181 = arith.constant 1.000000e+00 : f32
    %684 = vector.broadcast %cst_181 : f32 to vector<8x128xf32>
    %685 = arith.addf %684, %683 : vector<8x128xf32>
    %686 = arith.divf %684, %685 : vector<8x128xf32>
    %687 = vector.extract_strided_slice %678 {offsets = [0, 128], sizes = [8, 128], strides = [1, 1]} : vector<8x512xf32> to vector<8x128xf32>
    %688 = arith.negf %687 : vector<8x128xf32>
    %689 = math.exp %688 : vector<8x128xf32>
    %cst_182 = arith.constant 1.000000e+00 : f32
    %690 = vector.broadcast %cst_182 : f32 to vector<8x128xf32>
    %691 = arith.addf %690, %689 : vector<8x128xf32>
    %692 = arith.divf %690, %691 : vector<8x128xf32>
    %693 = vector.extract_strided_slice %678 {offsets = [0, 256], sizes = [8, 128], strides = [1, 1]} : vector<8x512xf32> to vector<8x128xf32>
    %694 = math.tanh %693 : vector<8x128xf32>
    %695 = vector.extract_strided_slice %678 {offsets = [0, 384], sizes = [8, 128], strides = [1, 1]} : vector<8x512xf32> to vector<8x128xf32>
    %696 = arith.negf %695 : vector<8x128xf32>
    %697 = math.exp %696 : vector<8x128xf32>
    %cst_183 = arith.constant 1.000000e+00 : f32
    %698 = vector.broadcast %cst_183 : f32 to vector<8x128xf32>
    %699 = arith.addf %698, %697 : vector<8x128xf32>
    %700 = arith.divf %698, %699 : vector<8x128xf32>
    %701 = arith.mulf %692, %664 : vector<8x128xf32>
    %702 = arith.mulf %686, %694 : vector<8x128xf32>
    %703 = arith.addf %701, %702 : vector<8x128xf32>
    %704 = math.tanh %703 : vector<8x128xf32>
    %705 = arith.mulf %700, %704 : vector<8x128xf32>
    %706 = vector.broadcast %680 : vector<8x1xf32> to vector<8x128xf32>
    %707 = arith.mulf %706, %703 : vector<8x128xf32>
    %cst_184 = arith.constant 1.000000e+00 : f32
    %708 = vector.broadcast %cst_184 : f32 to vector<8x1xf32>
    %709 = arith.subf %708, %680 : vector<8x1xf32>
    %710 = vector.broadcast %709 : vector<8x1xf32> to vector<8x128xf32>
    %711 = arith.mulf %710, %664 : vector<8x128xf32>
    %712 = arith.addf %707, %711 : vector<8x128xf32>
    %713 = vector.broadcast %680 : vector<8x1xf32> to vector<8x128xf32>
    %714 = arith.mulf %713, %705 : vector<8x128xf32>
    %cst_185 = arith.constant 1.000000e+00 : f32
    %715 = vector.broadcast %cst_185 : f32 to vector<8x1xf32>
    %716 = arith.subf %715, %680 : vector<8x1xf32>
    %717 = vector.broadcast %716 : vector<8x1xf32> to vector<8x128xf32>
    %718 = arith.mulf %717, %671 : vector<8x128xf32>
    %719 = arith.addf %714, %718 : vector<8x128xf32>
    %c6_i32_186 = arith.constant 6 : i32
    %c8_i32_187 = arith.constant 8 : i32
    %720 = arith.muli %c6_i32_186, %c8_i32_187 : i32
    %721 = tpu.assume_multiple %720, 8 : i32
    %722 = arith.index_cast %721 : i32 to index
    %c0_188 = arith.constant 0 : index
    %723 = vector.load %arg14[%722, %c0_188] : memref<64x512xf32, #tpu.memory_space<vmem>>, vector<8x512xf32>
    %c0_189 = arith.constant 0 : index
    %c0_190 = arith.constant 0 : index
    %724 = vector.load %arg7[%c0_189, %c0_190] : memref<128x512xf32, #tpu.memory_space<vmem>>, vector<128x512xf32>
    %cst_191 = arith.constant dense<0.000000e+00> : vector<8x512xf32>
    %725 = tpu.matmul %719, %724, %cst_191 {dimension_numbers = #tpu.dot_dimension_numbers<[1], [0], [0], [1], [0, 0, 1, 1], [], []>} : vector<8x128xf32>, vector<128x512xf32>, vector<8x512xf32> -> vector<8x512xf32>
    %726 = arith.addf %723, %725 : vector<8x512xf32>
    %727 = arith.index_cast %721 : i32 to index
    %c0_192 = arith.constant 0 : index
    %728 = vector.load %arg2[%727, %c0_192] : memref<64x1xf32, #tpu.memory_space<vmem>>, vector<8x1xf32>
    %729 = vector.extract_strided_slice %726 {offsets = [0, 0], sizes = [8, 128], strides = [1, 1]} : vector<8x512xf32> to vector<8x128xf32>
    %730 = arith.negf %729 : vector<8x128xf32>
    %731 = math.exp %730 : vector<8x128xf32>
    %cst_193 = arith.constant 1.000000e+00 : f32
    %732 = vector.broadcast %cst_193 : f32 to vector<8x128xf32>
    %733 = arith.addf %732, %731 : vector<8x128xf32>
    %734 = arith.divf %732, %733 : vector<8x128xf32>
    %735 = vector.extract_strided_slice %726 {offsets = [0, 128], sizes = [8, 128], strides = [1, 1]} : vector<8x512xf32> to vector<8x128xf32>
    %736 = arith.negf %735 : vector<8x128xf32>
    %737 = math.exp %736 : vector<8x128xf32>
    %cst_194 = arith.constant 1.000000e+00 : f32
    %738 = vector.broadcast %cst_194 : f32 to vector<8x128xf32>
    %739 = arith.addf %738, %737 : vector<8x128xf32>
    %740 = arith.divf %738, %739 : vector<8x128xf32>
    %741 = vector.extract_strided_slice %726 {offsets = [0, 256], sizes = [8, 128], strides = [1, 1]} : vector<8x512xf32> to vector<8x128xf32>
    %742 = math.tanh %741 : vector<8x128xf32>
    %743 = vector.extract_strided_slice %726 {offsets = [0, 384], sizes = [8, 128], strides = [1, 1]} : vector<8x512xf32> to vector<8x128xf32>
    %744 = arith.negf %743 : vector<8x128xf32>
    %745 = math.exp %744 : vector<8x128xf32>
    %cst_195 = arith.constant 1.000000e+00 : f32
    %746 = vector.broadcast %cst_195 : f32 to vector<8x128xf32>
    %747 = arith.addf %746, %745 : vector<8x128xf32>
    %748 = arith.divf %746, %747 : vector<8x128xf32>
    %749 = arith.mulf %740, %712 : vector<8x128xf32>
    %750 = arith.mulf %734, %742 : vector<8x128xf32>
    %751 = arith.addf %749, %750 : vector<8x128xf32>
    %752 = math.tanh %751 : vector<8x128xf32>
    %753 = arith.mulf %748, %752 : vector<8x128xf32>
    %754 = vector.broadcast %728 : vector<8x1xf32> to vector<8x128xf32>
    %755 = arith.mulf %754, %751 : vector<8x128xf32>
    %cst_196 = arith.constant 1.000000e+00 : f32
    %756 = vector.broadcast %cst_196 : f32 to vector<8x1xf32>
    %757 = arith.subf %756, %728 : vector<8x1xf32>
    %758 = vector.broadcast %757 : vector<8x1xf32> to vector<8x128xf32>
    %759 = arith.mulf %758, %712 : vector<8x128xf32>
    %760 = arith.addf %755, %759 : vector<8x128xf32>
    %761 = vector.broadcast %728 : vector<8x1xf32> to vector<8x128xf32>
    %762 = arith.mulf %761, %753 : vector<8x128xf32>
    %cst_197 = arith.constant 1.000000e+00 : f32
    %763 = vector.broadcast %cst_197 : f32 to vector<8x1xf32>
    %764 = arith.subf %763, %728 : vector<8x1xf32>
    %765 = vector.broadcast %764 : vector<8x1xf32> to vector<8x128xf32>
    %766 = arith.mulf %765, %719 : vector<8x128xf32>
    %767 = arith.addf %762, %766 : vector<8x128xf32>
    %c7_i32_198 = arith.constant 7 : i32
    %c8_i32_199 = arith.constant 8 : i32
    %768 = arith.muli %c7_i32_198, %c8_i32_199 : i32
    %769 = tpu.assume_multiple %768, 8 : i32
    %770 = arith.index_cast %769 : i32 to index
    %c0_200 = arith.constant 0 : index
    %771 = vector.load %arg14[%770, %c0_200] : memref<64x512xf32, #tpu.memory_space<vmem>>, vector<8x512xf32>
    %c0_201 = arith.constant 0 : index
    %c0_202 = arith.constant 0 : index
    %772 = vector.load %arg7[%c0_201, %c0_202] : memref<128x512xf32, #tpu.memory_space<vmem>>, vector<128x512xf32>
    %cst_203 = arith.constant dense<0.000000e+00> : vector<8x512xf32>
    %773 = tpu.matmul %767, %772, %cst_203 {dimension_numbers = #tpu.dot_dimension_numbers<[1], [0], [0], [1], [0, 0, 1, 1], [], []>} : vector<8x128xf32>, vector<128x512xf32>, vector<8x512xf32> -> vector<8x512xf32>
    %774 = arith.addf %771, %773 : vector<8x512xf32>
    %775 = arith.index_cast %769 : i32 to index
    %c0_204 = arith.constant 0 : index
    %776 = vector.load %arg2[%775, %c0_204] : memref<64x1xf32, #tpu.memory_space<vmem>>, vector<8x1xf32>
    %777 = vector.extract_strided_slice %774 {offsets = [0, 0], sizes = [8, 128], strides = [1, 1]} : vector<8x512xf32> to vector<8x128xf32>
    %778 = arith.negf %777 : vector<8x128xf32>
    %779 = math.exp %778 : vector<8x128xf32>
    %cst_205 = arith.constant 1.000000e+00 : f32
    %780 = vector.broadcast %cst_205 : f32 to vector<8x128xf32>
    %781 = arith.addf %780, %779 : vector<8x128xf32>
    %782 = arith.divf %780, %781 : vector<8x128xf32>
    %783 = vector.extract_strided_slice %774 {offsets = [0, 128], sizes = [8, 128], strides = [1, 1]} : vector<8x512xf32> to vector<8x128xf32>
    %784 = arith.negf %783 : vector<8x128xf32>
    %785 = math.exp %784 : vector<8x128xf32>
    %cst_206 = arith.constant 1.000000e+00 : f32
    %786 = vector.broadcast %cst_206 : f32 to vector<8x128xf32>
    %787 = arith.addf %786, %785 : vector<8x128xf32>
    %788 = arith.divf %786, %787 : vector<8x128xf32>
    %789 = vector.extract_strided_slice %774 {offsets = [0, 256], sizes = [8, 128], strides = [1, 1]} : vector<8x512xf32> to vector<8x128xf32>
    %790 = math.tanh %789 : vector<8x128xf32>
    %791 = vector.extract_strided_slice %774 {offsets = [0, 384], sizes = [8, 128], strides = [1, 1]} : vector<8x512xf32> to vector<8x128xf32>
    %792 = arith.negf %791 : vector<8x128xf32>
    %793 = math.exp %792 : vector<8x128xf32>
    %cst_207 = arith.constant 1.000000e+00 : f32
    %794 = vector.broadcast %cst_207 : f32 to vector<8x128xf32>
    %795 = arith.addf %794, %793 : vector<8x128xf32>
    %796 = arith.divf %794, %795 : vector<8x128xf32>
    %797 = arith.mulf %788, %760 : vector<8x128xf32>
    %798 = arith.mulf %782, %790 : vector<8x128xf32>
    %799 = arith.addf %797, %798 : vector<8x128xf32>
    %800 = math.tanh %799 : vector<8x128xf32>
    %801 = arith.mulf %796, %800 : vector<8x128xf32>
    %802 = vector.broadcast %776 : vector<8x1xf32> to vector<8x128xf32>
    %803 = arith.mulf %802, %799 : vector<8x128xf32>
    %cst_208 = arith.constant 1.000000e+00 : f32
    %804 = vector.broadcast %cst_208 : f32 to vector<8x1xf32>
    %805 = arith.subf %804, %776 : vector<8x1xf32>
    %806 = vector.broadcast %805 : vector<8x1xf32> to vector<8x128xf32>
    %807 = arith.mulf %806, %760 : vector<8x128xf32>
    %808 = arith.addf %803, %807 : vector<8x128xf32>
    %809 = vector.broadcast %776 : vector<8x1xf32> to vector<8x128xf32>
    %810 = arith.mulf %809, %801 : vector<8x128xf32>
    %cst_209 = arith.constant 1.000000e+00 : f32
    %811 = vector.broadcast %cst_209 : f32 to vector<8x1xf32>
    %812 = arith.subf %811, %776 : vector<8x1xf32>
    %813 = vector.broadcast %812 : vector<8x1xf32> to vector<8x128xf32>
    %814 = arith.mulf %813, %767 : vector<8x128xf32>
    %815 = arith.addf %810, %814 : vector<8x128xf32>
    %c8_i32_210 = arith.constant 8 : i32
    %c0_211 = arith.constant 0 : index
    %c0_212 = arith.constant 0 : index
    %816 = vector.load %arg9[%c0_211, %c0_212] : memref<128x256xf32, #tpu.memory_space<vmem>>, vector<128x256xf32>
    %cst_213 = arith.constant dense<0.000000e+00> : vector<8x256xf32>
    %817 = tpu.matmul %815, %816, %cst_213 {dimension_numbers = #tpu.dot_dimension_numbers<[1], [0], [0], [1], [0, 0, 1, 1], [], []>} : vector<8x128xf32>, vector<128x256xf32>, vector<8x256xf32> -> vector<8x256xf32>
    %c0_214 = arith.constant 0 : index
    %c0_215 = arith.constant 0 : index
    %818 = vector.load %arg10[%c0_214, %c0_215] : memref<1x256xf32, #tpu.memory_space<vmem>>, vector<1x256xf32>
    %819 = vector.broadcast %818 : vector<1x256xf32> to vector<8x256xf32>
    %820 = arith.addf %817, %819 : vector<8x256xf32>
    %cst_216 = arith.constant 0.000000e+00 : f32
    %821 = vector.broadcast %cst_216 : f32 to vector<8x256xf32>
    %822 = arith.maximumf %820, %821 : vector<8x256xf32>
    %c0_217 = arith.constant 0 : index
    %c0_218 = arith.constant 0 : index
    %823 = vector.load %arg11[%c0_217, %c0_218] : memref<256x128xf32, #tpu.memory_space<vmem>>, vector<256x128xf32>
    %cst_219 = arith.constant dense<0.000000e+00> : vector<8x128xf32>
    %824 = tpu.matmul %822, %823, %cst_219 {dimension_numbers = #tpu.dot_dimension_numbers<[1], [0], [0], [1], [0, 0, 1, 1], [], []>} : vector<8x256xf32>, vector<256x128xf32>, vector<8x128xf32> -> vector<8x128xf32>
    %c0_220 = arith.constant 0 : index
    %c0_221 = arith.constant 0 : index
    %825 = vector.load %arg12[%c0_220, %c0_221] : memref<1x128xf32, #tpu.memory_space<vmem>>, vector<1x128xf32>
    %826 = vector.broadcast %825 : vector<1x128xf32> to vector<8x128xf32>
    %827 = arith.addf %824, %826 : vector<8x128xf32>
    %c0_222 = arith.constant 0 : index
    %c0_223 = arith.constant 0 : index
    %828 = vector.load %arg13[%c0_222, %c0_223] : memref<8x128xf32, #tpu.memory_space<vmem>>, vector<8x128xf32>
    tpu.vector_store %arg13[%c0_222, %c0_223], %827 {strides = array<i32>} : memref<8x128xf32, #tpu.memory_space<vmem>>, vector<8x128xf32>,
    return
  }
  func.func @transform_0(%arg0: i32) -> (i32, i32) {
    %c0_i32 = arith.constant 0 : i32
    %c0_i32_0 = arith.constant 0 : i32
    %c0_i32_1 = arith.constant 0 : i32
    return %c0_i32, %c0_i32_0 : i32, i32
  }
  func.func @transform_1(%arg0: i32) -> (i32, i32) {
    %c0_i32 = arith.constant 0 : i32
    %c0_i32_0 = arith.constant 0 : i32
    %c0_i32_1 = arith.constant 0 : i32
    return %c0_i32, %c0_i32_0 : i32, i32
  }
  func.func @transform_2(%arg0: i32) -> (i32, i32) {
    %c0_i32 = arith.constant 0 : i32
    %c0_i32_0 = arith.constant 0 : i32
    %c0_i32_1 = arith.constant 0 : i32
    return %c0_i32, %c0_i32_0 : i32, i32
  }
  func.func @transform_3(%arg0: i32) -> (i32, i32) {
    %c0_i32 = arith.constant 0 : i32
    %c0_i32_0 = arith.constant 0 : i32
    %c0_i32_1 = arith.constant 0 : i32
    return %c0_i32, %c0_i32_0 : i32, i32
  }
  func.func @transform_4(%arg0: i32) -> (i32, i32) {
    %c0_i32 = arith.constant 0 : i32
    %c0_i32_0 = arith.constant 0 : i32
    %c0_i32_1 = arith.constant 0 : i32
    return %c0_i32, %c0_i32_0 : i32, i32
  }
  func.func @transform_5(%arg0: i32) -> (i32, i32) {
    %c0_i32 = arith.constant 0 : i32
    %c0_i32_0 = arith.constant 0 : i32
    %c0_i32_1 = arith.constant 0 : i32
    return %c0_i32, %c0_i32_0 : i32, i32
  }
  func.func @transform_6(%arg0: i32) -> (i32, i32) {
    %c0_i32 = arith.constant 0 : i32
    %c0_i32_0 = arith.constant 0 : i32
    %c0_i32_1 = arith.constant 0 : i32
    return %c0_i32, %c0_i32_0 : i32, i32
  }
  func.func @transform_7(%arg0: i32) -> (i32, i32) {
    %c0_i32 = arith.constant 0 : i32
    %c0_i32_0 = arith.constant 0 : i32
    %c0_i32_1 = arith.constant 0 : i32
    return %c0_i32, %c0_i32_0 : i32, i32
  }
  func.func @transform_8(%arg0: i32) -> (i32, i32) {
    %c0_i32 = arith.constant 0 : i32
    %c0_i32_0 = arith.constant 0 : i32
    %c0_i32_1 = arith.constant 0 : i32
    return %c0_i32, %c0_i32_0 : i32, i32
  }
  func.func @transform_9(%arg0: i32) -> (i32, i32) {
    %c0_i32 = arith.constant 0 : i32
    %c0_i32_0 = arith.constant 0 : i32
    %c0_i32_1 = arith.constant 0 : i32
    return %c0_i32, %c0_i32_0 : i32, i32
  }
  func.func @transform_10(%arg0: i32) -> (i32, i32) {
    %c0_i32 = arith.constant 0 : i32
    %c0_i32_0 = arith.constant 0 : i32
    %c0_i32_1 = arith.constant 0 : i32
    return %c0_i32, %c0_i32_0 : i32, i32
  }
  func.func @transform_11(%arg0: i32) -> (i32, i32) {
    %c0_i32 = arith.constant 0 : i32
    %c0_i32_0 = arith.constant 0 : i32
    %c0_i32_1 = arith.constant 0 : i32
    return %c0_i32, %c0_i32_0 : i32, i32
  }
  func.func @transform_12(%arg0: i32) -> (i32, i32) {
    %c0_i32 = arith.constant 0 : i32
    %c0_i32_0 = arith.constant 0 : i32
    %c0_i32_1 = arith.constant 0 : i32
    return %c0_i32, %c0_i32_0 : i32, i32
  }
}

</mosaic_0001>

<bundles_post_ra>
// kernel: lstm_model_forward.1
= control target key start
LH: loop header
LB: loop body
LE: loop exit
PB: predicated region body
PF: predicated region fallthrough
CT: control target
= control target key end

     0   :  { %17 = vsyncpa [#allocation5], 0  ;;  %s7991_s0 = inlined_call_operand.vmem [shape: f32[64,128], index: 0, kind: input, shape index: {}]   ;;  %s7992_s1 = inlined_call_operand.vmem [shape: f32[64,1], index: 1, kind: input, shape index: {}]   ;;  %s7993_s2 = inlined_call_operand.hbm [shape: f32[128,512], index: 2, kind: input, shape index: {}]   ;;  %s7994_s3 = inlined_call_operand.hbm [shape: f32[128,512], index: 3, kind: input, shape index: {}]   ;;  %s7995_s4 = inlined_call_operand.vmem [shape: f32[1,512], index: 4, kind: input, shape index: {}]   ;;  %s7996_s5 = inlined_call_operand.hbm [shape: f32[128,512], index: 5, kind: input, shape index: {}]   ;;  %s7997_s6 = inlined_call_operand.hbm [shape: f32[128,512], index: 6, kind: input, shape index: {}]   ;;  %s7998_s7 = inlined_call_operand.vmem [shape: f32[1,512], index: 7, kind: input, shape index: {}]   ;;  %s7999_s8 = inlined_call_operand.hbm [shape: f32[128,256], index: 8, kind: input, shape index: {}]   ;;  %s8000_s9 = inlined_call_operand.vmem [shape: f32[1,256], index: 9, kind: input, shape index: {}]   ;;  %s8001_s10 = inlined_call_operand.vmem [shape: f32[256,128], index: 10, kind: input, shape index: {}]   ;;  %s8002_s11 = inlined_call_operand.vmem [shape: f32[1,128], index: 11, kind: input, shape index: {}]   ;;  %s8003_s12 = inlined_call_operand.vmem [shape: f32[8,128], index: 12, kind: output, shape index: {}]  }
   0x1   :  { %18 = vsyncpa [#allocation7], 0 }
   0x2   :  { %19 = vsyncpa [#allocation10], 0  ;;  %s6559_s21 = smov [#allocation6]   ;;  %s6560_s23 = smov [#allocation9]  }
   0x3   :  { %s41_s22 = sshll.u32 %s6559_s21, 4  ;;  %s67_s24 = sshll.u32 %s6560_s23, 4  ;;  %s42_s22 = int_to_ptr.vmem [resolvable:$true] %s41_s22  ;;  %s6635_s24 = int_to_ptr.vmem [resolvable:$true] %s67_s24 }
   0x4   :  { %s6443_s27 = scalar_lea.hbm %s7994_s3, 8192 }
   0x5   :  { %p6444_p0 = scmp.ne.s32.totalorder %s7994_s3, %s6443_s27  ;;  %p6447_p1 = scmp.lt.u32.totalorder %s6443_s27, %s7994_s3 }
   0x7   :  { %p6449_p2 = pnand %p6447_p1, %p6444_p0 }
   0x9   :  { %6452 = shalt.err (!%p6449_p2)
}
   0xa   :  { %s6453_s14 = scalar_lea.vmem %s42_s22, 8192  ;;  %p6458_p4 = scmp.lt.s32.totalorder %s42_s22, %s42_s22 }
   0xb   :  { %p6454_p3 = scmp.ne.s32.totalorder %s42_s22, %s6453_s14  ;;  %p6459_p5 = scmp.lt.s32.totalorder %s6453_s14, %s6453_s14 }
   0xd   :  { %p6460_p6 = por %p6459_p5, %p6458_p4 }
   0xf   :  { %p6461_p7 = pnand %p6460_p6, %p6454_p3 }
  0x11   :  { %6464 = shalt.err (!%p6461_p7)
}
  0x12   :  { %s6561_s15 = smov 512   ;;  %s6562_s16 = smov 32  }
  0x13   :  { %47 = dma.hbm_to_vmem [thread:$0]  %s7994_s3, 8192, %s42_s22, [#allocation7], %s6561_s15, %s6561_s15, %s6562_s16  }
  0x14   :  { %s6465_s21 = scalar_lea.hbm %s7997_s6, 8192 }
  0x15   :  { %p6466_p8 = scmp.ne.s32.totalorder %s7997_s6, %s6465_s21  ;;  %p6469_p9 = scmp.lt.u32.totalorder %s6465_s21, %s7997_s6 }
  0x17   :  { %p6471_p10 = pnand %p6469_p9, %p6466_p8 }
  0x19   :  { %6474 = shalt.err (!%p6471_p10)
}
  0x1a   :  { %s6475_s28 = scalar_lea.vmem %s6635_s24, 8192  ;;  %p6480_p12 = scmp.lt.s32.totalorder %s6635_s24, %s6635_s24 }
  0x1b   :  { %p6476_p11 = scmp.ne.s32.totalorder %s6635_s24, %s6475_s28  ;;  %p6481_p13 = scmp.lt.s32.totalorder %s6475_s28, %s6475_s28 }
  0x1d   :  { %p6482_p0 = por %p6481_p13, %p6480_p12 }
  0x1f   :  { %p6483_p1 = pnand %p6482_p0, %p6476_p11 }
  0x21   :  { %6486 = shalt.err (!%p6483_p1)
}
  0x22   :  { %73 = dma.hbm_to_vmem [thread:$0]  %s7997_s6, 8192, %s6635_s24, [#allocation10], %s6561_s15, %s6561_s15, %s6562_s16  }
  0x23   :  { %s6563_s29 = smov [#allocation4]   ;;  %s6564_s13 = smov [#allocation8]  }
  0x24   :  { %s29_s30 = sshll.u32 %s6563_s29, 4  ;;  %s55_s14 = sshll.u32 %s6564_s13, 4  ;;  %s30_s30 = int_to_ptr.vmem [resolvable:$true] %s29_s30  ;;  %s6672_s14 = int_to_ptr.vmem [resolvable:$true] %s55_s14 }
  0x25   :  { %s6487_s19 = scalar_lea.hbm %s7993_s2, 8192 }
  0x26   :  { %p6488_p2 = scmp.ne.s32.totalorder %s7993_s2, %s6487_s19  ;;  %p6491_p3 = scmp.lt.u32.totalorder %s6487_s19, %s7993_s2 }
  0x28   :  { %p6493_p4 = pnand %p6491_p3, %p6488_p2 }
  0x2a   :  { %6496 = shalt.err (!%p6493_p4)
}
  0x2b   :  { %s6497_s6 = scalar_lea.vmem %s30_s30, 8192  ;;  %p6502_p6 = scmp.lt.s32.totalorder %s30_s30, %s30_s30 }
  0x2c   :  { %p6498_p5 = scmp.ne.s32.totalorder %s30_s30, %s6497_s6  ;;  %p6503_p7 = scmp.lt.s32.totalorder %s6497_s6, %s6497_s6 }
  0x2e   :  { %p6504_p8 = por %p6503_p7, %p6502_p6 }
  0x30   :  { %p6505_p9 = pnand %p6504_p8, %p6498_p5 }
  0x32   :  { %6508 = shalt.err (!%p6505_p9)
}
  0x33   :  { %35 = dma.hbm_to_vmem [thread:$0]  %s7993_s2, 8192, %s30_s30, [#allocation5], %s6561_s15, %s6561_s15, %s6562_s16  }
  0x34   :  { %s6509_s3 = scalar_lea.hbm %s7996_s5, 8192 }
  0x35   :  { %p6510_p10 = scmp.ne.s32.totalorder %s7996_s5, %s6509_s3  ;;  %p6513_p11 = scmp.lt.u32.totalorder %s6509_s3, %s7996_s5 }
  0x37   :  { %p6515_p12 = pnand %p6513_p11, %p6510_p10 }
  0x39   :  { %6518 = shalt.err (!%p6515_p12)
}
  0x3a   :  { %s6519_s18 = scalar_lea.vmem %s6672_s14, 8192  ;;  %p6524_p0 = scmp.lt.s32.totalorder %s6672_s14, %s6672_s14 }
  0x3b   :  { %p6520_p13 = scmp.ne.s32.totalorder %s6672_s14, %s6519_s18  ;;  %p6525_p1 = scmp.lt.s32.totalorder %s6519_s18, %s6519_s18 }
  0x3d   :  { %p6526_p2 = por %p6525_p1, %p6524_p0 }
  0x3f   :  { %p6527_p3 = pnand %p6526_p2, %p6520_p13 }
  0x41   :  { %6530 = shalt.err (!%p6527_p3)
}
  0x42   :  { %61 = dma.hbm_to_vmem [thread:$0]  %s7996_s5, 8192, %s6672_s14, [#allocation7], %s6561_s15, %s6561_s15, %s6562_s16  }
  0x43   :  { %s6565_s19 = smov [#allocation11]   ;;  %s6531_s25 = scalar_lea.hbm %s7999_s8, 4096 }
  0x44   :  { %s81_s20 = sshll.u32 %s6565_s19, 4  ;;  %p6532_p4 = scmp.ne.s32.totalorder %s7999_s8, %s6531_s25  ;;  %s82_s20 = int_to_ptr.vmem [resolvable:$true] %s81_s20 }
  0x45   :  { %p6535_p5 = scmp.lt.u32.totalorder %s6531_s25, %s7999_s8 }
  0x47   :  { %p6537_p6 = pnand %p6535_p5, %p6532_p4 }
  0x49   :  { %6540 = shalt.err (!%p6537_p6)
}
  0x4a   :  { %s6541_s28 = scalar_lea.vmem %s82_s20, 4096  ;;  %p6546_p8 = scmp.lt.s32.totalorder %s82_s20, %s82_s20 }
  0x4b   :  { %p6542_p7 = scmp.ne.s32.totalorder %s82_s20, %s6541_s28  ;;  %p6547_p9 = scmp.lt.s32.totalorder %s6541_s28, %s6541_s28 }
  0x4d   :  { %p6548_p10 = por %p6547_p9, %p6546_p8 }
  0x4f   :  { %p6549_p11 = pnand %p6548_p10, %p6542_p7 }
  0x51   :  { %6552 = shalt.err (!%p6549_p11)
}
  0x52   :  { %s6566_s5 = smov 256   ;;  %s6567_s15 = smov 16  }
  0x53   :  { %87 = dma.hbm_to_vmem [thread:$0]  %s7999_s8, 4096, %s82_s20, [#allocation10], %s6566_s5, %s6566_s5, %s6567_s15  }
  0x54   :  { %6553 = dma.done.wait [#allocation5], 8192  }
  0x55   :  { %6554 = vsyncadd [#allocation5], 4294959104 }
  0x56   :  { %6555 = dma.done.wait [#allocation7], 16384  }
  0x57   :  { %6556 = vsyncadd [#allocation7], 4294950912 }
  0x58   :  { %6557 = dma.done.wait [#allocation10], 12288  }
  0x59   :  { %6558 = vsyncadd [#allocation10], 4294955008  ;;  %v6568_v0 = vmov 0.0   ;;  %v6569_v1 = vmov 0   ;;  %v118_v2 = vld [vmem:[#allocation4 + $0x8] sm:$0xff]  ;;  %v120_v4 = vld [vmem:[#allocation4 + $0x18] sm:$0xff] }
  0x5a   :  { %267 = vmatprep.mubr.f32.mxu0 %v6568_v0  ;;  %380 = vmatprep.mubr.f32.mxu1 %v6568_v0  ;;  %v122_v3 = vld [vmem:[#allocation4 + $0x28] sm:$0xff]  ;;  %v124_v6 = vld [vmem:[#allocation4 + $0x38] sm:$0xff]  ;;  %v117_v7 = vld [vmem:[#allocation4] sm:$0xff] }
  0x5b   :  { %6185 = vset.pattern.permute.xlu0 %v6569_v1  ;;  %6186 = vset.pattern.permute.xlu1 %v6569_v1  ;;  %v4830_v5 = vpack.c.bf16 %v122_v3, %v118_v2  ;;  %v121_v8 = vld [vmem:[#allocation4 + $0x20] sm:$0xff]  ;;  %v4862_v9 = vpack.c.bf16 %v124_v6, %v120_v4  ;;  %v119_v11 = vld [vmem:[#allocation4 + $0x10] sm:$0xff]  ;;  %v126_v13 = vld [vmem:[#allocation4 + $0x48] sm:$0xff] }
  0x5c   :  { %v4832_v10 = vpack.c.bf16 %v121_v8, %v117_v7  ;;  %v123_v12 = vld [vmem:[#allocation4 + $0x30] sm:$0xff]  ;;  %v130_v15 = vld [vmem:[#allocation4 + $0x68] sm:$0xff]  ;;  %v128_v16 = vld [vmem:[#allocation4 + $0x58] sm:$0xff] }
  0x5d   :  { %4831 = vmatprep.subr.bf16.mxu0 %v4830_v5  ;;  %v4864_v14 = vpack.c.bf16 %v123_v12, %v119_v11  ;;  %v132_v17 = vld [vmem:[#allocation4 + $0x78] sm:$0xff]  ;;  %4863 = vmatprep.subr.bf16.mxu1 %v4862_v9  ;;  %v4834_v18 = vpack.c.bf16 %v130_v15, %v126_v13  ;;  %v125_v20 = vld [vmem:[#allocation4 + $0x40] sm:$0xff]  ;;  %v127_v22 = vld [vmem:[#allocation4 + $0x50] sm:$0xff] }
  0x5e   :  { %4833 = vmatpush1.bf16.msra.mxu0 %v4832_v10  ;;  %v4866_v19 = vpack.c.bf16 %v132_v17, %v128_v16  ;;  %v129_v21 = vld [vmem:[#allocation4 + $0x60] sm:$0xff]  ;;  %v131_v24 = vld [vmem:[#allocation4 + $0x70] sm:$0xff]  ;;  %v134_v25 = vld [vmem:[#allocation4 + $0x88] sm:$0xff] }
  0x5f   :  { %4865 = vmatpush1.bf16.msra.mxu1 %v4864_v14  ;;  %v4836_v23 = vpack.c.bf16 %v129_v21, %v125_v20  ;;  %v138_v26 = vld [vmem:[#allocation4 + $0xa8] sm:$0xff]  ;;  %4835 = vmatprep.subr.bf16.mxu0 %v4834_v18  ;;  %v4868_v27 = vpack.c.bf16 %v131_v24, %v127_v22  ;;  %v136_v29 = vld [vmem:[#allocation4 + $0x98] sm:$0xff]  ;;  %v133_v31 = vld [vmem:[#allocation4 + $0x80] sm:$0xff] }
  0x60   :  { %4867 = vmatprep.subr.bf16.mxu1 %v4866_v19  ;;  %v4838_v28 = vpack.c.bf16 %v138_v26, %v134_v25  ;;  %v140_v30 = vld [vmem:[#allocation4 + $0xb8] sm:$0xff]  ;;  %v137_v33 = vld [vmem:[#allocation4 + $0xa0] sm:$0xff]  ;;  %v135_v34 = vld [vmem:[#allocation4 + $0x90] sm:$0xff] }
  0x61   :  { %v4870_v32 = vpack.c.bf16 %v140_v30, %v136_v29  ;;  %v139_v35 = vld [vmem:[#allocation4 + $0xb0] sm:$0xff]  ;;  %v4840_v36 = vpack.c.bf16 %v137_v33, %v133_v31  ;;  %v142_v37 = vld [vmem:[#allocation4 + $0xc8] sm:$0xff]  ;;  %v144_v39 = vld [vmem:[#allocation4 + $0xd8] sm:$0xff] }
  0x62   :  { %4837 = vmatpush1.bf16.msra.mxu0 %v4836_v23  ;;  %v146_v38 = vld [vmem:[#allocation4 + $0xe8] sm:$0xff]  ;;  %v4872_v40 = vpack.c.bf16 %v139_v35, %v135_v34  ;;  %v148_v42 = vld [vmem:[#allocation4 + $0xf8] sm:$0xff]  ;;  %v141_v43 = vld [vmem:[#allocation4 + $0xc0] sm:$0xff] }
  0x63   :  { %4869 = vmatpush1.bf16.msra.mxu1 %v4868_v27  ;;  %4839 = vmatprep.subr.bf16.mxu0 %v4838_v28  ;;  %v4842_v41 = vpack.c.bf16 %v146_v38, %v142_v37  ;;  %v145_v44 = vld [vmem:[#allocation4 + $0xe0] sm:$0xff]  ;;  %v4874_v45 = vpack.c.bf16 %v148_v42, %v144_v39  ;;  %v143_v46 = vld [vmem:[#allocation4 + $0xd0] sm:$0xff]  ;;  %v150_v48 = vld [vmem:[#allocation4 + $0x108] sm:$0xff] }
  0x64   :  { %4871 = vmatprep.subr.bf16.mxu1 %v4870_v32  ;;  %v147_v47 = vld [vmem:[#allocation4 + $0xf0] sm:$0xff]  ;;  %v154_v49 = vld [vmem:[#allocation4 + $0x128] sm:$0xff]  ;;  %v152_v50 = vld [vmem:[#allocation4 + $0x118] sm:$0xff]  ;;  %v4844_v52 = vpack.c.bf16 %v145_v44, %v141_v43 }
  0x65   :  { %v156_v51 = vld [vmem:[#allocation4 + $0x138] sm:$0xff]  ;;  %v4876_v53 = vpack.c.bf16 %v147_v47, %v143_v46  ;;  %v4846_v54 = vpack.c.bf16 %v154_v49, %v150_v48  ;;  %v149_v55 = vld [vmem:[#allocation4 + $0x100] sm:$0xff]  ;;  %v151_v57 = vld [vmem:[#allocation4 + $0x110] sm:$0xff] }
  0x66   :  { %4841 = vmatpush1.bf16.msra.mxu0 %v4840_v36  ;;  %v153_v56 = vld [vmem:[#allocation4 + $0x120] sm:$0xff]  ;;  %v4878_v58 = vpack.c.bf16 %v156_v51, %v152_v50  ;;  %v155_v59 = vld [vmem:[#allocation4 + $0x130] sm:$0xff]  ;;  %v158_v60 = vld [vmem:[#allocation4 + $0x148] sm:$0xff] }
  0x67   :  { %4873 = vmatpush1.bf16.msra.mxu1 %v4872_v40  ;;  %4843 = vmatprep.subr.bf16.mxu0 %v4842_v41  ;;  %v162_v61 = vld [vmem:[#allocation4 + $0x168] sm:$0xff]  ;;  %v160_v62 = vld [vmem:[#allocation4 + $0x158] sm:$0xff]  ;;  %v4848_v1 = vpack.c.bf16 %v153_v56, %v149_v55  ;;  %v4880_v2 = vpack.c.bf16 %v155_v59, %v151_v57  ;;  %v157_v4 = vld [vmem:[#allocation4 + $0x140] sm:$0xff] }
  0x68   :  { %4875 = vmatprep.subr.bf16.mxu1 %v4874_v45  ;;  %v164_v63 = vld [vmem:[#allocation4 + $0x178] sm:$0xff]  ;;  %v4850_v3 = vpack.c.bf16 %v162_v61, %v158_v60  ;;  %v161_v5 = vld [vmem:[#allocation4 + $0x160] sm:$0xff]  ;;  %v159_v6 = vld [vmem:[#allocation4 + $0x150] sm:$0xff] }
  0x69   :  { %v4882_v7 = vpack.c.bf16 %v164_v63, %v160_v62  ;;  %v163_v8 = vld [vmem:[#allocation4 + $0x170] sm:$0xff]  ;;  %v166_v9 = vld [vmem:[#allocation4 + $0x188] sm:$0xff]  ;;  %v168_v11 = vld [vmem:[#allocation4 + $0x198] sm:$0xff]  ;;  %v4852_v13 = vpack.c.bf16 %v161_v5, %v157_v4 }
  0x6a   :  { %4845 = vmatpush1.bf16.msra.mxu0 %v4844_v52  ;;  %v170_v10 = vld [vmem:[#allocation4 + $0x1a8] sm:$0xff]  ;;  %v172_v12 = vld [vmem:[#allocation4 + $0x1b8] sm:$0xff]  ;;  %v4884_v14 = vpack.c.bf16 %v163_v8, %v159_v6  ;;  %v165_v16 = vld [vmem:[#allocation4 + $0x180] sm:$0xff] }
  0x6b   :  { %4877 = vmatpush1.bf16.msra.mxu1 %v4876_v53  ;;  %4847 = vmatprep.subr.bf16.mxu0 %v4846_v54  ;;  %v4854_v15 = vpack.c.bf16 %v170_v10, %v166_v9  ;;  %v169_v17 = vld [vmem:[#allocation4 + $0x1a0] sm:$0xff]  ;;  %v167_v18 = vld [vmem:[#allocation4 + $0x190] sm:$0xff]  ;;  %v4886_v19 = vpack.c.bf16 %v172_v12, %v168_v11  ;;  %v174_v21 = vld [vmem:[#allocation4 + $0x1c8] sm:$0xff] }
  0x6c   :  { %4879 = vmatprep.subr.bf16.mxu1 %v4878_v58  ;;  %v171_v20 = vld [vmem:[#allocation4 + $0x1b0] sm:$0xff]  ;;  %v178_v22 = vld [vmem:[#allocation4 + $0x1e8] sm:$0xff]  ;;  %v176_v23 = vld [vmem:[#allocation4 + $0x1d8] sm:$0xff]  ;;  %v4856_v25 = vpack.c.bf16 %v169_v17, %v165_v16 }
  0x6d   :  { %v180_v24 = vld [vmem:[#allocation4 + $0x1f8] sm:$0xff]  ;;  %v4888_v26 = vpack.c.bf16 %v171_v20, %v167_v18  ;;  %v4858_v27 = vpack.c.bf16 %v178_v22, %v174_v21  ;;  %v173_v28 = vld [vmem:[#allocation4 + $0x1c0] sm:$0xff]  ;;  %v175_v30 = vld [vmem:[#allocation4 + $0x1d0] sm:$0xff] }
  0x6e   :  { %4849 = vmatpush1.bf16.msra.mxu0 %v4848_v1  ;;  %v177_v29 = vld [vmem:[#allocation4 + $0x1e0] sm:$0xff]  ;;  %v4890_v31 = vpack.c.bf16 %v180_v24, %v176_v23  ;;  %v179_v32 = vld [vmem:[#allocation4 + $0x1f0] sm:$0xff]  ;;  %v469_v33 = vld [vmem:[#allocation6 + $0x8] sm:$0xff] }
  0x6f   :  { %4881 = vmatpush1.bf16.msra.mxu1 %v4880_v2  ;;  %4851 = vmatprep.subr.bf16.mxu0 %v4850_v3  ;;  %v473_v34 = vld [vmem:[#allocation6 + $0x28] sm:$0xff]  ;;  %v471_v35 = vld [vmem:[#allocation6 + $0x18] sm:$0xff]  ;;  %v4860_v37 = vpack.c.bf16 %v177_v29, %v173_v28  ;;  %v4892_v38 = vpack.c.bf16 %v179_v32, %v175_v30  ;;  %v468_v40 = vld [vmem:[#allocation6] sm:$0xff] }
  0x70   :  { %4883 = vmatprep.subr.bf16.mxu1 %v4882_v7  ;;  %v475_v36 = vld [vmem:[#allocation6 + $0x38] sm:$0xff]  ;;  %v6723_v39 = vpack.c.bf16 %v473_v34, %v469_v33  ;;  %v472_v41 = vld [vmem:[#allocation6 + $0x20] sm:$0xff]  ;;  %v470_v43 = vld [vmem:[#allocation6 + $0x10] sm:$0xff] }
  0x71   :  { %v6725_v42 = vpack.c.bf16 %v475_v36, %v471_v35  ;;  %v474_v44 = vld [vmem:[#allocation6 + $0x30] sm:$0xff]  ;;  %v477_v45 = vld [vmem:[#allocation6 + $0x48] sm:$0xff]  ;;  %v109_v47 = vld [vmem:[%s7991_s0] sm:$0xff]  ;;  %v6730_v48 = vpack.c.bf16 %v472_v41, %v468_v40 }
  0x72   :  { %4853 = vmatpush1.bf16.msra.mxu0 %v4852_v13  ;;  %v481_v46 = vld [vmem:[#allocation6 + $0x68] sm:$0xff]  ;;  %v479_v49 = vld [vmem:[#allocation6 + $0x58] sm:$0xff]  ;;  %v6733_v51 = vpack.c.bf16 %v474_v44, %v470_v43  ;;  %v476_v52 = vld [vmem:[#allocation6 + $0x40] sm:$0xff] }
  0x73   :  { %4885 = vmatpush1.bf16.msra.mxu1 %v4884_v14  ;;  %4855 = vmatprep.subr.bf16.mxu0 %v4854_v15  ;;  %v483_v50 = vld [vmem:[#allocation6 + $0x78] sm:$0xff]  ;;  %v480_v53 = vld [vmem:[#allocation6 + $0x60] sm:$0xff]  ;;  %v6736_v54 = vpack.c.bf16 %v481_v46, %v477_v45  ;;  %v478_v55 = vld [vmem:[#allocation6 + $0x50] sm:$0xff] }
  0x74   :  { %4887 = vmatprep.subr.bf16.mxu1 %v4886_v19  ;;  %v482_v56 = vld [vmem:[#allocation6 + $0x70] sm:$0xff]  ;;  %v6738_v57 = vpack.c.bf16 %v483_v50, %v479_v49  ;;  %v485_v58 = vld [vmem:[#allocation6 + $0x88] sm:$0xff]  ;;  %v6744_v61 = vpack.c.bf16 %v480_v53, %v476_v52  ;;  %v487_v62 = vld [vmem:[#allocation6 + $0x98] sm:$0xff] }
  0x75   :  { %v489_v59 = vld [vmem:[#allocation6 + $0xa8] sm:$0xff]  ;;  %v491_v63 = vld [vmem:[#allocation6 + $0xb8] sm:$0xff]  ;;  %v6748_v1 = vpack.c.bf16 %v482_v56, %v478_v55  ;;  %v484_v2 = vld [vmem:[#allocation6 + $0x80] sm:$0xff] }
  0x76   :  { %4857 = vmatpush1.bf16.msra.mxu0 %v4856_v25  ;;  %v110_v60 = vld [vmem:[%s7991_s0 + $0x8] sm:$0xff]  ;;  %v488_v3 = vld [vmem:[#allocation6 + $0xa0] sm:$0xff]  ;;  %v6752_v4 = vpack.c.bf16 %v489_v59, %v485_v58  ;;  %v486_v5 = vld [vmem:[#allocation6 + $0x90] sm:$0xff]  ;;  %v6755_v7 = vpack.c.bf16 %v491_v63, %v487_v62 }
  0x77   :  { %4889 = vmatpush1.bf16.msra.mxu1 %v4888_v26  ;;  %4859 = vmatprep.subr.bf16.mxu0 %v4858_v27  ;;  %v490_v6 = vld [vmem:[#allocation6 + $0xb0] sm:$0xff]  ;;  %v493_v8 = vld [vmem:[#allocation6 + $0xc8] sm:$0xff]  ;;  %v6761_v11 = vpack.c.bf16 %v488_v3, %v484_v2  ;;  %v495_v12 = vld [vmem:[#allocation6 + $0xd8] sm:$0xff] }
  0x78   :  { %4891 = vmatprep.subr.bf16.mxu1 %v4890_v31  ;;  %v497_v9 = vld [vmem:[#allocation6 + $0xe8] sm:$0xff]  ;;  %v111_v10 = vld [vmem:[%s7991_s0 + $0x10] sm:$0xff]  ;;  %v499_v13 = vld [vmem:[#allocation6 + $0xf8] sm:$0xff]  ;;  %v6765_v14 = vpack.c.bf16 %v490_v6, %v486_v5 }
  0x79   :  { %v492_v15 = vld [vmem:[#allocation6 + $0xc0] sm:$0xff]  ;;  %v6769_v17 = vpack.c.bf16 %v497_v9, %v493_v8  ;;  %v494_v18 = vld [vmem:[#allocation6 + $0xd0] sm:$0xff]  ;;  %v6772_v20 = vpack.c.bf16 %v499_v13, %v495_v12  ;;  %v501_v21 = vld [vmem:[#allocation6 + $0x108] sm:$0xff] }
  0x7a   :  { %4861 = vmatpush1.bf16.msra.mxu0 %v4860_v37  ;;  %v496_v16 = vld [vmem:[#allocation6 + $0xe0] sm:$0xff]  ;;  %v498_v19 = vld [vmem:[#allocation6 + $0xf0] sm:$0xff]  ;;  %v505_v22 = vld [vmem:[#allocation6 + $0x128] sm:$0xff] }
  0x7b   :  { %4893 = vmatpush1.bf16.msra.mxu1 %v4892_v38  ;;  %4895 = vmatprep.subr.bf16.mxu0 %v6723_v39  ;;  %v112_v23 = vld [vmem:[%s7991_s0 + $0x18] sm:$0xff]  ;;  %v6778_v24 = vpack.c.bf16 %v496_v16, %v492_v15  ;;  %v6782_v27 = vpack.c.bf16 %v498_v19, %v494_v18  ;;  %v500_v28 = vld [vmem:[#allocation6 + $0x100] sm:$0xff]  ;;  %v6786_v30 = vpack.c.bf16 %v505_v22, %v501_v21  ;;  %v502_v31 = vld [vmem:[#allocation6 + $0x110] sm:$0xff] }
  0x7c   :  { %4927 = vmatprep.subr.bf16.mxu1 %v6725_v42  ;;  %v503_v25 = vld [vmem:[#allocation6 + $0x118] sm:$0xff]  ;;  %v504_v29 = vld [vmem:[#allocation6 + $0x120] sm:$0xff]  ;;  %v506_v32 = vld [vmem:[#allocation6 + $0x130] sm:$0xff] }
  0x7d   :  { %268 = vmatmul.mubr.f32.vlgmr.msra.gmra.mrb[0].mxu0 %v109_v47  ;;  %v507_v26 = vld [vmem:[#allocation6 + $0x138] sm:$0xff]  ;;  %v509_v34 = vld [vmem:[#allocation6 + $0x148] sm:$0xff]  ;;  %v113_v36 = vld [vmem:[%s7991_s0 + $0x20] sm:$0xff]  ;;  %v6795_v37 = vpack.c.bf16 %v504_v29, %v500_v28  ;;  %v6799_v41 = vpack.c.bf16 %v506_v32, %v502_v31 }
  0x7e   :  { %381 = vmatmul.mubr.f32.vlgmr.msra.gmra.mrb[0].mxu1 %v109_v47  ;;  %4897 = vmatpush1.bf16.msra.mxu0 %v6730_v48  ;;  %v6789_v33 = vpack.c.bf16 %v507_v26, %v503_v25  ;;  %v513_v35 = vld [vmem:[#allocation6 + $0x168] sm:$0xff]  ;;  %v511_v38 = vld [vmem:[#allocation6 + $0x158] sm:$0xff]  ;;  %v508_v43 = vld [vmem:[#allocation6 + $0x140] sm:$0xff] }
  0x7f   :  { %4929 = vmatpush1.bf16.msra.mxu1 %v6733_v51  ;;  %273 = vmatprep.mubr.f32.mxu0 %v6568_v0  ;;  %v515_v40 = vld [vmem:[#allocation6 + $0x178] sm:$0xff]  ;;  %v512_v44 = vld [vmem:[#allocation6 + $0x160] sm:$0xff]  ;;  %v6803_v45 = vpack.c.bf16 %v513_v35, %v509_v34  ;;  %v510_v46 = vld [vmem:[#allocation6 + $0x150] sm:$0xff] }
  0x80   :  { %386 = vmatprep.mubr.f32.mxu1 %v6568_v0  ;;  %4899 = vmatprep.subr.bf16.mxu0 %v6736_v54  ;;  %v514_v47 = vld [vmem:[#allocation6 + $0x170] sm:$0xff]  ;;  %v6806_v49 = vpack.c.bf16 %v515_v40, %v511_v38  ;;  %v517_v50 = vld [vmem:[#allocation6 + $0x188] sm:$0xff]  ;;  %v6812_v55 = vpack.c.bf16 %v512_v44, %v508_v43  ;;  %v519_v56 = vld [vmem:[#allocation6 + $0x198] sm:$0xff] }
  0x81   :  { %274 = vmatmul.mubr.f32.gmra.mrb[2].mxu0 %v110_v60  ;;  %4931 = vmatprep.subr.bf16.mxu1 %v6738_v57  ;;  %v521_v52 = vld [vmem:[#allocation6 + $0x1a8] sm:$0xff]  ;;  %v523_v58 = vld [vmem:[#allocation6 + $0x1b8] sm:$0xff]  ;;  %v6816_v59 = vpack.c.bf16 %v514_v47, %v510_v46  ;;  %v520_v62 = vld [vmem:[#allocation6 + $0x1a0] sm:$0xff] }
  0x82   :  { %387 = vmatmul.mubr.f32.gmra.mrb[2].mxu1 %v110_v60  ;;  %4901 = vmatpush1.bf16.msra.mxu0 %v6744_v61  ;;  %v114_v53 = vld [vmem:[%s7991_s0 + $0x28] sm:$0xff]  ;;  %v516_v60 = vld [vmem:[#allocation6 + $0x180] sm:$0xff]  ;;  %v6820_v63 = vpack.c.bf16 %v521_v52, %v517_v50  ;;  %v518_v2 = vld [vmem:[#allocation6 + $0x190] sm:$0xff]  ;;  %v6823_v5 = vpack.c.bf16 %v523_v58, %v519_v56  ;;  %v183_v58 = vlaneseq }
  0x83   :  { %4933 = vmatpush1.bf16.msra.mxu1 %v6748_v1  ;;  %279 = vmatprep.mubr.f32.mxu0 %v6568_v0  ;;  %v522_v3 = vld [vmem:[#allocation6 + $0x1b0] sm:$0xff]  ;;  %v525_v6 = vld [vmem:[#allocation6 + $0x1c8] sm:$0xff]  ;;  %v527_v12 = vld [vmem:[#allocation6 + $0x1d8] sm:$0xff] }
  0x84   :  { %392 = vmatprep.mubr.f32.mxu1 %v6568_v0  ;;  %4903 = vmatprep.subr.bf16.mxu0 %v6752_v4  ;;  %v529_v8 = vld [vmem:[#allocation6 + $0x1e8] sm:$0xff]  ;;  %v115_v9 = vld [vmem:[%s7991_s0 + $0x30] sm:$0xff]  ;;  %v531_v13 = vld [vmem:[#allocation6 + $0x1f8] sm:$0xff]  ;;  %v6833_v15 = vpack.c.bf16 %v522_v3, %v518_v2 }
  0x85   :  { %280 = vmatmul.mubr.f32.gmra.mrb[4].mxu0 %v111_v10  ;;  %4935 = vmatprep.subr.bf16.mxu1 %v6755_v7  ;;  %v524_v16 = vld [vmem:[#allocation6 + $0x1c0] sm:$0xff]  ;;  %v6837_v19 = vpack.c.bf16 %v529_v8, %v525_v6  ;;  %v526_v21 = vld [vmem:[#allocation6 + $0x1d0] sm:$0xff]  ;;  %v116_v25 = vld [vmem:[%s7991_s0 + $0x38] sm:$0xff] }
  0x86   :  { %393 = vmatmul.mubr.f32.gmra.mrb[4].mxu1 %v111_v10  ;;  %4905 = vmatpush1.bf16.msra.mxu0 %v6761_v11  ;;  %v6829_v10 = vpack.c.bf16 %v520_v62, %v516_v60  ;;  %v528_v18 = vld [vmem:[#allocation6 + $0x1e0] sm:$0xff]  ;;  %v530_v22 = vld [vmem:[#allocation6 + $0x1f0] sm:$0xff]  ;;  %v6869_v32 = vld [vmem:[%s7992_s1 + $0x8] sm:$0xff] }
  0x87   :  { %4937 = vmatpush1.bf16.msra.mxu1 %v6765_v14  ;;  %285 = vmatprep.mubr.f32.mxu0 %v6568_v0  ;;  %v6846_v26 = vpack.c.bf16 %v528_v18, %v524_v16  ;;  %v6850_v28 = vpack.c.bf16 %v530_v22, %v526_v21  ;;  %v6858_v29 = vld [vmem:[%s7992_s1] sm:$0xff]  ;;  %v3331_v34 = vsub.f32 1.0, %v6869_v32  ;;  %v4739_v35 = vld [vmem:[%s7992_s1 + $0x10] sm:$0xff]  ;;  %v4743_v38 = vld [vmem:[%s7992_s1 + $0x18] sm:$0xff] }
  0x88   :  { %398 = vmatprep.mubr.f32.mxu1 %v6568_v0  ;;  %4907 = vmatprep.subr.bf16.mxu0 %v6769_v17  ;;  %v711_v31 = vsub.f32 1.0, %v6858_v29  ;;  %v1496_v40 = vsub.f32 1.0, %v4743_v38  ;;  %v4747_v43 = vld [vmem:[%s7992_s1 + $0x20] sm:$0xff]  ;;  %v4751_v46 = vld [vmem:[%s7992_s1 + $0x28] sm:$0xff]  ;;  %v4755_v50 = vld [vmem:[%s7992_s1 + $0x30] sm:$0xff] }
  0x89   :  { %286 = vmatmul.mubr.f32.gmra.mrb[6].mxu0 %v112_v23  ;;  %4939 = vmatprep.subr.bf16.mxu1 %v6772_v20  ;;  %v1758_v44 = vsub.f32 1.0, %v4747_v43  ;;  %v2020_v47 = vsub.f32 1.0, %v4751_v46  ;;  %v2282_v52 = vsub.f32 1.0, %v4755_v50  ;;  %v181_v60 = vld [vmem:[%s7995_s4] sm:$0xf] }
  0x8a   :  { %399 = vmatmul.mubr.f32.gmra.mrb[6].mxu1 %v112_v23  ;;  %4909 = vmatpush1.bf16.msra.mxu0 %v6778_v24  ;;  %v6840_v23 = vpack.c.bf16 %v531_v13, %v527_v12 }
  0x8b   :  { %4941 = vmatpush1.bf16.msra.mxu1 %v6782_v27  ;;  %291 = vmatprep.mubr.f32.mxu0 %v6568_v0 }
  0x8c   :  { %404 = vmatprep.mubr.f32.mxu1 %v6568_v0  ;;  %4911 = vmatprep.subr.bf16.mxu0 %v6786_v30 }
  0x8d   :  { %292 = vmatmul.mubr.f32.gmra.mrb[8].mxu0 %v113_v36  ;;  %4943 = vmatprep.subr.bf16.mxu1 %v6789_v33 }
  0x8e   :  { %405 = vmatmul.mubr.f32.gmra.mrb[8].mxu1 %v113_v36  ;;  %4913 = vmatpush1.bf16.msra.mxu0 %v6795_v37  ;;  %v1234_v36 = vsub.f32 1.0, %v4739_v35 }
  0x8f   :  { %4945 = vmatpush1.bf16.msra.mxu1 %v6799_v41  ;;  %297 = vmatprep.mubr.f32.mxu0 %v6568_v0 }
  0x90   :  { %410 = vmatprep.mubr.f32.mxu1 %v6568_v0  ;;  %4915 = vmatprep.subr.bf16.mxu0 %v6803_v45 }
  0x91   :  { %298 = vmatmul.mubr.f32.gmra.mrb[10].mxu0 %v114_v53  ;;  %4947 = vmatprep.subr.bf16.mxu1 %v6806_v49 }
  0x92   :  { %411 = vmatmul.mubr.f32.gmra.mrb[10].mxu1 %v114_v53  ;;  %4917 = vmatpush1.bf16.msra.mxu0 %v6812_v55  ;;  %v4759_v53 = vld [vmem:[%s7992_s1 + $0x38] sm:$0xff] }
  0x93   :  { %4949 = vmatpush1.bf16.msra.mxu1 %v6816_v59  ;;  %303 = vmatprep.mubr.f32.mxu0 %v6568_v0  ;;  %v4483_v56 = vsub.f32 1.0, %v4759_v53 }
  0x94   :  { %416 = vmatprep.mubr.f32.mxu1 %v6568_v0  ;;  %4919 = vmatprep.subr.bf16.mxu0 %v6820_v63 }
  0x95   :  { %304 = vmatmul.mubr.f32.gmra.mrb[12].mxu0 %v115_v9  ;;  %4951 = vmatprep.subr.bf16.mxu1 %v6823_v5 }
  0x96   :  { %417 = vmatmul.mubr.f32.gmra.mrb[12].mxu1 %v115_v9  ;;  %4921 = vmatpush1.bf16.msra.mxu0 %v6829_v10 }
  0x97   :  { %4953 = vmatpush1.bf16.msra.mxu1 %v6833_v15  ;;  %309 = vmatprep.mubr.f32.mxu0 %v6568_v0 }
  0x98   :  { %422 = vmatprep.mubr.f32.mxu1 %v6568_v0  ;;  %4923 = vmatprep.subr.bf16.mxu0 %v6837_v19 }
  0x99   :  { %310 = vmatmul.mubr.f32.gmra.mrb[14].mxu0 %v116_v25  ;;  %4955 = vmatprep.subr.bf16.mxu1 %v6840_v23 }
  0x9a   :  { %423 = vmatmul.mubr.f32.gmra.mrb[14].mxu1 %v116_v25  ;;  %4925 = vmatpush1.bf16.msra.mxu0 %v6846_v26 }
  0x9b   :  { %4957 = vmatpush1.bf16.msra.mxu1 %v6850_v28  ;;  %596 = vmatprep.mubr.f32.mxu0 %v6568_v0 }
  0x9c   :  { %667 = vmatprep.mubr.f32.mxu1 %v6568_v0  ;;  %705 = vperm.xlu0 %6185, %v6858_v29  }
  0x9d   :  { %597 = vmatmul.mubr.f32.vlgmr.msra.gmra.mrb[0].mxu0 %v6568_v0  ;;  %965 = vperm.xlu1 %6186, %v6869_v32  }
  0x9e   :  { %668 = vmatmul.mubr.f32.vlgmr.msra.gmra.mrb[0].mxu1 %v6568_v0  ;;  %4959 = vmatprep.subr.bf16.mxu0 %v6723_v39 }
  0x9f   :  { %4991 = vmatprep.subr.bf16.mxu1 %v6725_v42  ;;  %4961 = vmatpush1.bf16.msra.mxu0 %v6730_v48 }
  0xa0   :  { %714 = vperm.xlu0 %6185, %v711_v31   ;;  %4993 = vmatpush1.bf16.msra.mxu1 %v6733_v51 }
  0xa1   :  { %975 = vperm.xlu1 %6186, %v3331_v34   ;;  %4963 = vmatprep.subr.bf16.mxu0 %v6736_v54 }
  0xa2   :  { %4995 = vmatprep.subr.bf16.mxu1 %v6738_v57  ;;  %855 = vmatprep.mubr.f32.mxu0 %v6568_v0 }
  0xa3   :  { %4965 = vmatpush1.bf16.msra.mxu0 %v6744_v61  ;;  %926 = vmatprep.mubr.f32.mxu1 %v6568_v0 }
  0xa4   :  { %1227 = vperm.xlu0 %6185, %v4739_v35   ;;  %4997 = vmatpush1.bf16.msra.mxu1 %v6748_v1 }
  0xa5   :  { %4967 = vmatprep.subr.bf16.mxu0 %v6752_v4  ;;  %4999 = vmatprep.subr.bf16.mxu1 %v6755_v7 }
  0xa6   :  { %1237 = vperm.xlu1 %6186, %v1234_v36  }
  0xa7   :  { %4969 = vmatpush1.bf16.msra.mxu0 %v6761_v11 }
  0xa8   :  { %1489 = vperm.xlu0 %6185, %v4743_v38   ;;  %5001 = vmatpush1.bf16.msra.mxu1 %v6765_v14 }
  0xa9   :  { %4971 = vmatprep.subr.bf16.mxu0 %v6769_v17  ;;  %5003 = vmatprep.subr.bf16.mxu1 %v6772_v20 }
  0xaa   :  { %1499 = vperm.xlu1 %6186, %v1496_v40  }
  0xab   :  { %4973 = vmatpush1.bf16.msra.mxu0 %v6778_v24 }
  0xac   :  { %1751 = vperm.xlu0 %6185, %v4747_v43   ;;  %5005 = vmatpush1.bf16.msra.mxu1 %v6782_v27 }
  0xad   :  { %4975 = vmatprep.subr.bf16.mxu0 %v6786_v30  ;;  %5007 = vmatprep.subr.bf16.mxu1 %v6789_v33 }
  0xae   :  { %1761 = vperm.xlu1 %6186, %v1758_v44  }
  0xaf   :  { %4977 = vmatpush1.bf16.msra.mxu0 %v6795_v37 }
  0xb0   :  { %2013 = vperm.xlu0 %6185, %v4751_v46   ;;  %5009 = vmatpush1.bf16.msra.mxu1 %v6799_v41 }
  0xb1   :  { %4979 = vmatprep.subr.bf16.mxu0 %v6803_v45  ;;  %5011 = vmatprep.subr.bf16.mxu1 %v6806_v49 }
  0xb2   :  { %2023 = vperm.xlu1 %6186, %v2020_v47  }
  0xb3   :  { %4981 = vmatpush1.bf16.msra.mxu0 %v6812_v55 }
  0xb4   :  { %2275 = vperm.xlu0 %6185, %v4755_v50   ;;  %5013 = vmatpush1.bf16.msra.mxu1 %v6816_v59 }
  0xb5   :  { %4983 = vmatprep.subr.bf16.mxu0 %v6820_v63  ;;  %5015 = vmatprep.subr.bf16.mxu1 %v6823_v5 }
  0xb6   :  { %2285 = vperm.xlu1 %6186, %v2282_v52  }
  0xb7   :  { %4985 = vmatpush1.bf16.msra.mxu0 %v6829_v10 }
  0xb8   :  { %2537 = vperm.xlu0 %6185, %v4759_v53   ;;  %5017 = vmatpush1.bf16.msra.mxu1 %v6833_v15 }
  0xb9   :  { %4987 = vmatprep.subr.bf16.mxu0 %v6837_v19  ;;  %5019 = vmatprep.subr.bf16.mxu1 %v6840_v23 }
  0xba   :  { %3136 = vperm.xlu1 %6186, %v6858_v29  }
  0xbb   :  { %4989 = vmatpush1.bf16.msra.mxu0 %v6846_v26 }
  0xbc   :  { %3143 = vperm.xlu0 %6185, %v711_v31   ;;  %5021 = vmatpush1.bf16.msra.mxu1 %v6850_v28 }
  0xbd   :  { %5023 = vmatprep.subr.bf16.mxu0 %v6723_v39  ;;  %5055 = vmatprep.subr.bf16.mxu1 %v6725_v42  ;;  %v6935_v39 = vshrl.u32 %v183_v58, 7 }
  0xbe   :  { %3327 = vperm.xlu1 %6186, %v6869_v32  }
  0xbf   :  { %v6938_v42 = vsub.s32 0, %v6935_v39  ;;  %v6944_v62 = vsub.s32 1, %v6935_v39  ;;  %v197_v8 = vsub.s32 3, %v6935_v39  ;;  %v8004_v29 = vsub.s32 2, %v6935_v39 }
  0xc0   :  { %3334 = vperm.xlu0 %6185, %v3331_v34  }
  0xc1   :  { %v6947_v2 = vrot.slane %v181_v60, %v6938_v42  ;;  %v6950_v3 = vrot.slane %v181_v60, %v6944_v62  ;;  %v6957_v25 = vrot.slane %v181_v60, %v197_v8  ;;  %v6963_v32 = vrot.slane %v181_v60, %v8004_v29 }
  0xc2   :  { %3519 = vperm.xlu1 %6186, %v4739_v35  }
  0xc4   :  { %3526 = vperm.xlu0 %6185, %v1234_v36  }
  0xc6   :  { %3711 = vperm.xlu1 %6186, %v4743_v38  }
  0xc8   :  { %3718 = vperm.xlu0 %6185, %v1496_v40  }
  0xca   :  { %3903 = vperm.xlu1 %6186, %v4747_v43  }
  0xcc   :  { %3910 = vperm.xlu0 %6185, %v1758_v44  }
  0xce   :  { %4095 = vperm.xlu1 %6186, %v4751_v46  }
  0xd0   :  { %4102 = vperm.xlu0 %6185, %v2020_v47  }
  0xd2   :  { %4287 = vperm.xlu1 %6186, %v4755_v50  }
  0xd4   :  { %4294 = vperm.xlu0 %6185, %v2282_v52  }
  0xd6   :  { %4479 = vperm.xlu1 %6186, %v4759_v53  }
  0xd8   :  { %4486 = vperm.xlu0 %6185, %v4483_v56  }
 0x11b   :  { %v706_v44 = vpop.permute.xlu0 %705 }
 0x11f   :  { %v715_v60 = vpop.permute.xlu0 %714 }
 0x170   :  { %v598_v6 = vpop.f32.mrb[0].mxu0 }
 0x171   :  { %v6046_v9 = vadd.f32 %v598_v6, %v6947_v2  ;;  %v669_v12 = vpop.f32.mrb[0].mxu1  ;;  %v600_v13 = vpop.f32.mrb[1].mxu0  ;;  %v717_v6 = vmul.f32 0.0, %v715_v60  ;;  %v1264_v60 = vld [vmem:[#allocation6 + $0x68] sm:$0xff] }
 0x172   :  { %v6047_v16 = vadd.f32 %v600_v13, %v6950_v3  ;;  %v671_v18 = vpop.f32.mrb[1].mxu1  ;;  %v6062_v35 = vadd.f32 %v669_v12, %v6963_v32 }
 0x173   :  { %v4732_v21 = vmul.f32 -1.442695, %v6046_v9  ;;  %v6063_v31 = vadd.f32 %v671_v18, %v6957_v25 }
 0x174   :  { %v4733_v22 = vmul.f32 -1.442695, %v6047_v16 }
 0x175   :  { %6187 = vpow2.f32 %v4732_v21  ;;  %v4734_v34 = vmul.f32 -1.442695, %v6063_v31 }
 0x176   :  { %6189 = vpow2.f32 %v4733_v22 }
 0x177   :  { %6191 = vpow2.f32 %v4734_v34 }
 0x178   :  { %6193 = vtanh.f32 %v6062_v35  ;;  %v1252_v35 = vld [vmem:[#allocation6 + $0x8] sm:$0xff] }
 0x17f   :  { %v6188_v36 = vpop.eup %6187 }
 0x180   :  { %v6190_v38 = vpop.eup %6189  ;;  %v682_v40 = vadd.f32 1.0, %v6188_v36  ;;  %v1256_v36 = vld [vmem:[#allocation6 + $0x28] sm:$0xff] }
 0x181   :  { %v688_v43 = vadd.f32 1.0, %v6190_v38  ;;  %v6192_v46 = vpop.eup %6191  ;;  %v1254_v38 = vld [vmem:[#allocation6 + $0x18] sm:$0xff] }
 0x182   :  { %6195 = vrcp.f32 %v682_v40  ;;  %v6194_v47 = vpop.eup %6193  ;;  %v695_v53 = vadd.f32 1.0, %v6192_v46  ;;  %v7031_v40 = vpack.c.bf16 %v1256_v36, %v1252_v35  ;;  %v1255_v46 = vld [vmem:[#allocation6 + $0x20] sm:$0xff]  ;;  %v1284_v36 = vld [vmem:[#allocation6 + $0x108] sm:$0xff] }
 0x183   :  { %6197 = vrcp.f32 %v688_v43  ;;  %v1258_v43 = vld [vmem:[#allocation6 + $0x38] sm:$0xff] }
 0x184   :  { %6199 = vrcp.f32 %v695_v53  ;;  %v1257_v53 = vld [vmem:[#allocation6 + $0x30] sm:$0xff] }
 0x18c   :  { %v6196_v50 = vpop.eup %6195 }
 0x18d   :  { %v6198_v52 = vpop.eup %6197  ;;  %v699_v56 = vmul.f32 %v6196_v50, %v6194_v47  ;;  %v7033_v47 = vpack.c.bf16 %v1258_v43, %v1254_v38  ;;  %v1288_v38 = vld [vmem:[#allocation6 + $0x128] sm:$0xff]  ;;  %v1286_v43 = vld [vmem:[#allocation6 + $0x118] sm:$0xff] }
 0x18e   :  { %v698_v58 = vmul.f32 0.0, %v6198_v52  ;;  %v6200_v16 = vpop.eup %6199  ;;  %v1253_v52 = vld [vmem:[#allocation6 + $0x10] sm:$0xff] }
 0x190   :  { %v700_v9 = vadd.f32 %v699_v56, %v698_v58  ;;  %v7038_v56 = vpack.c.bf16 %v1257_v53, %v1253_v52  ;;  %v1260_v58 = vld [vmem:[#allocation6 + $0x48] sm:$0xff]  ;;  %v1283_v52 = vld [vmem:[#allocation6 + $0x100] sm:$0xff] }
 0x191   :  { %v1287_v53 = vld [vmem:[#allocation6 + $0x120] sm:$0xff] }
 0x192   :  { %6201 = vtanh.f32 %v700_v9  ;;  %v710_v12 = vmul.f32 %v706_v44, %v700_v9  ;;  %v7043_v9 = vpack.c.bf16 %v1264_v60, %v1260_v58  ;;  %v7083_v60 = vpack.c.bf16 %v1287_v53, %v1283_v52  ;;  %v1308_v52 = vld [vmem:[#allocation6 + $0x1c8] sm:$0xff] }
 0x193   :  { %v1312_v53 = vld [vmem:[#allocation6 + $0x1e8] sm:$0xff] }
 0x194   :  { %v6966_v13 = vadd.f32 %v717_v6, %v710_v12  ;;  %v1266_v12 = vld [vmem:[#allocation6 + $0x78] sm:$0xff] }
 0x19c   :  { %v6202_v18 = vpop.eup %6201 }
 0x19d   :  { %v702_v21 = vmul.f32 %v6202_v18, %v6200_v16  ;;  %v1259_v16 = vld [vmem:[#allocation6 + $0x40] sm:$0xff] }
 0x19e   :  { %v1263_v18 = vld [vmem:[#allocation6 + $0x60] sm:$0xff] }
 0x19f   :  { %v6968_v22 = vmul.f32 %v706_v44, %v702_v21  ;;  %v1251_v44 = vld [vmem:[#allocation6] sm:$0xff] }
 0x1a0   :  { %v7035_v50 = vpack.c.bf16 %v1255_v46, %v1251_v44  ;;  %v7079_v44 = vpack.c.bf16 %v1288_v38, %v1284_v36  ;;  %v1290_v46 = vld [vmem:[#allocation6 + $0x138] sm:$0xff]  ;;  %v1303_v36 = vld [vmem:[#allocation6 + $0x1a0] sm:$0xff]  ;;  %v1301_v38 = vld [vmem:[#allocation6 + $0x190] sm:$0xff] }
 0x1a1   :  { %v6971_v31 = vadd.f32 %v717_v6, %v6968_v22  ;;  %v1262_v6 = vld [vmem:[#allocation6 + $0x58] sm:$0xff]  ;;  %v7081_v58 = vpack.c.bf16 %v1290_v46, %v1286_v43  ;;  %v1305_v43 = vld [vmem:[#allocation6 + $0x1b0] sm:$0xff] }
 0x1a2   :  { %v7045_v21 = vpack.c.bf16 %v1266_v12, %v1262_v6  ;;  %v1285_v6 = vld [vmem:[#allocation6 + $0x110] sm:$0xff] }
 0x1a3   :  { %856 = vmatmul.mubr.f32.vlgmr.msra.gmra.mrb[2].mxu0 %v6971_v31  ;;  %927 = vmatmul.mubr.f32.vlgmr.msra.gmra.mrb[2].mxu1 %v6971_v31  ;;  %v1289_v12 = vld [vmem:[#allocation6 + $0x130] sm:$0xff] }
 0x1a4   :  { %5025 = vmatpush1.bf16.msra.mxu0 %v6730_v48  ;;  %5057 = vmatpush1.bf16.msra.mxu1 %v6733_v51 }
 0x1a5   :  { %5027 = vmatprep.subr.bf16.mxu0 %v6736_v54  ;;  %5059 = vmatprep.subr.bf16.mxu1 %v6738_v57 }
 0x1a6   :  { %1117 = vmatprep.mubr.f32.mxu0 %v6568_v0  ;;  %1188 = vmatprep.mubr.f32.mxu1 %v6568_v0 }
 0x1a8   :  { %5029 = vmatpush1.bf16.msra.mxu0 %v6744_v61  ;;  %5061 = vmatpush1.bf16.msra.mxu1 %v6748_v1 }
 0x1a9   :  { %5031 = vmatprep.subr.bf16.mxu0 %v6752_v4  ;;  %5063 = vmatprep.subr.bf16.mxu1 %v6755_v7 }
 0x1ac   :  { %5033 = vmatpush1.bf16.msra.mxu0 %v6761_v11  ;;  %5065 = vmatpush1.bf16.msra.mxu1 %v6765_v14 }
 0x1ad   :  { %5035 = vmatprep.subr.bf16.mxu0 %v6769_v17  ;;  %5067 = vmatprep.subr.bf16.mxu1 %v6772_v20 }
 0x1b0   :  { %5037 = vmatpush1.bf16.msra.mxu0 %v6778_v24  ;;  %5069 = vmatpush1.bf16.msra.mxu1 %v6782_v27 }
 0x1b1   :  { %5039 = vmatprep.subr.bf16.mxu0 %v6786_v30  ;;  %5071 = vmatprep.subr.bf16.mxu1 %v6789_v33 }
 0x1b4   :  { %5041 = vmatpush1.bf16.msra.mxu0 %v6795_v37  ;;  %5073 = vmatpush1.bf16.msra.mxu1 %v6799_v41 }
 0x1b5   :  { %5043 = vmatprep.subr.bf16.mxu0 %v6803_v45  ;;  %5075 = vmatprep.subr.bf16.mxu1 %v6806_v49 }
 0x1b8   :  { %5045 = vmatpush1.bf16.msra.mxu0 %v6812_v55  ;;  %5077 = vmatpush1.bf16.msra.mxu1 %v6816_v59 }
 0x1b9   :  { %5047 = vmatprep.subr.bf16.mxu0 %v6820_v63  ;;  %5079 = vmatprep.subr.bf16.mxu1 %v6823_v5  ;;  %v7015_v5 = vpop.permute.xlu1 %965 }
 0x1bc   :  { %5049 = vmatpush1.bf16.msra.mxu0 %v6829_v10  ;;  %5081 = vmatpush1.bf16.msra.mxu1 %v6833_v15 }
 0x1bd   :  { %5051 = vmatprep.subr.bf16.mxu0 %v6837_v19  ;;  %5083 = vmatprep.subr.bf16.mxu1 %v6840_v23  ;;  %v7017_v23 = vpop.permute.xlu1 %975 }
 0x1c0   :  { %5053 = vmatpush1.bf16.msra.mxu0 %v6846_v26  ;;  %5085 = vmatpush1.bf16.msra.mxu1 %v6850_v28  ;;  %v980_v26 = vmul.f32 %v7017_v23, %v6971_v31  ;;  %v7047_v31 = vpack.c.bf16 %v1263_v18, %v1259_v16  ;;  %v1292_v16 = vld [vmem:[#allocation6 + $0x148] sm:$0xff]  ;;  %v7086_v18 = vpack.c.bf16 %v1289_v12, %v1285_v6  ;;  %v1310_v6 = vld [vmem:[#allocation6 + $0x1d8] sm:$0xff] }
 0x1c1   :  { %5087 = vmatprep.subr.bf16.mxu0 %v7031_v40  ;;  %5119 = vmatprep.subr.bf16.mxu1 %v7033_v47  ;;  %v7110_v12 = vpack.c.bf16 %v1305_v43, %v1301_v38 }
 0x276   :  { %v857_v48 = vpop.f32.mrb[2].mxu0  ;;  %v928_v51 = vpop.f32.mrb[2].mxu1 }
 0x277   :  { %v6048_v54 = vadd.f32 %v857_v48, %v6947_v2  ;;  %v859_v57 = vpop.f32.mrb[3].mxu0  ;;  %v930_v61 = vpop.f32.mrb[3].mxu1  ;;  %v6064_v17 = vadd.f32 %v928_v51, %v6963_v32  ;;  %v1261_v48 = vld [vmem:[#allocation6 + $0x50] sm:$0xff] }
 0x278   :  { %v6049_v1 = vadd.f32 %v859_v57, %v6950_v3  ;;  %v6065_v11 = vadd.f32 %v930_v61, %v6957_v25  ;;  %v1265_v51 = vld [vmem:[#allocation6 + $0x70] sm:$0xff]  ;;  %v1268_v57 = vld [vmem:[#allocation6 + $0x88] sm:$0xff] }
 0x279   :  { %v4736_v4 = vmul.f32 -1.442695, %v6048_v54  ;;  %v7050_v54 = vpack.c.bf16 %v1265_v51, %v1261_v48  ;;  %v1272_v61 = vld [vmem:[#allocation6 + $0xa8] sm:$0xff]  ;;  %v1294_v51 = vld [vmem:[#allocation6 + $0x158] sm:$0xff] }
 0x27a   :  { %v4737_v7 = vmul.f32 -1.442695, %v6049_v1  ;;  %v4738_v14 = vmul.f32 -1.442695, %v6065_v11  ;;  %v1270_v1 = vld [vmem:[#allocation6 + $0x98] sm:$0xff]  ;;  %v1267_v11 = vld [vmem:[#allocation6 + $0x80] sm:$0xff] }
 0x27b   :  { %6203 = vpow2.f32 %v4736_v4  ;;  %v7055_v4 = vpack.c.bf16 %v1272_v61, %v1268_v57  ;;  %v1296_v48 = vld [vmem:[#allocation6 + $0x168] sm:$0xff]  ;;  %v1298_v57 = vld [vmem:[#allocation6 + $0x178] sm:$0xff] }
 0x27c   :  { %6205 = vpow2.f32 %v4737_v7  ;;  %v1274_v7 = vld [vmem:[#allocation6 + $0xb8] sm:$0xff]  ;;  %v7090_v61 = vpack.c.bf16 %v1296_v48, %v1292_v16  ;;  %v7112_v16 = vpack.c.bf16 %v1312_v53, %v1308_v52 }
 0x27d   :  { %6207 = vpow2.f32 %v4738_v14  ;;  %v1271_v14 = vld [vmem:[#allocation6 + $0xa0] sm:$0xff]  ;;  %v1314_v48 = vld [vmem:[#allocation6 + $0x1f8] sm:$0xff] }
 0x27e   :  { %6209 = vtanh.f32 %v6064_v17  ;;  %v7057_v17 = vpack.c.bf16 %v1274_v7, %v1270_v1  ;;  %v7092_v1 = vpack.c.bf16 %v1298_v57, %v1294_v51  ;;  %v1291_v7 = vld [vmem:[#allocation6 + $0x140] sm:$0xff] }
 0x27f   :  { %v1307_v51 = vld [vmem:[#allocation6 + $0x1c0] sm:$0xff] }
 0x280   :  { %v1311_v57 = vld [vmem:[#allocation6 + $0x1e0] sm:$0xff] }
 0x285   :  { %v6204_v20 = vpop.eup %6203 }
 0x286   :  { %v6206_v24 = vpop.eup %6205  ;;  %v942_v27 = vadd.f32 1.0, %v6204_v20  ;;  %v7059_v20 = vpack.c.bf16 %v1271_v14, %v1267_v11  ;;  %v1295_v11 = vld [vmem:[#allocation6 + $0x160] sm:$0xff]  ;;  %v1293_v14 = vld [vmem:[#allocation6 + $0x150] sm:$0xff] }
 0x287   :  { %v948_v30 = vadd.f32 1.0, %v6206_v24  ;;  %v6208_v33 = vpop.eup %6207  ;;  %v1269_v24 = vld [vmem:[#allocation6 + $0x90] sm:$0xff] }
 0x288   :  { %6211 = vrcp.f32 %v942_v27  ;;  %v6210_v37 = vpop.eup %6209  ;;  %v955_v55 = vadd.f32 1.0, %v6208_v33  ;;  %v1273_v27 = vld [vmem:[#allocation6 + $0xb0] sm:$0xff]  ;;  %v1276_v33 = vld [vmem:[#allocation6 + $0xc8] sm:$0xff] }
 0x289   :  { %6213 = vrcp.f32 %v948_v30  ;;  %v7062_v30 = vpack.c.bf16 %v1273_v27, %v1269_v24  ;;  %v7095_v24 = vpack.c.bf16 %v1295_v11, %v1291_v7  ;;  %v1297_v27 = vld [vmem:[#allocation6 + $0x170] sm:$0xff]  ;;  %v7115_v7 = vpack.c.bf16 %v1314_v48, %v1310_v6 }
 0x28a   :  { %6215 = vrcp.f32 %v955_v55  ;;  %v1275_v55 = vld [vmem:[#allocation6 + $0xc0] sm:$0xff]  ;;  %v1309_v11 = vld [vmem:[#allocation6 + $0x1d0] sm:$0xff] }
 0x292   :  { %v6212_v41 = vpop.eup %6211 }
 0x293   :  { %v6214_v45 = vpop.eup %6213  ;;  %v959_v49 = vmul.f32 %v6212_v41, %v6210_v37  ;;  %v1280_v37 = vld [vmem:[#allocation6 + $0xe8] sm:$0xff]  ;;  %v1278_v41 = vld [vmem:[#allocation6 + $0xd8] sm:$0xff] }
 0x294   :  { %v958_v59 = vmul.f32 %v6214_v45, %v6966_v13  ;;  %v6216_v10 = vpop.eup %6215  ;;  %v7067_v45 = vpack.c.bf16 %v1280_v37, %v1276_v33  ;;  %v1300_v33 = vld [vmem:[#allocation6 + $0x188] sm:$0xff] }
 0x295   :  { %v1304_v37 = vld [vmem:[#allocation6 + $0x1a8] sm:$0xff] }
 0x296   :  { %v7012_v63 = vadd.f32 %v959_v49, %v958_v59  ;;  %v1282_v49 = vld [vmem:[#allocation6 + $0xf8] sm:$0xff]  ;;  %v1279_v59 = vld [vmem:[#allocation6 + $0xe0] sm:$0xff] }
 0x298   :  { %6217 = vtanh.f32 %v7012_v63 }
 0x2a2   :  { %v6218_v15 = vpop.eup %6217 }
 0x2a3   :  { %v962_v19 = vmul.f32 %v6218_v15, %v6216_v10  ;;  %v7069_v10 = vpack.c.bf16 %v1282_v49, %v1278_v41  ;;  %v7071_v15 = vpack.c.bf16 %v1279_v59, %v1275_v55  ;;  %v7099_v41 = vpack.c.bf16 %v1297_v27, %v1293_v14  ;;  %v1302_v55 = vld [vmem:[#allocation6 + $0x198] sm:$0xff]  ;;  %v1313_v14 = vld [vmem:[#allocation6 + $0x1f0] sm:$0xff] }
 0x2a4   :  { %v7101_v49 = vpack.c.bf16 %v1304_v37, %v1300_v33  ;;  %v1306_v59 = vld [vmem:[#allocation6 + $0x1b8] sm:$0xff]  ;;  %v7118_v27 = vpack.c.bf16 %v1311_v57, %v1307_v51  ;;  %v7122_v33 = vpack.c.bf16 %v1313_v14, %v1309_v11 }
 0x2a5   :  { %v7022_v28 = vmul.f32 %v7015_v5, %v962_v19  ;;  %v1277_v19 = vld [vmem:[#allocation6 + $0xd0] sm:$0xff] }
 0x2a7   :  { %v7025_v34 = vadd.f32 %v980_v26, %v7022_v28  ;;  %v1281_v26 = vld [vmem:[#allocation6 + $0xf0] sm:$0xff] }
 0x2a8   :  { %v7074_v35 = vpack.c.bf16 %v1281_v26, %v1277_v19  ;;  %v1299_v19 = vld [vmem:[#allocation6 + $0x180] sm:$0xff]  ;;  %v7103_v26 = vpack.c.bf16 %v1306_v59, %v1302_v55 }
 0x2a9   :  { %1118 = vmatmul.mubr.f32.vlgmr.msra.gmra.mrb[4].mxu0 %v7025_v34  ;;  %1189 = vmatmul.mubr.f32.vlgmr.msra.gmra.mrb[4].mxu1 %v7025_v34  ;;  %v7106_v46 = vpack.c.bf16 %v1303_v36, %v1299_v19 }
 0x2aa   :  { %1379 = vmatprep.mubr.f32.mxu0 %v6568_v0  ;;  %1450 = vmatprep.mubr.f32.mxu1 %v6568_v0 }
 0x2ab   :  { %5089 = vmatpush1.bf16.msra.mxu0 %v7035_v50  ;;  %5121 = vmatpush1.bf16.msra.mxu1 %v7038_v56 }
 0x2ac   :  { %5091 = vmatprep.subr.bf16.mxu0 %v7043_v9  ;;  %5123 = vmatprep.subr.bf16.mxu1 %v7045_v21 }
 0x2af   :  { %5093 = vmatpush1.bf16.msra.mxu0 %v7047_v31  ;;  %5125 = vmatpush1.bf16.msra.mxu1 %v7050_v54 }
 0x2b0   :  { %5095 = vmatprep.subr.bf16.mxu0 %v7055_v4  ;;  %5127 = vmatprep.subr.bf16.mxu1 %v7057_v17 }
 0x2b3   :  { %5097 = vmatpush1.bf16.msra.mxu0 %v7059_v20  ;;  %5129 = vmatpush1.bf16.msra.mxu1 %v7062_v30 }
 0x2b4   :  { %5099 = vmatprep.subr.bf16.mxu0 %v7067_v45  ;;  %5131 = vmatprep.subr.bf16.mxu1 %v7069_v10 }
 0x2b7   :  { %5101 = vmatpush1.bf16.msra.mxu0 %v7071_v15  ;;  %5133 = vmatpush1.bf16.msra.mxu1 %v7074_v35 }
 0x2b8   :  { %5103 = vmatprep.subr.bf16.mxu0 %v7079_v44  ;;  %5135 = vmatprep.subr.bf16.mxu1 %v7081_v58 }
 0x2bb   :  { %5105 = vmatpush1.bf16.msra.mxu0 %v7083_v60  ;;  %5137 = vmatpush1.bf16.msra.mxu1 %v7086_v18 }
 0x2bc   :  { %5107 = vmatprep.subr.bf16.mxu0 %v7090_v61  ;;  %5139 = vmatprep.subr.bf16.mxu1 %v7092_v1 }
 0x2bf   :  { %5109 = vmatpush1.bf16.msra.mxu0 %v7095_v24  ;;  %5141 = vmatpush1.bf16.msra.mxu1 %v7099_v41 }
 0x2c0   :  { %5111 = vmatprep.subr.bf16.mxu0 %v7101_v49  ;;  %5143 = vmatprep.subr.bf16.mxu1 %v7103_v26 }
 0x2c3   :  { %5113 = vmatpush1.bf16.msra.mxu0 %v7106_v46  ;;  %5145 = vmatpush1.bf16.msra.mxu1 %v7110_v12 }
 0x2c4   :  { %5115 = vmatprep.subr.bf16.mxu0 %v7112_v16  ;;  %5147 = vmatprep.subr.bf16.mxu1 %v7115_v7 }
 0x2c7   :  { %5117 = vmatpush1.bf16.msra.mxu0 %v7118_v27  ;;  %5149 = vmatpush1.bf16.msra.mxu1 %v7122_v33 }
 0x2c8   :  { %5151 = vmatprep.subr.bf16.mxu0 %v7031_v40  ;;  %5183 = vmatprep.subr.bf16.mxu1 %v7033_v47 }
 0x37c   :  { %v1119_v37 = vpop.f32.mrb[4].mxu0  ;;  %v1190_v55 = vpop.f32.mrb[4].mxu1 }
 0x37d   :  { %v6050_v59 = vadd.f32 %v1119_v37, %v6947_v2  ;;  %v1121_v19 = vpop.f32.mrb[5].mxu0  ;;  %v1192_v36 = vpop.f32.mrb[5].mxu1  ;;  %v6066_v48 = vadd.f32 %v1190_v55, %v6963_v32  ;;  %v971_v37 = vmul.f32 %v7015_v5, %v7012_v63 }
 0x37e   :  { %v6051_v38 = vadd.f32 %v1121_v19, %v6950_v3  ;;  %v6067_v53 = vadd.f32 %v1192_v36, %v6957_v25  ;;  %v978_v19 = vmul.f32 %v7017_v23, %v6966_v13 }
 0x37f   :  { %v4740_v43 = vmul.f32 -1.442695, %v6050_v59 }
 0x380   :  { %v4741_v52 = vmul.f32 -1.442695, %v6051_v38  ;;  %v4742_v6 = vmul.f32 -1.442695, %v6067_v53 }
 0x381   :  { %6219 = vpow2.f32 %v4740_v43  ;;  %v7137_v43 = vadd.f32 %v978_v19, %v971_v37 }
 0x382   :  { %6221 = vpow2.f32 %v4741_v52 }
 0x383   :  { %6223 = vpow2.f32 %v4742_v6 }
 0x384   :  { %6225 = vtanh.f32 %v6066_v48 }
 0x38b   :  { %v6220_v51 = vpop.eup %6219 }
 0x38c   :  { %v6222_v57 = vpop.eup %6221  ;;  %v1204_v11 = vadd.f32 1.0, %v6220_v51 }
 0x38d   :  { %v1210_v14 = vadd.f32 1.0, %v6222_v57  ;;  %v6224_v59 = vpop.eup %6223  ;;  %v1228_v57 = vpop.permute.xlu0 %1227 }
 0x38e   :  { %6227 = vrcp.f32 %v1204_v11  ;;  %v6226_v38 = vpop.eup %6225  ;;  %v1217_v53 = vadd.f32 1.0, %v6224_v59  ;;  %v7143_v11 = vpop.permute.xlu1 %1237 }
 0x38f   :  { %6229 = vrcp.f32 %v1210_v14  ;;  %v1242_v23 = vmul.f32 %v7143_v11, %v7025_v34 }
 0x390   :  { %6231 = vrcp.f32 %v1217_v53 }
 0x398   :  { %v6228_v36 = vpop.eup %6227 }
 0x399   :  { %v6230_v55 = vpop.eup %6229  ;;  %v1221_v52 = vmul.f32 %v6228_v36, %v6226_v38 }
 0x39a   :  { %v1220_v6 = vmul.f32 %v6230_v55, %v7137_v43  ;;  %v6232_v51 = vpop.eup %6231 }
 0x39c   :  { %v7140_v48 = vadd.f32 %v1221_v52, %v1220_v6 }
 0x39e   :  { %6233 = vtanh.f32 %v7140_v48 }
 0x3a8   :  { %v6234_v63 = vpop.eup %6233 }
 0x3a9   :  { %v1224_v5 = vmul.f32 %v6234_v63, %v6232_v51 }
 0x3ab   :  { %v7145_v13 = vmul.f32 %v1228_v57, %v1224_v5 }
 0x3ad   :  { %v7150_v14 = vadd.f32 %v1242_v23, %v7145_v13 }
 0x3af   :  { %1380 = vmatmul.mubr.f32.vlgmr.msra.gmra.mrb[6].mxu0 %v7150_v14  ;;  %1451 = vmatmul.mubr.f32.vlgmr.msra.gmra.mrb[6].mxu1 %v7150_v14 }
 0x3b0   :  { %5153 = vmatpush1.bf16.msra.mxu0 %v7035_v50  ;;  %5185 = vmatpush1.bf16.msra.mxu1 %v7038_v56 }
 0x3b1   :  { %5155 = vmatprep.subr.bf16.mxu0 %v7043_v9  ;;  %5187 = vmatprep.subr.bf16.mxu1 %v7045_v21 }
 0x3b2   :  { %1641 = vmatprep.mubr.f32.mxu0 %v6568_v0  ;;  %1712 = vmatprep.mubr.f32.mxu1 %v6568_v0 }
 0x3b4   :  { %5157 = vmatpush1.bf16.msra.mxu0 %v7047_v31  ;;  %5189 = vmatpush1.bf16.msra.mxu1 %v7050_v54 }
 0x3b5   :  { %5159 = vmatprep.subr.bf16.mxu0 %v7055_v4  ;;  %5191 = vmatprep.subr.bf16.mxu1 %v7057_v17 }
 0x3b8   :  { %5161 = vmatpush1.bf16.msra.mxu0 %v7059_v20  ;;  %5193 = vmatpush1.bf16.msra.mxu1 %v7062_v30 }
 0x3b9   :  { %5163 = vmatprep.subr.bf16.mxu0 %v7067_v45  ;;  %5195 = vmatprep.subr.bf16.mxu1 %v7069_v10 }
 0x3bc   :  { %5165 = vmatpush1.bf16.msra.mxu0 %v7071_v15  ;;  %5197 = vmatpush1.bf16.msra.mxu1 %v7074_v35 }
 0x3bd   :  { %5167 = vmatprep.subr.bf16.mxu0 %v7079_v44  ;;  %5199 = vmatprep.subr.bf16.mxu1 %v7081_v58 }
 0x3c0   :  { %5169 = vmatpush1.bf16.msra.mxu0 %v7083_v60  ;;  %5201 = vmatpush1.bf16.msra.mxu1 %v7086_v18 }
 0x3c1   :  { %5171 = vmatprep.subr.bf16.mxu0 %v7090_v61  ;;  %5203 = vmatprep.subr.bf16.mxu1 %v7092_v1 }
 0x3c4   :  { %5173 = vmatpush1.bf16.msra.mxu0 %v7095_v24  ;;  %5205 = vmatpush1.bf16.msra.mxu1 %v7099_v41 }
 0x3c5   :  { %5175 = vmatprep.subr.bf16.mxu0 %v7101_v49  ;;  %5207 = vmatprep.subr.bf16.mxu1 %v7103_v26 }
 0x3c8   :  { %5177 = vmatpush1.bf16.msra.mxu0 %v7106_v46  ;;  %5209 = vmatpush1.bf16.msra.mxu1 %v7110_v12 }
 0x3c9   :  { %5179 = vmatprep.subr.bf16.mxu0 %v7112_v16  ;;  %5211 = vmatprep.subr.bf16.mxu1 %v7115_v7 }
 0x3cc   :  { %5181 = vmatpush1.bf16.msra.mxu0 %v7118_v27  ;;  %5213 = vmatpush1.bf16.msra.mxu1 %v7122_v33 }
 0x3cd   :  { %5215 = vmatprep.subr.bf16.mxu0 %v7031_v40  ;;  %5247 = vmatprep.subr.bf16.mxu1 %v7033_v47 }
 0x482   :  { %v1381_v34 = vpop.f32.mrb[6].mxu0  ;;  %v1452_v37 = vpop.f32.mrb[6].mxu1 }
 0x483   :  { %v6052_v59 = vadd.f32 %v1381_v34, %v6947_v2  ;;  %v1383_v19 = vpop.f32.mrb[7].mxu0  ;;  %v1454_v38 = vpop.f32.mrb[7].mxu1  ;;  %v6068_v51 = vadd.f32 %v1452_v37, %v6963_v32  ;;  %v1233_v34 = vmul.f32 %v1228_v57, %v7140_v48 }
 0x484   :  { %v6053_v36 = vadd.f32 %v1383_v19, %v6950_v3  ;;  %v6069_v53 = vadd.f32 %v1454_v38, %v6957_v25 }
 0x485   :  { %v4744_v55 = vmul.f32 -1.442695, %v6052_v59  ;;  %v1240_v59 = vmul.f32 %v7143_v11, %v7137_v43 }
 0x486   :  { %v4745_v52 = vmul.f32 -1.442695, %v6053_v36  ;;  %v4746_v6 = vmul.f32 -1.442695, %v6069_v53 }
 0x487   :  { %6235 = vpow2.f32 %v4744_v55  ;;  %v7195_v38 = vadd.f32 %v1240_v59, %v1233_v34 }
 0x488   :  { %6237 = vpow2.f32 %v4745_v52 }
 0x489   :  { %6239 = vpow2.f32 %v4746_v6 }
 0x48a   :  { %6241 = vtanh.f32 %v6068_v51  ;;  %v1490_v51 = vpop.permute.xlu0 %1489 }
 0x491   :  { %v6236_v63 = vpop.eup %6235 }
 0x492   :  { %v6238_v5 = vpop.eup %6237  ;;  %v1466_v23 = vadd.f32 1.0, %v6236_v63 }
 0x493   :  { %v1472_v29 = vadd.f32 1.0, %v6238_v5  ;;  %v6240_v19 = vpop.eup %6239  ;;  %v7201_v5 = vpop.permute.xlu1 %1499 }
 0x494   :  { %6243 = vrcp.f32 %v1466_v23  ;;  %v6242_v36 = vpop.eup %6241  ;;  %v1479_v53 = vadd.f32 1.0, %v6240_v19  ;;  %v1504_v11 = vmul.f32 %v7201_v5, %v7150_v14 }
 0x495   :  { %6245 = vrcp.f32 %v1472_v29 }
 0x496   :  { %6247 = vrcp.f32 %v1479_v53 }
 0x49e   :  { %v6244_v55 = vpop.eup %6243 }
 0x49f   :  { %v6246_v52 = vpop.eup %6245  ;;  %v1483_v37 = vmul.f32 %v6244_v55, %v6242_v36 }
 0x4a0   :  { %v1482_v63 = vmul.f32 %v6246_v52, %v7195_v38  ;;  %v6248_v29 = vpop.eup %6247 }
 0x4a2   :  { %v7198_v6 = vadd.f32 %v1483_v37, %v1482_v63 }
 0x4a4   :  { %6249 = vtanh.f32 %v7198_v6 }
 0x4ae   :  { %v6250_v48 = vpop.eup %6249 }
 0x4af   :  { %v1486_v57 = vmul.f32 %v6250_v48, %v6248_v29 }
 0x4b1   :  { %v7203_v43 = vmul.f32 %v1490_v51, %v1486_v57 }
 0x4b3   :  { %v7208_v23 = vadd.f32 %v1504_v11, %v7203_v43  ;;  %v1495_v11 = vmul.f32 %v1490_v51, %v7198_v6 }
 0x4b5   :  { %1642 = vmatmul.mubr.f32.vlgmr.msra.gmra.mrb[8].mxu0 %v7208_v23  ;;  %1713 = vmatmul.mubr.f32.vlgmr.msra.gmra.mrb[8].mxu1 %v7208_v23 }
 0x4b6   :  { %5217 = vmatpush1.bf16.msra.mxu0 %v7035_v50  ;;  %5249 = vmatpush1.bf16.msra.mxu1 %v7038_v56 }
 0x4b7   :  { %5219 = vmatprep.subr.bf16.mxu0 %v7043_v9  ;;  %5251 = vmatprep.subr.bf16.mxu1 %v7045_v21 }
 0x4b8   :  { %1903 = vmatprep.mubr.f32.mxu0 %v6568_v0  ;;  %1974 = vmatprep.mubr.f32.mxu1 %v6568_v0 }
 0x4ba   :  { %5221 = vmatpush1.bf16.msra.mxu0 %v7047_v31  ;;  %5253 = vmatpush1.bf16.msra.mxu1 %v7050_v54 }
 0x4bb   :  { %5223 = vmatprep.subr.bf16.mxu0 %v7055_v4  ;;  %5255 = vmatprep.subr.bf16.mxu1 %v7057_v17 }
 0x4be   :  { %5225 = vmatpush1.bf16.msra.mxu0 %v7059_v20  ;;  %5257 = vmatpush1.bf16.msra.mxu1 %v7062_v30 }
 0x4bf   :  { %5227 = vmatprep.subr.bf16.mxu0 %v7067_v45  ;;  %5259 = vmatprep.subr.bf16.mxu1 %v7069_v10 }
 0x4c2   :  { %5229 = vmatpush1.bf16.msra.mxu0 %v7071_v15  ;;  %5261 = vmatpush1.bf16.msra.mxu1 %v7074_v35 }
 0x4c3   :  { %5231 = vmatprep.subr.bf16.mxu0 %v7079_v44  ;;  %5263 = vmatprep.subr.bf16.mxu1 %v7081_v58 }
 0x4c6   :  { %5233 = vmatpush1.bf16.msra.mxu0 %v7083_v60  ;;  %5265 = vmatpush1.bf16.msra.mxu1 %v7086_v18 }
 0x4c7   :  { %5235 = vmatprep.subr.bf16.mxu0 %v7090_v61  ;;  %5267 = vmatprep.subr.bf16.mxu1 %v7092_v1 }
 0x4ca   :  { %5237 = vmatpush1.bf16.msra.mxu0 %v7095_v24  ;;  %5269 = vmatpush1.bf16.msra.mxu1 %v7099_v41 }
 0x4cb   :  { %5239 = vmatprep.subr.bf16.mxu0 %v7101_v49  ;;  %5271 = vmatprep.subr.bf16.mxu1 %v7103_v26 }
 0x4ce   :  { %5241 = vmatpush1.bf16.msra.mxu0 %v7106_v46  ;;  %5273 = vmatpush1.bf16.msra.mxu1 %v7110_v12 }
 0x4cf   :  { %5243 = vmatprep.subr.bf16.mxu0 %v7112_v16  ;;  %5275 = vmatprep.subr.bf16.mxu1 %v7115_v7 }
 0x4d2   :  { %5245 = vmatpush1.bf16.msra.mxu0 %v7118_v27  ;;  %5277 = vmatpush1.bf16.msra.mxu1 %v7122_v33 }
 0x4d3   :  { %5279 = vmatprep.subr.bf16.mxu0 %v7031_v40  ;;  %5311 = vmatprep.subr.bf16.mxu1 %v7033_v47 }
 0x588   :  { %v1643_v14 = vpop.f32.mrb[8].mxu0  ;;  %v1714_v34 = vpop.f32.mrb[8].mxu1 }
 0x589   :  { %v6054_v19 = vadd.f32 %v1643_v14, %v6947_v2  ;;  %v1645_v59 = vpop.f32.mrb[9].mxu0  ;;  %v1716_v36 = vpop.f32.mrb[9].mxu1  ;;  %v6070_v29 = vadd.f32 %v1714_v34, %v6963_v32 }
 0x58a   :  { %v6055_v55 = vadd.f32 %v1645_v59, %v6950_v3  ;;  %v6071_v53 = vadd.f32 %v1716_v36, %v6957_v25 }
 0x58b   :  { %v4748_v52 = vmul.f32 -1.442695, %v6054_v19  ;;  %v1502_v19 = vmul.f32 %v7201_v5, %v7195_v38 }
 0x58c   :  { %v4749_v37 = vmul.f32 -1.442695, %v6055_v55  ;;  %v4750_v63 = vmul.f32 -1.442695, %v6071_v53 }
 0x58d   :  { %6251 = vpow2.f32 %v4748_v52  ;;  %v7253_v36 = vadd.f32 %v1502_v19, %v1495_v11  ;;  %v2300_v19 = vld [vmem:[#allocation6 + $0x8] sm:$0xff] }
 0x58e   :  { %6253 = vpow2.f32 %v4749_v37 }
 0x58f   :  { %6255 = vpow2.f32 %v4750_v63 }
 0x590   :  { %6257 = vtanh.f32 %v6070_v29 }
 0x597   :  { %v6252_v40 = vpop.eup %6251 }
 0x598   :  { %v6254_v48 = vpop.eup %6253  ;;  %v1728_v47 = vadd.f32 1.0, %v6252_v40  ;;  %v1752_v40 = vpop.permute.xlu0 %1751 }
 0x599   :  { %v1734_v57 = vadd.f32 1.0, %v6254_v48  ;;  %v6256_v14 = vpop.eup %6255  ;;  %v1762_v48 = vpop.permute.xlu1 %1761 }
 0x59a   :  { %6259 = vrcp.f32 %v1728_v47  ;;  %v6258_v59 = vpop.eup %6257  ;;  %v1741_v37 = vadd.f32 1.0, %v6256_v14  ;;  %v1766_v5 = vmul.f32 %v1762_v48, %v7208_v23 }
 0x59b   :  { %6261 = vrcp.f32 %v1734_v57 }
 0x59c   :  { %6263 = vrcp.f32 %v1741_v37  ;;  %v2303_v37 = vld [vmem:[#allocation6 + $0x20] sm:$0xff] }
 0x59d   :  { %v7313_v23 = vpop.permute.xlu1 %2023 }
 0x5a4   :  { %v6260_v55 = vpop.eup %6259 }
 0x5a5   :  { %v6262_v52 = vpop.eup %6261  ;;  %v1745_v34 = vmul.f32 %v6260_v55, %v6258_v59  ;;  %v2304_v59 = vld [vmem:[#allocation6 + $0x28] sm:$0xff]  ;;  %v2302_v55 = vld [vmem:[#allocation6 + $0x18] sm:$0xff] }
 0x5a6   :  { %v1744_v53 = vmul.f32 %v6262_v52, %v7253_v36  ;;  %v6264_v29 = vpop.eup %6263  ;;  %v2306_v52 = vld [vmem:[#allocation6 + $0x38] sm:$0xff] }
 0x5a8   :  { %v7256_v63 = vadd.f32 %v1745_v34, %v1744_v53  ;;  %v2299_v34 = vld [vmem:[#allocation6] sm:$0xff]  ;;  %v5374_v53 = vpack.c.bf16 %v2306_v52, %v2302_v55  ;;  %v2329_v55 = vld [vmem:[#allocation6 + $0xf0] sm:$0xff]  ;;  %v2332_v52 = vld [vmem:[#allocation6 + $0x108] sm:$0xff] }
 0x5aa   :  { %6265 = vtanh.f32 %v7256_v63 }
 0x5b4   :  { %v6266_v6 = vpop.eup %6265 }
 0x5b5   :  { %v1748_v51 = vmul.f32 %v6266_v6, %v6264_v29  ;;  %v2301_v29 = vld [vmem:[#allocation6 + $0x10] sm:$0xff] }
 0x5b6   :  { %v2305_v6 = vld [vmem:[#allocation6 + $0x30] sm:$0xff] }
 0x5b7   :  { %v7259_v38 = vmul.f32 %v1752_v40, %v1748_v51  ;;  %v5376_v51 = vpack.c.bf16 %v2305_v6, %v2301_v29  ;;  %v2331_v29 = vld [vmem:[#allocation6 + $0x100] sm:$0xff] }
 0x5b8   :  { %v2335_v6 = vld [vmem:[#allocation6 + $0x120] sm:$0xff] }
 0x5b9   :  { %v7263_v47 = vadd.f32 %v1766_v5, %v7259_v38  ;;  %v2310_v5 = vld [vmem:[#allocation6 + $0x58] sm:$0xff] }
 0x5bb   :  { %1904 = vmatmul.mubr.f32.vlgmr.msra.gmra.mrb[10].mxu0 %v7263_v47  ;;  %1975 = vmatmul.mubr.f32.vlgmr.msra.gmra.mrb[10].mxu1 %v7263_v47  ;;  %v2028_v11 = vmul.f32 %v7313_v23, %v7263_v47 }
 0x5bc   :  { %5281 = vmatpush1.bf16.msra.mxu0 %v7035_v50  ;;  %5313 = vmatpush1.bf16.msra.mxu1 %v7038_v56 }
 0x5bd   :  { %5283 = vmatprep.subr.bf16.mxu0 %v7043_v9  ;;  %5315 = vmatprep.subr.bf16.mxu1 %v7045_v21 }
 0x5be   :  { %2165 = vmatprep.mubr.f32.mxu0 %v6568_v0  ;;  %2236 = vmatprep.mubr.f32.mxu1 %v6568_v0 }
 0x5c0   :  { %5285 = vmatpush1.bf16.msra.mxu0 %v7047_v31  ;;  %5317 = vmatpush1.bf16.msra.mxu1 %v7050_v54 }
 0x5c1   :  { %5287 = vmatprep.subr.bf16.mxu0 %v7055_v4  ;;  %5319 = vmatprep.subr.bf16.mxu1 %v7057_v17 }
 0x5c4   :  { %5289 = vmatpush1.bf16.msra.mxu0 %v7059_v20  ;;  %5321 = vmatpush1.bf16.msra.mxu1 %v7062_v30 }
 0x5c5   :  { %5291 = vmatprep.subr.bf16.mxu0 %v7067_v45  ;;  %5323 = vmatprep.subr.bf16.mxu1 %v7069_v10 }
 0x5c8   :  { %5293 = vmatpush1.bf16.msra.mxu0 %v7071_v15  ;;  %5325 = vmatpush1.bf16.msra.mxu1 %v7074_v35 }
 0x5c9   :  { %5295 = vmatprep.subr.bf16.mxu0 %v7079_v44  ;;  %5327 = vmatprep.subr.bf16.mxu1 %v7081_v58  ;;  %v1757_v58 = vmul.f32 %v1752_v40, %v7256_v63  ;;  %v5344_v63 = vpack.c.bf16 %v2303_v37, %v2299_v34  ;;  %v2308_v40 = vld [vmem:[#allocation6 + $0x48] sm:$0xff]  ;;  %v2334_v37 = vld [vmem:[#allocation6 + $0x118] sm:$0xff] }
 0x5ca   :  { %v2336_v34 = vld [vmem:[#allocation6 + $0x128] sm:$0xff] }
 0x5cc   :  { %5297 = vmatpush1.bf16.msra.mxu0 %v7083_v60  ;;  %5329 = vmatpush1.bf16.msra.mxu1 %v7086_v18  ;;  %v1764_v18 = vmul.f32 %v1762_v48, %v7253_v36  ;;  %v5342_v36 = vpack.c.bf16 %v2304_v59, %v2300_v19  ;;  %v2312_v48 = vld [vmem:[#allocation6 + $0x68] sm:$0xff]  ;;  %v2325_v59 = vld [vmem:[#allocation6 + $0xd0] sm:$0xff] }
 0x5cd   :  { %5299 = vmatprep.subr.bf16.mxu0 %v7090_v61  ;;  %5331 = vmatprep.subr.bf16.mxu1 %v7092_v1  ;;  %v5346_v47 = vpack.c.bf16 %v2312_v48, %v2308_v40  ;;  %v5360_v40 = vpack.c.bf16 %v2335_v6, %v2331_v29  ;;  %v2333_v48 = vld [vmem:[#allocation6 + $0x110] sm:$0xff]  ;;  %v2558_v29 = vld [vmem:[#allocation8 + $0x38] sm:$0xff] }
 0x5d0   :  { %5301 = vmatpush1.bf16.msra.mxu0 %v7095_v24  ;;  %5333 = vmatpush1.bf16.msra.mxu1 %v7099_v41  ;;  %v7305_v24 = vadd.f32 %v1764_v18, %v1757_v58  ;;  %v2317_v18 = vld [vmem:[#allocation6 + $0x90] sm:$0xff] }
 0x5d1   :  { %5303 = vmatprep.subr.bf16.mxu0 %v7101_v49  ;;  %5335 = vmatprep.subr.bf16.mxu1 %v7103_v26 }
 0x5d4   :  { %5305 = vmatpush1.bf16.msra.mxu0 %v7106_v46  ;;  %5337 = vmatpush1.bf16.msra.mxu1 %v7110_v12 }
 0x5d5   :  { %5307 = vmatprep.subr.bf16.mxu0 %v7112_v16  ;;  %5339 = vmatprep.subr.bf16.mxu1 %v7115_v7 }
 0x5d8   :  { %5309 = vmatpush1.bf16.msra.mxu0 %v7118_v27  ;;  %5341 = vmatpush1.bf16.msra.mxu1 %v7122_v33  ;;  %v7311_v33 = vpop.permute.xlu0 %2013 }
 0x5d9   :  { %5343 = vmatprep.subr.bf16.mxu0 %v5342_v36  ;;  %5375 = vmatprep.subr.bf16.mxu1 %v5374_v53  ;;  %v5388_v36 = vpack.c.bf16 %v2329_v55, %v2325_v59  ;;  %v5358_v53 = vpack.c.bf16 %v2336_v34, %v2332_v52  ;;  %v2355_v59 = vld [vmem:[#allocation6 + $0x1c0] sm:$0xff]  ;;  %v2357_v52 = vld [vmem:[#allocation6 + $0x1d0] sm:$0xff] }
 0x5da   :  { %v2359_v55 = vld [vmem:[#allocation6 + $0x1e0] sm:$0xff]  ;;  %v2361_v34 = vld [vmem:[#allocation6 + $0x1f0] sm:$0xff] }
 0x5db   :  { %v5372_v6 = vpack.c.bf16 %v2359_v55, %v2355_v59  ;;  %v7343_v59 = vpop.permute.xlu1 %2285  ;;  %v2564_v55 = vld [vmem:[#allocation8 + $0x68] sm:$0xff] }
 0x68e   :  { %v1905_v50 = vpop.f32.mrb[10].mxu0  ;;  %v1976_v56 = vpop.f32.mrb[10].mxu1 }
 0x68f   :  { %v6056_v9 = vadd.f32 %v1905_v50, %v6947_v2  ;;  %v1907_v21 = vpop.f32.mrb[11].mxu0  ;;  %v1978_v31 = vpop.f32.mrb[11].mxu1  ;;  %v6072_v45 = vadd.f32 %v1976_v56, %v6963_v32  ;;  %v2314_v50 = vld [vmem:[#allocation6 + $0x78] sm:$0xff]  ;;  %v2307_v56 = vld [vmem:[#allocation6 + $0x40] sm:$0xff] }
 0x690   :  { %v6057_v54 = vadd.f32 %v1907_v21, %v6950_v3  ;;  %v6073_v20 = vadd.f32 %v1978_v31, %v6957_v25  ;;  %v5378_v21 = vpack.c.bf16 %v2314_v50, %v2310_v5  ;;  %v2337_v5 = vld [vmem:[#allocation6 + $0x130] sm:$0xff] }
 0x691   :  { %v4752_v4 = vmul.f32 -1.442695, %v6056_v9  ;;  %v2311_v9 = vld [vmem:[#allocation6 + $0x60] sm:$0xff]  ;;  %v5392_v50 = vpack.c.bf16 %v2337_v5, %v2333_v48 }
 0x692   :  { %v4753_v17 = vmul.f32 -1.442695, %v6057_v54  ;;  %v4754_v30 = vmul.f32 -1.442695, %v6073_v20  ;;  %v5348_v31 = vpack.c.bf16 %v2311_v9, %v2307_v56  ;;  %v2309_v54 = vld [vmem:[#allocation6 + $0x50] sm:$0xff]  ;;  %v2316_v20 = vld [vmem:[#allocation6 + $0x88] sm:$0xff] }
 0x693   :  { %6267 = vpow2.f32 %v4752_v4  ;;  %v2313_v4 = vld [vmem:[#allocation6 + $0x70] sm:$0xff]  ;;  %v2344_v56 = vld [vmem:[#allocation6 + $0x168] sm:$0xff]  ;;  %v2342_v9 = vld [vmem:[#allocation6 + $0x158] sm:$0xff] }
 0x694   :  { %6269 = vpow2.f32 %v4753_v17  ;;  %v5380_v17 = vpack.c.bf16 %v2313_v4, %v2309_v54  ;;  %v2339_v4 = vld [vmem:[#allocation6 + $0x140] sm:$0xff] }
 0x695   :  { %6271 = vpow2.f32 %v4754_v30  ;;  %v2320_v30 = vld [vmem:[#allocation6 + $0xa8] sm:$0xff] }
 0x696   :  { %6273 = vtanh.f32 %v6072_v45  ;;  %v2318_v45 = vld [vmem:[#allocation6 + $0x98] sm:$0xff] }
 0x69d   :  { %v6268_v10 = vpop.eup %6267 }
 0x69e   :  { %v6270_v15 = vpop.eup %6269  ;;  %v1990_v35 = vadd.f32 1.0, %v6268_v10  ;;  %v5350_v10 = vpack.c.bf16 %v2320_v30, %v2316_v20  ;;  %v2341_v20 = vld [vmem:[#allocation6 + $0x150] sm:$0xff] }
 0x69f   :  { %v1996_v44 = vadd.f32 1.0, %v6270_v15  ;;  %v6272_v60 = vpop.eup %6271  ;;  %v2322_v15 = vld [vmem:[#allocation6 + $0xb8] sm:$0xff] }
 0x6a0   :  { %6275 = vrcp.f32 %v1990_v35  ;;  %v6274_v61 = vpop.eup %6273  ;;  %v2003_v26 = vadd.f32 1.0, %v6272_v60  ;;  %v2315_v35 = vld [vmem:[#allocation6 + $0x80] sm:$0xff]  ;;  %v5382_v58 = vpack.c.bf16 %v2322_v15, %v2318_v45  ;;  %v2345_v45 = vld [vmem:[#allocation6 + $0x170] sm:$0xff]  ;;  %v2352_v15 = vld [vmem:[#allocation6 + $0x1a8] sm:$0xff] }
 0x6a1   :  { %6277 = vrcp.f32 %v1996_v44  ;;  %v2319_v44 = vld [vmem:[#allocation6 + $0xa0] sm:$0xff] }
 0x6a2   :  { %6279 = vrcp.f32 %v2003_v26  ;;  %v5352_v60 = vpack.c.bf16 %v2319_v44, %v2315_v35  ;;  %v2326_v26 = vld [vmem:[#allocation6 + $0xd8] sm:$0xff]  ;;  %v5396_v35 = vpack.c.bf16 %v2345_v45, %v2341_v20 }
 0x6aa   :  { %v6276_v1 = vpop.eup %6275 }
 0x6ab   :  { %v6278_v41 = vpop.eup %6277  ;;  %v2007_v49 = vmul.f32 %v6276_v1, %v6274_v61  ;;  %v2321_v61 = vld [vmem:[#allocation6 + $0xb0] sm:$0xff] }
 0x6ac   :  { %v2006_v46 = vmul.f32 %v6278_v41, %v7305_v24  ;;  %v6280_v16 = vpop.eup %6279  ;;  %v5384_v1 = vpack.c.bf16 %v2321_v61, %v2317_v18  ;;  %v2324_v41 = vld [vmem:[#allocation6 + $0xc8] sm:$0xff]  ;;  %v2347_v18 = vld [vmem:[#allocation6 + $0x180] sm:$0xff] }
 0x6ae   :  { %v7308_v12 = vadd.f32 %v2007_v49, %v2006_v46  ;;  %v2328_v49 = vld [vmem:[#allocation6 + $0xe8] sm:$0xff] }
 0x6af   :  { %v5354_v46 = vpack.c.bf16 %v2328_v49, %v2324_v41  ;;  %v2349_v41 = vld [vmem:[#allocation6 + $0x190] sm:$0xff] }
 0x6b0   :  { %6281 = vtanh.f32 %v7308_v12  ;;  %v2353_v49 = vld [vmem:[#allocation6 + $0x1b0] sm:$0xff] }
 0x6ba   :  { %v6282_v7 = vpop.eup %6281 }
 0x6bb   :  { %v2010_v27 = vmul.f32 %v6282_v7, %v6280_v16  ;;  %v2330_v16 = vld [vmem:[#allocation6 + $0xf8] sm:$0xff]  ;;  %v2323_v7 = vld [vmem:[#allocation6 + $0xc0] sm:$0xff] }
 0x6bd   :  { %v7316_v57 = vmul.f32 %v7311_v33, %v2010_v27  ;;  %v2327_v27 = vld [vmem:[#allocation6 + $0xe0] sm:$0xff] }
 0x6be   :  { %v5356_v19 = vpack.c.bf16 %v2327_v27, %v2323_v7  ;;  %v2358_v7 = vld [vmem:[#allocation6 + $0x1d8] sm:$0xff]  ;;  %v5400_v27 = vpack.c.bf16 %v2353_v49, %v2349_v41 }
 0x6bf   :  { %v7321_v14 = vadd.f32 %v2028_v11, %v7316_v57  ;;  %v5386_v11 = vpack.c.bf16 %v2330_v16, %v2326_v26  ;;  %v2360_v16 = vld [vmem:[#allocation6 + $0x1e8] sm:$0xff] }
 0x6c1   :  { %2166 = vmatmul.mubr.f32.vlgmr.msra.gmra.mrb[12].mxu0 %v7321_v14  ;;  %2237 = vmatmul.mubr.f32.vlgmr.msra.gmra.mrb[12].mxu1 %v7321_v14 }
 0x6c2   :  { %2427 = vmatprep.mubr.f32.mxu0 %v6568_v0  ;;  %2498 = vmatprep.mubr.f32.mxu1 %v6568_v0 }
 0x6c3   :  { %5345 = vmatpush1.bf16.msra.mxu0 %v5344_v63  ;;  %5377 = vmatpush1.bf16.msra.mxu1 %v5376_v51  ;;  %v2338_v63 = vld [vmem:[#allocation6 + $0x138] sm:$0xff] }
 0x6c4   :  { %5347 = vmatprep.subr.bf16.mxu0 %v5346_v47  ;;  %5379 = vmatprep.subr.bf16.mxu1 %v5378_v21  ;;  %v5390_v51 = vpack.c.bf16 %v2338_v63, %v2334_v37  ;;  %v2340_v47 = vld [vmem:[#allocation6 + $0x148] sm:$0xff]  ;;  %v2346_v21 = vld [vmem:[#allocation6 + $0x178] sm:$0xff] }
 0x6c5   :  { %v5394_v54 = vpack.c.bf16 %v2346_v21, %v2342_v9  ;;  %v2552_v37 = vld [vmem:[#allocation8 + $0x8] sm:$0xff]  ;;  %v2554_v63 = vld [vmem:[#allocation8 + $0x18] sm:$0xff] }
 0x6c6   :  { %v5438_v48 = vpack.c.bf16 %v2558_v29, %v2554_v63  ;;  %v2559_v29 = vld [vmem:[#allocation8 + $0x40] sm:$0xff] }
 0x6c7   :  { %5349 = vmatpush1.bf16.msra.mxu0 %v5348_v31  ;;  %5381 = vmatpush1.bf16.msra.mxu1 %v5380_v17  ;;  %v5362_v31 = vpack.c.bf16 %v2344_v56, %v2340_v47  ;;  %v2343_v17 = vld [vmem:[#allocation6 + $0x160] sm:$0xff] }
 0x6c8   :  { %5351 = vmatprep.subr.bf16.mxu0 %v5350_v10  ;;  %5383 = vmatprep.subr.bf16.mxu1 %v5382_v58  ;;  %v5364_v30 = vpack.c.bf16 %v2343_v17, %v2339_v4  ;;  %v2348_v10 = vld [vmem:[#allocation6 + $0x188] sm:$0xff]  ;;  %v2350_v58 = vld [vmem:[#allocation6 + $0x198] sm:$0xff] }
 0x6c9   :  { %v5366_v44 = vpack.c.bf16 %v2352_v15, %v2348_v10 }
 0x6cb   :  { %5353 = vmatpush1.bf16.msra.mxu0 %v5352_v60  ;;  %5385 = vmatpush1.bf16.msra.mxu1 %v5384_v1  ;;  %v2354_v60 = vld [vmem:[#allocation6 + $0x1b8] sm:$0xff]  ;;  %v2351_v1 = vld [vmem:[#allocation6 + $0x1a0] sm:$0xff] }
 0x6cc   :  { %5355 = vmatprep.subr.bf16.mxu0 %v5354_v46  ;;  %5387 = vmatprep.subr.bf16.mxu1 %v5386_v11  ;;  %v5398_v61 = vpack.c.bf16 %v2354_v60, %v2350_v58  ;;  %v5368_v26 = vpack.c.bf16 %v2351_v1, %v2347_v18  ;;  %v2356_v46 = vld [vmem:[#allocation6 + $0x1c8] sm:$0xff]  ;;  %v2026_v58 = vmul.f32 %v7313_v23, %v7305_v24  ;;  %v2553_v24 = vld [vmem:[#allocation8 + $0x10] sm:$0xff] }
 0x6cd   :  { %v5370_v11 = vpack.c.bf16 %v2360_v16, %v2356_v46  ;;  %v2557_v23 = vld [vmem:[#allocation8 + $0x30] sm:$0xff] }
 0x6ce   :  { %v5440_v63 = vpack.c.bf16 %v2557_v23, %v2553_v24 }
 0x6cf   :  { %5357 = vmatpush1.bf16.msra.mxu0 %v5356_v19  ;;  %5389 = vmatpush1.bf16.msra.mxu1 %v5388_v36  ;;  %v2362_v19 = vld [vmem:[#allocation6 + $0x1f8] sm:$0xff] }
 0x6d0   :  { %5359 = vmatprep.subr.bf16.mxu0 %v5358_v53  ;;  %5391 = vmatprep.subr.bf16.mxu1 %v5390_v51  ;;  %v5402_v36 = vpack.c.bf16 %v2362_v19, %v2358_v7  ;;  %v2556_v53 = vld [vmem:[#allocation8 + $0x28] sm:$0xff]  ;;  %v5404_v51 = vpack.c.bf16 %v2361_v34, %v2357_v52  ;;  %v2555_v7 = vld [vmem:[#allocation8 + $0x20] sm:$0xff]  ;;  %v7341_v19 = vpop.permute.xlu0 %2275  ;;  %v2566_v52 = vld [vmem:[#allocation8 + $0x78] sm:$0xff] }
 0x6d3   :  { %5361 = vmatpush1.bf16.msra.mxu0 %v5360_v40  ;;  %5393 = vmatpush1.bf16.msra.mxu1 %v5392_v50  ;;  %v5406_v40 = vpack.c.bf16 %v2556_v53, %v2552_v37  ;;  %v2290_v37 = vmul.f32 %v7343_v59, %v7321_v14 }
 0x6d4   :  { %5363 = vmatprep.subr.bf16.mxu0 %v5362_v31  ;;  %5395 = vmatprep.subr.bf16.mxu1 %v5394_v54 }
 0x6d7   :  { %5365 = vmatpush1.bf16.msra.mxu0 %v5364_v30  ;;  %5397 = vmatpush1.bf16.msra.mxu1 %v5396_v35  ;;  %v2019_v35 = vmul.f32 %v7311_v33, %v7308_v12  ;;  %v2551_v33 = vld [vmem:[#allocation8] sm:$0xff] }
 0x6d8   :  { %5367 = vmatprep.subr.bf16.mxu0 %v5366_v44  ;;  %5399 = vmatprep.subr.bf16.mxu1 %v5398_v61  ;;  %v5408_v53 = vpack.c.bf16 %v2555_v7, %v2551_v33  ;;  %v2588_v33 = vld [vmem:[#allocation8 + $0x128] sm:$0xff]  ;;  %v2586_v7 = vld [vmem:[#allocation8 + $0x118] sm:$0xff] }
 0x6d9   :  { %v7335_v61 = vadd.f32 %v2026_v58, %v2019_v35  ;;  %v2578_v35 = vld [vmem:[#allocation8 + $0xd8] sm:$0xff] }
 0x6db   :  { %5369 = vmatpush1.bf16.msra.mxu0 %v5368_v26  ;;  %5401 = vmatpush1.bf16.msra.mxu1 %v5400_v27 }
 0x6dc   :  { %5371 = vmatprep.subr.bf16.mxu0 %v5370_v11  ;;  %5403 = vmatprep.subr.bf16.mxu1 %v5402_v36  ;;  %v2560_v11 = vld [vmem:[#allocation8 + $0x48] sm:$0xff]  ;;  %v2562_v36 = vld [vmem:[#allocation8 + $0x58] sm:$0xff] }
 0x6df   :  { %5373 = vmatpush1.bf16.msra.mxu0 %v5372_v6  ;;  %5405 = vmatpush1.bf16.msra.mxu1 %v5404_v51  ;;  %v2563_v6 = vld [vmem:[#allocation8 + $0x60] sm:$0xff] }
 0x6e0   :  { %5407 = vmatprep.subr.bf16.mxu0 %v5406_v40  ;;  %5439 = vmatprep.subr.bf16.mxu1 %v5438_v48  ;;  %v5410_v40 = vpack.c.bf16 %v2564_v55, %v2560_v11  ;;  %v5442_v48 = vpack.c.bf16 %v2566_v52, %v2562_v36  ;;  %v2583_v11 = vld [vmem:[#allocation8 + $0x100] sm:$0xff] }
 0x6e1   :  { %v2587_v55 = vld [vmem:[#allocation8 + $0x120] sm:$0xff] }
 0x794   :  { %v2167_v5 = vpop.f32.mrb[12].mxu0  ;;  %v2238_v47 = vpop.f32.mrb[12].mxu1 }
 0x795   :  { %v6058_v50 = vadd.f32 %v2167_v5, %v6947_v2  ;;  %v2169_v56 = vpop.f32.mrb[13].mxu0  ;;  %v2240_v9 = vpop.f32.mrb[13].mxu1  ;;  %v6074_v20 = vadd.f32 %v2238_v47, %v6963_v32  ;;  %v2561_v5 = vld [vmem:[#allocation8 + $0x50] sm:$0xff] }
 0x796   :  { %v6059_v21 = vadd.f32 %v2169_v56, %v6950_v3  ;;  %v6075_v4 = vadd.f32 %v2240_v9, %v6957_v25  ;;  %v2565_v47 = vld [vmem:[#allocation8 + $0x70] sm:$0xff]  ;;  %v2572_v56 = vld [vmem:[#allocation8 + $0xa8] sm:$0xff]  ;;  %v2570_v9 = vld [vmem:[#allocation8 + $0x98] sm:$0xff] }
 0x797   :  { %v4756_v31 = vmul.f32 -1.442695, %v6058_v50  ;;  %v2568_v50 = vld [vmem:[#allocation8 + $0x88] sm:$0xff]  ;;  %v5444_v14 = vpack.c.bf16 %v2565_v47, %v2561_v5  ;;  %v2591_v5 = vld [vmem:[#allocation8 + $0x140] sm:$0xff] }
 0x798   :  { %v4757_v54 = vmul.f32 -1.442695, %v6059_v21  ;;  %v4758_v17 = vmul.f32 -1.442695, %v6075_v4  ;;  %v2574_v21 = vld [vmem:[#allocation8 + $0xb8] sm:$0xff]  ;;  %v2571_v4 = vld [vmem:[#allocation8 + $0xa0] sm:$0xff] }
 0x799   :  { %6283 = vpow2.f32 %v4756_v31  ;;  %v5412_v31 = vpack.c.bf16 %v2563_v6, %v2559_v29  ;;  %v2596_v29 = vld [vmem:[#allocation8 + $0x168] sm:$0xff]  ;;  %v2594_v6 = vld [vmem:[#allocation8 + $0x158] sm:$0xff]  ;;  %v2595_v47 = vld [vmem:[#allocation8 + $0x160] sm:$0xff] }
 0x79a   :  { %6285 = vpow2.f32 %v4757_v54  ;;  %v2567_v54 = vld [vmem:[#allocation8 + $0x80] sm:$0xff] }
 0x79b   :  { %6287 = vpow2.f32 %v4758_v17  ;;  %v5414_v17 = vpack.c.bf16 %v2572_v56, %v2568_v50  ;;  %v5416_v58 = vpack.c.bf16 %v2571_v4, %v2567_v54  ;;  %v2602_v54 = vld [vmem:[#allocation8 + $0x198] sm:$0xff] }
 0x79c   :  { %6289 = vtanh.f32 %v6074_v20  ;;  %v5446_v20 = vpack.c.bf16 %v2574_v21, %v2570_v9  ;;  %v2593_v9 = vld [vmem:[#allocation8 + $0x150] sm:$0xff]  ;;  %v2606_v4 = vld [vmem:[#allocation8 + $0x1b8] sm:$0xff] }
 0x79d   :  { %v2597_v21 = vld [vmem:[#allocation8 + $0x170] sm:$0xff] }
 0x7a3   :  { %v6284_v30 = vpop.eup %6283 }
 0x7a4   :  { %v6286_v45 = vpop.eup %6285  ;;  %v2252_v10 = vadd.f32 1.0, %v6284_v30  ;;  %v2569_v30 = vld [vmem:[#allocation8 + $0x90] sm:$0xff] }
 0x7a5   :  { %v2258_v15 = vadd.f32 1.0, %v6286_v45  ;;  %v6288_v44 = vpop.eup %6287  ;;  %v2573_v45 = vld [vmem:[#allocation8 + $0xb0] sm:$0xff] }
 0x7a6   :  { %6291 = vrcp.f32 %v2252_v10  ;;  %v6290_v60 = vpop.eup %6289  ;;  %v2265_v49 = vadd.f32 1.0, %v6288_v44  ;;  %v2576_v10 = vld [vmem:[#allocation8 + $0xc8] sm:$0xff]  ;;  %v2582_v44 = vld [vmem:[#allocation8 + $0xf8] sm:$0xff] }
 0x7a7   :  { %6293 = vrcp.f32 %v2258_v15  ;;  %v2580_v15 = vld [vmem:[#allocation8 + $0xe8] sm:$0xff] }
 0x7a8   :  { %6295 = vrcp.f32 %v2265_v49  ;;  %v5450_v49 = vpack.c.bf16 %v2582_v44, %v2578_v35  ;;  %v2601_v35 = vld [vmem:[#allocation8 + $0x190] sm:$0xff] }
 0x7a9   :  { %v2605_v44 = vld [vmem:[#allocation8 + $0x1b0] sm:$0xff] }
 0x7b0   :  { %v6292_v18 = vpop.eup %6291 }
 0x7b1   :  { %v6294_v1 = vpop.eup %6293  ;;  %v2269_v41 = vmul.f32 %v6292_v18, %v6290_v60  ;;  %v5448_v60 = vpack.c.bf16 %v2573_v45, %v2569_v30  ;;  %v2575_v18 = vld [vmem:[#allocation8 + $0xc0] sm:$0xff] }
 0x7b2   :  { %v2268_v26 = vmul.f32 %v6294_v1, %v7335_v61  ;;  %v6296_v16 = vpop.eup %6295  ;;  %v2579_v1 = vld [vmem:[#allocation8 + $0xe0] sm:$0xff] }
 0x7b3   :  { %v5420_v24 = vpack.c.bf16 %v2579_v1, %v2575_v18  ;;  %v2599_v30 = vld [vmem:[#allocation8 + $0x180] sm:$0xff]  ;;  %v2610_v18 = vld [vmem:[#allocation8 + $0x1d8] sm:$0xff] }
 0x7b4   :  { %v7338_v46 = vadd.f32 %v2269_v41, %v2268_v26  ;;  %v5418_v41 = vpack.c.bf16 %v2580_v15, %v2576_v10  ;;  %v2577_v26 = vld [vmem:[#allocation8 + $0xd0] sm:$0xff]  ;;  %v2603_v45 = vld [vmem:[#allocation8 + $0x1a0] sm:$0xff]  ;;  %v5462_v15 = vpack.c.bf16 %v2606_v4, %v2602_v54  ;;  %v2614_v1 = vld [vmem:[#allocation8 + $0x1f8] sm:$0xff] }
 0x7b5   :  { %v2922_v4 = vld [vmem:[#allocation9 + $0xb8] sm:$0xff] }
 0x7b6   :  { %6297 = vtanh.f32 %v7338_v46 }
 0x7c0   :  { %v6298_v12 = vpop.eup %6297 }
 0x7c1   :  { %v2272_v27 = vmul.f32 %v6298_v12, %v6296_v16  ;;  %v2581_v16 = vld [vmem:[#allocation8 + $0xf0] sm:$0xff]  ;;  %v2584_v12 = vld [vmem:[#allocation8 + $0x108] sm:$0xff] }
 0x7c2   :  { %v5452_v23 = vpack.c.bf16 %v2581_v16, %v2577_v26  ;;  %v5422_v36 = vpack.c.bf16 %v2588_v33, %v2584_v12  ;;  %v2607_v26 = vld [vmem:[#allocation8 + $0x1c0] sm:$0xff]  ;;  %v5466_v12 = vpack.c.bf16 %v2614_v1, %v2610_v18  ;;  %v2930_v1 = vld [vmem:[#allocation9 + $0xf8] sm:$0xff] }
 0x7c3   :  { %v7346_v34 = vmul.f32 %v7341_v19, %v2272_v27  ;;  %v2590_v27 = vld [vmem:[#allocation8 + $0x138] sm:$0xff]  ;;  %v2611_v33 = vld [vmem:[#allocation8 + $0x1e0] sm:$0xff] }
 0x7c4   :  { %v5454_v52 = vpack.c.bf16 %v2590_v27, %v2586_v7  ;;  %v2609_v7 = vld [vmem:[#allocation8 + $0x1d0] sm:$0xff] }
 0x7c5   :  { %v2291_v51 = vadd.f32 %v2290_v37, %v7346_v34  ;;  %v2585_v37 = vld [vmem:[#allocation8 + $0x110] sm:$0xff] }
 0x7c6   :  { %v2613_v27 = vld [vmem:[#allocation8 + $0x1f0] sm:$0xff] }
 0x7c7   :  { %2428 = vmatmul.mubr.f32.vlgmr.msra.gmra.mrb[14].mxu0 %v2291_v51  ;;  %2499 = vmatmul.mubr.f32.vlgmr.msra.gmra.mrb[14].mxu1 %v2291_v51  ;;  %v2598_v51 = vld [vmem:[#allocation8 + $0x178] sm:$0xff] }
 0x7c8   :  { %5409 = vmatpush1.bf16.msra.mxu0 %v5408_v53  ;;  %5441 = vmatpush1.bf16.msra.mxu1 %v5440_v63  ;;  %v2589_v53 = vld [vmem:[#allocation8 + $0x130] sm:$0xff]  ;;  %v2592_v63 = vld [vmem:[#allocation8 + $0x148] sm:$0xff]  ;;  %v5458_v56 = vpack.c.bf16 %v2598_v51, %v2594_v6  ;;  %v2914_v51 = vld [vmem:[#allocation9 + $0x78] sm:$0xff] }
 0x7c9   :  { %5411 = vmatprep.subr.bf16.mxu0 %v5410_v40  ;;  %5443 = vmatprep.subr.bf16.mxu1 %v5442_v48  ;;  %v5424_v40 = vpack.c.bf16 %v2587_v55, %v2583_v11  ;;  %v5456_v48 = vpack.c.bf16 %v2589_v53, %v2585_v37  ;;  %v5426_v50 = vpack.c.bf16 %v2596_v29, %v2592_v63  ;;  %v2899_v11 = vld [vmem:[#allocation9] sm:$0xff]  ;;  %v2905_v37 = vld [vmem:[#allocation9 + $0x30] sm:$0xff]  ;;  %v2908_v53 = vld [vmem:[#allocation9 + $0x48] sm:$0xff] }
 0x7ca   :  { %2701 = vmatprep.mubr.f32.mxu0 %v6568_v0  ;;  %2814 = vmatprep.mubr.f32.mxu1 %v6568_v0  ;;  %v2912_v63 = vld [vmem:[#allocation9 + $0x68] sm:$0xff]  ;;  %v2910_v29 = vld [vmem:[#allocation9 + $0x58] sm:$0xff] }
 0x7cb   :  { %v7393_v6 = vpack.c.bf16 %v2912_v63, %v2908_v53  ;;  %v2940_v53 = vld [vmem:[#allocation9 + $0x148] sm:$0xff] }
 0x7cc   :  { %5413 = vmatpush1.bf16.msra.mxu0 %v5412_v31  ;;  %5445 = vmatpush1.bf16.msra.mxu1 %v5444_v14  ;;  %v2600_v31 = vld [vmem:[#allocation8 + $0x188] sm:$0xff] }
 0x7cd   :  { %5415 = vmatprep.subr.bf16.mxu0 %v5414_v17  ;;  %5447 = vmatprep.subr.bf16.mxu1 %v5446_v20  ;;  %v2604_v14 = vld [vmem:[#allocation8 + $0x1a8] sm:$0xff]  ;;  %v5428_v17 = vpack.c.bf16 %v2595_v47, %v2591_v5  ;;  %v5460_v20 = vpack.c.bf16 %v2597_v21, %v2593_v9  ;;  %v7395_v5 = vpack.c.bf16 %v2914_v51, %v2910_v29 }
 0x7ce   :  { %v5430_v10 = vpack.c.bf16 %v2604_v14, %v2600_v31  ;;  %v2916_v21 = vld [vmem:[#allocation9 + $0x88] sm:$0xff]  ;;  %v2918_v14 = vld [vmem:[#allocation9 + $0x98] sm:$0xff] }
 0x7cf   :  { %v2920_v31 = vld [vmem:[#allocation9 + $0xa8] sm:$0xff] }
 0x7d0   :  { %5417 = vmatpush1.bf16.msra.mxu0 %v5416_v58  ;;  %5449 = vmatpush1.bf16.msra.mxu1 %v5448_v60  ;;  %v2608_v58 = vld [vmem:[#allocation8 + $0x1c8] sm:$0xff]  ;;  %v7405_v54 = vpack.c.bf16 %v2920_v31, %v2916_v21  ;;  %v2943_v21 = vld [vmem:[#allocation9 + $0x160] sm:$0xff]  ;;  %v2941_v31 = vld [vmem:[#allocation9 + $0x150] sm:$0xff] }
 0x7d1   :  { %5419 = vmatprep.subr.bf16.mxu0 %v5418_v41  ;;  %5451 = vmatprep.subr.bf16.mxu1 %v5450_v49  ;;  %v2612_v60 = vld [vmem:[#allocation8 + $0x1e8] sm:$0xff]  ;;  %v5432_v41 = vpack.c.bf16 %v2603_v45, %v2599_v30  ;;  %v5464_v49 = vpack.c.bf16 %v2605_v44, %v2601_v35  ;;  %v7407_v30 = vpack.c.bf16 %v2922_v4, %v2918_v14  ;;  %v2945_v14 = vld [vmem:[#allocation9 + $0x170] sm:$0xff] }
 0x7d2   :  { %v5434_v16 = vpack.c.bf16 %v2612_v60, %v2608_v58  ;;  %v2924_v44 = vld [vmem:[#allocation9 + $0xc8] sm:$0xff]  ;;  %v2926_v60 = vld [vmem:[#allocation9 + $0xd8] sm:$0xff] }
 0x7d3   :  { %v2928_v58 = vld [vmem:[#allocation9 + $0xe8] sm:$0xff] }
 0x7d4   :  { %5421 = vmatpush1.bf16.msra.mxu0 %v5420_v24  ;;  %5453 = vmatpush1.bf16.msra.mxu1 %v5452_v23  ;;  %v5436_v24 = vpack.c.bf16 %v2611_v33, %v2607_v26  ;;  %v5468_v23 = vpack.c.bf16 %v2613_v27, %v2609_v7  ;;  %v7416_v18 = vpack.c.bf16 %v2928_v58, %v2924_v44  ;;  %v2929_v33 = vld [vmem:[#allocation9 + $0xf0] sm:$0xff]  ;;  %v2932_v7 = vld [vmem:[#allocation9 + $0x108] sm:$0xff] }
 0x7d5   :  { %5423 = vmatprep.subr.bf16.mxu0 %v5422_v36  ;;  %5455 = vmatprep.subr.bf16.mxu1 %v5454_v52  ;;  %v2901_v52 = vld [vmem:[#allocation9 + $0x10] sm:$0xff]  ;;  %v7419_v26 = vpack.c.bf16 %v2930_v1, %v2926_v60  ;;  %v2944_v63 = vld [vmem:[#allocation9 + $0x168] sm:$0xff]  ;;  %v7448_v44 = vpack.c.bf16 %v2945_v14, %v2941_v31  ;;  %v2947_v60 = vld [vmem:[#allocation9 + $0x180] sm:$0xff] }
 0x7d6   :  { %v7438_v51 = vpack.c.bf16 %v2944_v63, %v2940_v53  ;;  %v2948_v4 = vld [vmem:[#allocation9 + $0x188] sm:$0xff]  ;;  %v2951_v1 = vld [vmem:[#allocation9 + $0x1a0] sm:$0xff] }
 0x7d8   :  { %5425 = vmatpush1.bf16.msra.mxu0 %v5424_v40  ;;  %5457 = vmatpush1.bf16.msra.mxu1 %v5456_v48  ;;  %v2907_v40 = vld [vmem:[#allocation9 + $0x40] sm:$0xff] }
 0x7d9   :  { %5427 = vmatprep.subr.bf16.mxu0 %v5426_v50  ;;  %5459 = vmatprep.subr.bf16.mxu1 %v5458_v56  ;;  %v2911_v48 = vld [vmem:[#allocation9 + $0x60] sm:$0xff]  ;;  %v2909_v50 = vld [vmem:[#allocation9 + $0x50] sm:$0xff] }
 0x7da   :  { %v7397_v47 = vpack.c.bf16 %v2911_v48, %v2907_v40  ;;  %v2913_v56 = vld [vmem:[#allocation9 + $0x70] sm:$0xff]  ;;  %v2942_v40 = vld [vmem:[#allocation9 + $0x158] sm:$0xff] }
 0x7db   :  { %v7400_v9 = vpack.c.bf16 %v2913_v56, %v2909_v50  ;;  %v2946_v48 = vld [vmem:[#allocation9 + $0x178] sm:$0xff]  ;;  %v2939_v50 = vld [vmem:[#allocation9 + $0x140] sm:$0xff] }
 0x7dc   :  { %5429 = vmatpush1.bf16.msra.mxu0 %v5428_v17  ;;  %5461 = vmatpush1.bf16.msra.mxu1 %v5460_v20  ;;  %v2915_v17 = vld [vmem:[#allocation9 + $0x80] sm:$0xff]  ;;  %v7441_v56 = vpack.c.bf16 %v2946_v48, %v2942_v40  ;;  %v2957_v40 = vld [vmem:[#allocation9 + $0x1d0] sm:$0xff] }
 0x7dd   :  { %5431 = vmatprep.subr.bf16.mxu0 %v5430_v10  ;;  %5463 = vmatprep.subr.bf16.mxu1 %v5462_v15  ;;  %v2919_v20 = vld [vmem:[#allocation9 + $0xa0] sm:$0xff]  ;;  %v2917_v10 = vld [vmem:[#allocation9 + $0x90] sm:$0xff] }
 0x7de   :  { %v7409_v45 = vpack.c.bf16 %v2919_v20, %v2915_v17  ;;  %v2921_v15 = vld [vmem:[#allocation9 + $0xb0] sm:$0xff]  ;;  %v2952_v17 = vld [vmem:[#allocation9 + $0x1a8] sm:$0xff]  ;;  %v2950_v20 = vld [vmem:[#allocation9 + $0x198] sm:$0xff] }
 0x7df   :  { %v7412_v35 = vpack.c.bf16 %v2921_v15, %v2917_v10  ;;  %v7444_v10 = vpack.c.bf16 %v2943_v21, %v2939_v50  ;;  %v2954_v15 = vld [vmem:[#allocation9 + $0x1b8] sm:$0xff]  ;;  %v7450_v58 = vpack.c.bf16 %v2952_v17, %v2948_v4  ;;  %v2961_v48 = vld [vmem:[#allocation9 + $0x1f0] sm:$0xff] }
 0x7e0   :  { %5433 = vmatpush1.bf16.msra.mxu0 %v5432_v41  ;;  %5465 = vmatpush1.bf16.msra.mxu1 %v5464_v49  ;;  %v2923_v41 = vld [vmem:[#allocation9 + $0xc0] sm:$0xff]  ;;  %v7472_v50 = vpack.c.bf16 %v2961_v48, %v2957_v40 }
 0x7e1   :  { %5435 = vmatprep.subr.bf16.mxu0 %v5434_v16  ;;  %5467 = vmatprep.subr.bf16.mxu1 %v5466_v12  ;;  %v2927_v49 = vld [vmem:[#allocation9 + $0xe0] sm:$0xff]  ;;  %v2925_v12 = vld [vmem:[#allocation9 + $0xd0] sm:$0xff] }
 0x7e2   :  { %v7421_v16 = vpack.c.bf16 %v2927_v49, %v2923_v41  ;;  %v7424_v27 = vpack.c.bf16 %v2929_v33, %v2925_v12  ;;  %v7453_v41 = vpack.c.bf16 %v2954_v15, %v2950_v20  ;;  %v2949_v49 = vld [vmem:[#allocation9 + $0x190] sm:$0xff]  ;;  %v7456_v33 = vpack.c.bf16 %v2951_v1, %v2947_v60 }
 0x7e3   :  { %v2953_v12 = vld [vmem:[#allocation9 + $0x1b0] sm:$0xff] }
 0x7e4   :  { %5437 = vmatpush1.bf16.msra.mxu0 %v5436_v24  ;;  %5469 = vmatpush1.bf16.msra.mxu1 %v5468_v23  ;;  %v2936_v24 = vld [vmem:[#allocation9 + $0x128] sm:$0xff]  ;;  %v2934_v23 = vld [vmem:[#allocation9 + $0x118] sm:$0xff] }
 0x7e7   :  { %2702 = vmatmul.mubr.f32.vlgmr.msra.gmra.mrb[16].mxu0 %v6968_v22  ;;  %2815 = vmatmul.mubr.f32.vlgmr.msra.gmra.mrb[16].mxu1 %v6968_v22  ;;  %v2900_v22 = vld [vmem:[#allocation9 + $0x8] sm:$0xff] }
 0x7e8   :  { %2707 = vmatprep.mubr.f32.mxu0 %v6568_v0  ;;  %2820 = vmatprep.mubr.f32.mxu1 %v6568_v0 }
 0x7eb   :  { %2708 = vmatmul.mubr.f32.gmra.mrb[18].mxu0 %v7022_v28  ;;  %2821 = vmatmul.mubr.f32.gmra.mrb[18].mxu1 %v7022_v28  ;;  %v2904_v28 = vld [vmem:[#allocation9 + $0x28] sm:$0xff] }
 0x7ec   :  { %2713 = vmatprep.mubr.f32.mxu0 %v6568_v0  ;;  %2826 = vmatprep.mubr.f32.mxu1 %v6568_v0 }
 0x7ef   :  { %2714 = vmatmul.mubr.f32.gmra.mrb[20].mxu0 %v7145_v13  ;;  %2827 = vmatmul.mubr.f32.gmra.mrb[20].mxu1 %v7145_v13  ;;  %v2902_v13 = vld [vmem:[#allocation9 + $0x18] sm:$0xff] }
 0x7f0   :  { %2719 = vmatprep.mubr.f32.mxu0 %v6568_v0  ;;  %2832 = vmatprep.mubr.f32.mxu1 %v6568_v0 }
 0x7f3   :  { %2720 = vmatmul.mubr.f32.gmra.mrb[22].mxu0 %v7203_v43  ;;  %2833 = vmatmul.mubr.f32.gmra.mrb[22].mxu1 %v7203_v43  ;;  %v7381_v43 = vpack.c.bf16 %v2904_v28, %v2900_v22  ;;  %v2938_v22 = vld [vmem:[#allocation9 + $0x138] sm:$0xff]  ;;  %v7427_v28 = vpack.c.bf16 %v2936_v24, %v2932_v7  ;;  %v7460_v7 = vpack.c.bf16 %v2953_v12, %v2949_v49  ;;  %v2956_v24 = vld [vmem:[#allocation9 + $0x1c8] sm:$0xff] }
 0x7f4   :  { %2725 = vmatprep.mubr.f32.mxu0 %v6568_v0  ;;  %2838 = vmatprep.mubr.f32.mxu1 %v6568_v0 }
 0x7f5   :  { %5471 = vmatprep.subr.bf16.mxu0 %v7381_v43 }
 0x7f7   :  { %2726 = vmatmul.mubr.f32.gmra.mrb[24].mxu0 %v7259_v38  ;;  %2839 = vmatmul.mubr.f32.gmra.mrb[24].mxu1 %v7259_v38  ;;  %v2906_v38 = vld [vmem:[#allocation9 + $0x38] sm:$0xff] }
 0x7f8   :  { %2731 = vmatprep.mubr.f32.mxu0 %v6568_v0  ;;  %2844 = vmatprep.mubr.f32.mxu1 %v6568_v0  ;;  %v7383_v55 = vpack.c.bf16 %v2906_v38, %v2902_v13  ;;  %v7429_v13 = vpack.c.bf16 %v2938_v22, %v2934_v23  ;;  %v2931_v38 = vld [vmem:[#allocation9 + $0x100] sm:$0xff]  ;;  %v2960_v23 = vld [vmem:[#allocation9 + $0x1e8] sm:$0xff]  ;;  %v2958_v22 = vld [vmem:[#allocation9 + $0x1d8] sm:$0xff] }
 0x7fa   :  { %5503 = vmatprep.subr.bf16.mxu1 %v7383_v55 }
 0x7fb   :  { %2732 = vmatmul.mubr.f32.gmra.mrb[26].mxu0 %v7316_v57  ;;  %2845 = vmatmul.mubr.f32.gmra.mrb[26].mxu1 %v7316_v57  ;;  %v2903_v57 = vld [vmem:[#allocation9 + $0x20] sm:$0xff] }
 0x7fc   :  { %2737 = vmatprep.mubr.f32.mxu0 %v6568_v0  ;;  %2850 = vmatprep.mubr.f32.mxu1 %v6568_v0  ;;  %v7385_v36 = vpack.c.bf16 %v2903_v57, %v2899_v11  ;;  %v2935_v11 = vld [vmem:[#allocation9 + $0x120] sm:$0xff]  ;;  %v2933_v57 = vld [vmem:[#allocation9 + $0x110] sm:$0xff] }
 0x7fe   :  { %5473 = vmatpush1.bf16.msra.mxu0 %v7385_v36 }
 0x7ff   :  { %2738 = vmatmul.mubr.f32.gmra.mrb[28].mxu0 %v7346_v34  ;;  %2851 = vmatmul.mubr.f32.gmra.mrb[28].mxu1 %v7346_v34  ;;  %v7388_v34 = vpack.c.bf16 %v2905_v37, %v2901_v52  ;;  %v7432_v52 = vpack.c.bf16 %v2935_v11, %v2931_v38  ;;  %v2937_v37 = vld [vmem:[#allocation9 + $0x130] sm:$0xff]  ;;  %v7465_v38 = vpack.c.bf16 %v2960_v23, %v2956_v24  ;;  %v2962_v11 = vld [vmem:[#allocation9 + $0x1f8] sm:$0xff] }
 0x800   :  { %2743 = vmatprep.mubr.f32.mxu0 %v6568_v0  ;;  %2856 = vmatprep.mubr.f32.mxu1 %v6568_v0  ;;  %v7436_v29 = vpack.c.bf16 %v2937_v37, %v2933_v57  ;;  %v2955_v57 = vld [vmem:[#allocation9 + $0x1c0] sm:$0xff]  ;;  %v7467_v53 = vpack.c.bf16 %v2962_v11, %v2958_v22 }
 0x801   :  { %5505 = vmatpush1.bf16.msra.mxu1 %v7388_v34  ;;  %5475 = vmatprep.subr.bf16.mxu0 %v7393_v6  ;;  %v2959_v37 = vld [vmem:[#allocation9 + $0x1e0] sm:$0xff] }
 0x802   :  { %5507 = vmatprep.subr.bf16.mxu1 %v7395_v5  ;;  %5477 = vmatpush1.bf16.msra.mxu0 %v7397_v47  ;;  %v7469_v63 = vpack.c.bf16 %v2959_v37, %v2955_v57  ;;  %v2288_v57 = vmul.f32 %v7343_v59, %v7335_v61  ;;  %v2615_v61 = vld [vmem:[%s7998_s7] sm:$0xf] }
 0x803   :  { %5479 = vmatprep.subr.bf16.mxu0 %v7405_v54 }
 0x805   :  { %5509 = vmatpush1.bf16.msra.mxu1 %v7400_v9 }
 0x806   :  { %5511 = vmatprep.subr.bf16.mxu1 %v7407_v30  ;;  %5481 = vmatpush1.bf16.msra.mxu0 %v7409_v45 }
 0x807   :  { %5483 = vmatprep.subr.bf16.mxu0 %v7416_v18 }
 0x809   :  { %5513 = vmatpush1.bf16.msra.mxu1 %v7412_v35 }
 0x80a   :  { %5515 = vmatprep.subr.bf16.mxu1 %v7419_v26  ;;  %5485 = vmatpush1.bf16.msra.mxu0 %v7421_v16 }
 0x80b   :  { %5487 = vmatprep.subr.bf16.mxu0 %v7427_v28 }
 0x80d   :  { %5517 = vmatpush1.bf16.msra.mxu1 %v7424_v27 }
 0x80e   :  { %5519 = vmatprep.subr.bf16.mxu1 %v7429_v13  ;;  %5489 = vmatpush1.bf16.msra.mxu0 %v7432_v52 }
 0x80f   :  { %5491 = vmatprep.subr.bf16.mxu0 %v7438_v51 }
 0x811   :  { %5521 = vmatpush1.bf16.msra.mxu1 %v7436_v29 }
 0x812   :  { %5523 = vmatprep.subr.bf16.mxu1 %v7441_v56  ;;  %5493 = vmatpush1.bf16.msra.mxu0 %v7444_v10 }
 0x813   :  { %5495 = vmatprep.subr.bf16.mxu0 %v7450_v58 }
 0x815   :  { %5525 = vmatpush1.bf16.msra.mxu1 %v7448_v44 }
 0x816   :  { %5527 = vmatprep.subr.bf16.mxu1 %v7453_v41  ;;  %5497 = vmatpush1.bf16.msra.mxu0 %v7456_v33 }
 0x817   :  { %5499 = vmatprep.subr.bf16.mxu0 %v7465_v38 }
 0x819   :  { %5529 = vmatpush1.bf16.msra.mxu1 %v7460_v7 }
 0x81a   :  { %5531 = vmatprep.subr.bf16.mxu1 %v7467_v53  ;;  %5501 = vmatpush1.bf16.msra.mxu0 %v7469_v63 }
 0x81b   :  { %5535 = vmatprep.subr.bf16.mxu0 %v7381_v43 }
 0x81d   :  { %5533 = vmatpush1.bf16.msra.mxu1 %v7472_v50 }
 0x81e   :  { %5567 = vmatprep.subr.bf16.mxu1 %v7383_v55 }
 0x89a   :  { %v2429_v21 = vpop.f32.mrb[14].mxu0  ;;  %v2500_v31 = vpop.f32.mrb[14].mxu1 }
 0x89b   :  { %v6060_v14 = vadd.f32 %v2429_v21, %v6947_v2  ;;  %v2431_v4 = vpop.f32.mrb[15].mxu0  ;;  %v2502_v17 = vpop.f32.mrb[15].mxu1  ;;  %v6076_v12 = vadd.f32 %v2500_v31, %v6963_v32  ;;  %v2281_v2 = vmul.f32 %v7341_v19, %v7338_v46  ;;  %v7529_v46 = vrot.slane %v2615_v61, %v6938_v42 }
 0x89c   :  { %v6061_v20 = vadd.f32 %v2431_v4, %v6950_v3  ;;  %v6077_v1 = vadd.f32 %v2502_v17, %v6957_v25  ;;  %v7532_v19 = vrot.slane %v2615_v61, %v6944_v62 }
 0x89d   :  { %v4760_v15 = vmul.f32 -1.442695, %v6060_v14  ;;  %v2289_v40 = vadd.f32 %v2288_v57, %v2281_v2  ;;  %v7538_v2 = vrot.slane %v2615_v61, %v197_v8  ;;  %v8005_v57 = vsub.s32 2, %v6935_v39 }
 0x89e   :  { %v4761_v60 = vmul.f32 -1.442695, %v6061_v20  ;;  %v4762_v49 = vmul.f32 -1.442695, %v6077_v1 }
 0x89f   :  { %6299 = vpow2.f32 %v4760_v15  ;;  %v2538_v15 = vpop.permute.xlu0 %2537 }
 0x8a0   :  { %6301 = vpow2.f32 %v4761_v60 }
 0x8a1   :  { %6303 = vpow2.f32 %v4762_v49 }
 0x8a2   :  { %6305 = vtanh.f32 %v6076_v12 }
 0x8a9   :  { %v6300_v24 = vpop.eup %6299 }
 0x8aa   :  { %v6302_v23 = vpop.eup %6301  ;;  %v2514_v22 = vadd.f32 1.0, %v6300_v24 }
 0x8ab   :  { %v2520_v11 = vadd.f32 1.0, %v6302_v23  ;;  %v6304_v3 = vpop.eup %6303 }
 0x8ac   :  { %6307 = vrcp.f32 %v2514_v22  ;;  %v6306_v37 = vpop.eup %6305  ;;  %v2527_v21 = vadd.f32 1.0, %v6304_v3 }
 0x8ad   :  { %6309 = vrcp.f32 %v2520_v11 }
 0x8ae   :  { %6311 = vrcp.f32 %v2527_v21 }
 0x8b6   :  { %v6308_v25 = vpop.eup %6307 }
 0x8b7   :  { %v6310_v48 = vpop.eup %6309  ;;  %v2531_v32 = vmul.f32 %v6308_v25, %v6306_v37  ;;  %v7543_v37 = vrot.slane %v2615_v61, %v8005_v57  ;;  %v3144_v61 = vpop.permute.xlu0 %3143 }
 0x8b8   :  { %v2530_v31 = vmul.f32 %v6310_v48, %v2289_v40  ;;  %v6312_v4 = vpop.eup %6311 }
 0x8ba   :  { %v2532_v14 = vadd.f32 %v2531_v32, %v2530_v31 }
 0x8bc   :  { %6313 = vtanh.f32 %v2532_v14 }
 0x8c6   :  { %v6314_v17 = vpop.eup %6313 }
 0x8c7   :  { %v2534_v20 = vmul.f32 %v6314_v17, %v6312_v4 }
 0x8c9   :  { %v2540_v60 = vmul.f32 %v2538_v15, %v2534_v20 }
 0x8cb   :  { %2744 = vmatmul.mubr.f32.gmra.mrb[30].mxu0 %v2540_v60  ;;  %2857 = vmatmul.mubr.f32.gmra.mrb[30].mxu1 %v2540_v60 }
 0x8cc   :  { %3027 = vmatprep.mubr.f32.mxu0 %v6568_v0  ;;  %3098 = vmatprep.mubr.f32.mxu1 %v6568_v0 }
 0x8cf   :  { %3028 = vmatmul.mubr.f32.vlgmr.msra.gmra.mrb[16].mxu0 %v6568_v0  ;;  %3099 = vmatmul.mubr.f32.vlgmr.msra.gmra.mrb[16].mxu1 %v6568_v0 }
 0x8d0   :  { %5537 = vmatpush1.bf16.msra.mxu0 %v7385_v36  ;;  %5569 = vmatpush1.bf16.msra.mxu1 %v7388_v34 }
 0x8d1   :  { %5539 = vmatprep.subr.bf16.mxu0 %v7393_v6  ;;  %5571 = vmatprep.subr.bf16.mxu1 %v7395_v5 }
 0x8d2   :  { %3218 = vmatprep.mubr.f32.mxu0 %v6568_v0  ;;  %3289 = vmatprep.mubr.f32.mxu1 %v6568_v0 }
 0x8d4   :  { %5541 = vmatpush1.bf16.msra.mxu0 %v7397_v47  ;;  %5573 = vmatpush1.bf16.msra.mxu1 %v7400_v9 }
 0x8d5   :  { %5543 = vmatprep.subr.bf16.mxu0 %v7405_v54  ;;  %5575 = vmatprep.subr.bf16.mxu1 %v7407_v30 }
 0x8d8   :  { %5545 = vmatpush1.bf16.msra.mxu0 %v7409_v45  ;;  %5577 = vmatpush1.bf16.msra.mxu1 %v7412_v35 }
 0x8d9   :  { %5547 = vmatprep.subr.bf16.mxu0 %v7416_v18  ;;  %5579 = vmatprep.subr.bf16.mxu1 %v7419_v26 }
 0x8dc   :  { %5549 = vmatpush1.bf16.msra.mxu0 %v7421_v16  ;;  %5581 = vmatpush1.bf16.msra.mxu1 %v7424_v27 }
 0x8dd   :  { %5551 = vmatprep.subr.bf16.mxu0 %v7427_v28  ;;  %5583 = vmatprep.subr.bf16.mxu1 %v7429_v13 }
 0x8e0   :  { %5553 = vmatpush1.bf16.msra.mxu0 %v7432_v52  ;;  %5585 = vmatpush1.bf16.msra.mxu1 %v7436_v29 }
 0x8e1   :  { %5555 = vmatprep.subr.bf16.mxu0 %v7438_v51  ;;  %5587 = vmatprep.subr.bf16.mxu1 %v7441_v56 }
 0x8e4   :  { %5557 = vmatpush1.bf16.msra.mxu0 %v7444_v10  ;;  %5589 = vmatpush1.bf16.msra.mxu1 %v7448_v44 }
 0x8e5   :  { %5559 = vmatprep.subr.bf16.mxu0 %v7450_v58  ;;  %5591 = vmatprep.subr.bf16.mxu1 %v7453_v41 }
 0x8e8   :  { %5561 = vmatpush1.bf16.msra.mxu0 %v7456_v33  ;;  %5593 = vmatpush1.bf16.msra.mxu1 %v7460_v7 }
 0x8e9   :  { %5563 = vmatprep.subr.bf16.mxu0 %v7465_v38  ;;  %5595 = vmatprep.subr.bf16.mxu1 %v7467_v53 }
 0x8ec   :  { %5565 = vmatpush1.bf16.msra.mxu0 %v7469_v63  ;;  %5597 = vmatpush1.bf16.msra.mxu1 %v7472_v50 }
 0x8ed   :  { %5599 = vmatprep.subr.bf16.mxu0 %v7381_v43  ;;  %5631 = vmatprep.subr.bf16.mxu1 %v7383_v55 }
 0x9a2   :  { %v3029_v59 = vpop.f32.mrb[16].mxu0  ;;  %v3100_v1 = vpop.f32.mrb[16].mxu1 }
 0x9a3   :  { %v6078_v49 = vadd.f32 %v3029_v59, %v7529_v46  ;;  %v3031_v12 = vpop.f32.mrb[17].mxu0  ;;  %v3102_v24 = vpop.f32.mrb[17].mxu1  ;;  %v6094_v40 = vadd.f32 %v3100_v1, %v7543_v37  ;;  %v3146_v1 = vmul.f32 0.0, %v3144_v61 }
 0x9a4   :  { %v6079_v23 = vadd.f32 %v3031_v12, %v7532_v19  ;;  %v6095_v3 = vadd.f32 %v3102_v24, %v7538_v2  ;;  %v3137_v59 = vpop.permute.xlu1 %3136 }
 0x9a5   :  { %v4763_v22 = vmul.f32 -1.442695, %v6078_v49 }
 0x9a6   :  { %v4764_v11 = vmul.f32 -1.442695, %v6079_v23  ;;  %v4765_v25 = vmul.f32 -1.442695, %v6095_v3 }
 0x9a7   :  { %6315 = vpow2.f32 %v4763_v22 }
 0x9a8   :  { %6317 = vpow2.f32 %v4764_v11 }
 0x9a9   :  { %6319 = vpow2.f32 %v4765_v25 }
 0x9aa   :  { %6321 = vtanh.f32 %v6094_v40 }
 0x9b1   :  { %v6316_v48 = vpop.eup %6315 }
 0x9b2   :  { %v6318_v32 = vpop.eup %6317  ;;  %v3113_v21 = vadd.f32 1.0, %v6316_v48 }
 0x9b3   :  { %v3119_v31 = vadd.f32 1.0, %v6318_v32  ;;  %v6320_v8 = vpop.eup %6319 }
 0x9b4   :  { %6323 = vrcp.f32 %v3113_v21  ;;  %v6322_v14 = vpop.eup %6321  ;;  %v3126_v15 = vadd.f32 1.0, %v6320_v8 }
 0x9b5   :  { %6325 = vrcp.f32 %v3119_v31 }
 0x9b6   :  { %6327 = vrcp.f32 %v3126_v15 }
 0x9be   :  { %v6324_v4 = vpop.eup %6323 }
 0x9bf   :  { %v6326_v17 = vpop.eup %6325  ;;  %v3130_v20 = vmul.f32 %v6324_v4, %v6322_v14 }
 0x9c0   :  { %v3129_v39 = vmul.f32 0.0, %v6326_v17  ;;  %v6328_v24 = vpop.eup %6327 }
 0x9c2   :  { %v3131_v60 = vadd.f32 %v3130_v20, %v3129_v39 }
 0x9c4   :  { %6329 = vtanh.f32 %v3131_v60  ;;  %v3139_v49 = vmul.f32 %v3137_v59, %v3131_v60 }
 0x9c6   :  { %v7546_v12 = vadd.f32 %v3146_v1, %v3139_v49 }
 0x9ce   :  { %v6330_v23 = vpop.eup %6329 }
 0x9cf   :  { %v3133_v22 = vmul.f32 %v6330_v23, %v6328_v24 }
 0x9d1   :  { %v3148_v11 = vmul.f32 %v3137_v59, %v3133_v22 }
 0x9d3   :  { %v7548_v3 = vadd.f32 %v3148_v11, %v3146_v1 }
 0x9d5   :  { %3219 = vmatmul.mubr.f32.vlgmr.msra.gmra.mrb[18].mxu0 %v7548_v3  ;;  %3290 = vmatmul.mubr.f32.vlgmr.msra.gmra.mrb[18].mxu1 %v7548_v3 }
 0x9d6   :  { %5601 = vmatpush1.bf16.msra.mxu0 %v7385_v36  ;;  %5633 = vmatpush1.bf16.msra.mxu1 %v7388_v34 }
 0x9d7   :  { %5603 = vmatprep.subr.bf16.mxu0 %v7393_v6  ;;  %5635 = vmatprep.subr.bf16.mxu1 %v7395_v5 }
 0x9d8   :  { %3410 = vmatprep.mubr.f32.mxu0 %v6568_v0  ;;  %3481 = vmatprep.mubr.f32.mxu1 %v6568_v0 }
 0x9da   :  { %5605 = vmatpush1.bf16.msra.mxu0 %v7397_v47  ;;  %5637 = vmatpush1.bf16.msra.mxu1 %v7400_v9 }
 0x9db   :  { %5607 = vmatprep.subr.bf16.mxu0 %v7405_v54  ;;  %5639 = vmatprep.subr.bf16.mxu1 %v7407_v30 }
 0x9de   :  { %5609 = vmatpush1.bf16.msra.mxu0 %v7409_v45  ;;  %5641 = vmatpush1.bf16.msra.mxu1 %v7412_v35 }
 0x9df   :  { %5611 = vmatprep.subr.bf16.mxu0 %v7416_v18  ;;  %5643 = vmatprep.subr.bf16.mxu1 %v7419_v26 }
 0x9e2   :  { %5613 = vmatpush1.bf16.msra.mxu0 %v7421_v16  ;;  %5645 = vmatpush1.bf16.msra.mxu1 %v7424_v27 }
 0x9e3   :  { %5615 = vmatprep.subr.bf16.mxu0 %v7427_v28  ;;  %5647 = vmatprep.subr.bf16.mxu1 %v7429_v13 }
 0x9e6   :  { %5617 = vmatpush1.bf16.msra.mxu0 %v7432_v52  ;;  %5649 = vmatpush1.bf16.msra.mxu1 %v7436_v29 }
 0x9e7   :  { %5619 = vmatprep.subr.bf16.mxu0 %v7438_v51  ;;  %5651 = vmatprep.subr.bf16.mxu1 %v7441_v56 }
 0x9ea   :  { %5621 = vmatpush1.bf16.msra.mxu0 %v7444_v10  ;;  %5653 = vmatpush1.bf16.msra.mxu1 %v7448_v44 }
 0x9eb   :  { %5623 = vmatprep.subr.bf16.mxu0 %v7450_v58  ;;  %5655 = vmatprep.subr.bf16.mxu1 %v7453_v41 }
 0x9ee   :  { %5625 = vmatpush1.bf16.msra.mxu0 %v7456_v33  ;;  %5657 = vmatpush1.bf16.msra.mxu1 %v7460_v7 }
 0x9ef   :  { %5627 = vmatprep.subr.bf16.mxu0 %v7465_v38  ;;  %5659 = vmatprep.subr.bf16.mxu1 %v7467_v53 }
 0x9f2   :  { %5629 = vmatpush1.bf16.msra.mxu0 %v7469_v63  ;;  %5661 = vmatpush1.bf16.msra.mxu1 %v7472_v50 }
 0x9f3   :  { %5663 = vmatprep.subr.bf16.mxu0 %v7381_v43  ;;  %5695 = vmatprep.subr.bf16.mxu1 %v7383_v55 }
 0xaa8   :  { %v3220_v57 = vpop.f32.mrb[18].mxu0  ;;  %v3291_v25 = vpop.f32.mrb[18].mxu1 }
 0xaa9   :  { %v6080_v40 = vadd.f32 %v3220_v57, %v7529_v46  ;;  %v3222_v48 = vpop.f32.mrb[19].mxu0  ;;  %v3293_v32 = vpop.f32.mrb[19].mxu1  ;;  %v6096_v17 = vadd.f32 %v3291_v25, %v7543_v37 }
 0xaaa   :  { %v6081_v21 = vadd.f32 %v3222_v48, %v7532_v19  ;;  %v6097_v14 = vadd.f32 %v3293_v32, %v7538_v2  ;;  %v7594_v48 = vpop.permute.xlu0 %3334  ;;  %v3328_v32 = vpop.permute.xlu1 %3327 }
 0xaab   :  { %v4767_v31 = vmul.f32 -1.442695, %v6080_v40 }
 0xaac   :  { %v4768_v8 = vmul.f32 -1.442695, %v6081_v21  ;;  %v4769_v4 = vmul.f32 -1.442695, %v6097_v14 }
 0xaad   :  { %6331 = vpow2.f32 %v4767_v31  ;;  %v3340_v31 = vmul.f32 %v7594_v48, %v7548_v3 }
 0xaae   :  { %6333 = vpow2.f32 %v4768_v8 }
 0xaaf   :  { %6335 = vpow2.f32 %v4769_v4 }
 0xab0   :  { %6337 = vtanh.f32 %v6096_v17 }
 0xab7   :  { %v6332_v20 = vpop.eup %6331 }
 0xab8   :  { %v6334_v15 = vpop.eup %6333  ;;  %v3304_v39 = vadd.f32 1.0, %v6332_v20 }
 0xab9   :  { %v3310_v60 = vadd.f32 1.0, %v6334_v15  ;;  %v6336_v61 = vpop.eup %6335 }
 0xaba   :  { %6339 = vrcp.f32 %v3304_v39  ;;  %v6338_v59 = vpop.eup %6337  ;;  %v3317_v23 = vadd.f32 1.0, %v6336_v61 }
 0xabb   :  { %6341 = vrcp.f32 %v3310_v60 }
 0xabc   :  { %6343 = vrcp.f32 %v3317_v23 }
 0xac4   :  { %v6340_v1 = vpop.eup %6339 }
 0xac5   :  { %v6342_v49 = vpop.eup %6341  ;;  %v3321_v24 = vmul.f32 %v6340_v1, %v6338_v59 }
 0xac6   :  { %v3320_v22 = vmul.f32 %v6342_v49, %v7546_v12  ;;  %v6344_v57 = vpop.eup %6343 }
 0xac8   :  { %v7591_v11 = vadd.f32 %v3321_v24, %v3320_v22 }
 0xaca   :  { %6345 = vtanh.f32 %v7591_v11 }
 0xad4   :  { %v6346_v25 = vpop.eup %6345 }
 0xad5   :  { %v3324_v40 = vmul.f32 %v6346_v25, %v6344_v57  ;;  %v3330_v57 = vmul.f32 %v3328_v32, %v7591_v11 }
 0xad7   :  { %v3339_v21 = vmul.f32 %v3328_v32, %v3324_v40  ;;  %v3337_v40 = vmul.f32 %v7594_v48, %v7546_v12  ;;  %v3520_v12 = vpop.permute.xlu1 %3519 }
 0xad9   :  { %v7598_v8 = vadd.f32 %v3340_v31, %v3339_v21 }
 0xadb   :  { %3411 = vmatmul.mubr.f32.vlgmr.msra.gmra.mrb[20].mxu0 %v7598_v8  ;;  %3482 = vmatmul.mubr.f32.vlgmr.msra.gmra.mrb[20].mxu1 %v7598_v8 }
 0xadc   :  { %5665 = vmatpush1.bf16.msra.mxu0 %v7385_v36  ;;  %5697 = vmatpush1.bf16.msra.mxu1 %v7388_v34 }
 0xadd   :  { %5667 = vmatprep.subr.bf16.mxu0 %v7393_v6  ;;  %5699 = vmatprep.subr.bf16.mxu1 %v7395_v5 }
 0xade   :  { %3602 = vmatprep.mubr.f32.mxu0 %v6568_v0  ;;  %3673 = vmatprep.mubr.f32.mxu1 %v6568_v0 }
 0xae0   :  { %5669 = vmatpush1.bf16.msra.mxu0 %v7397_v47  ;;  %5701 = vmatpush1.bf16.msra.mxu1 %v7400_v9 }
 0xae1   :  { %5671 = vmatprep.subr.bf16.mxu0 %v7405_v54  ;;  %5703 = vmatprep.subr.bf16.mxu1 %v7407_v30 }
 0xae4   :  { %5673 = vmatpush1.bf16.msra.mxu0 %v7409_v45  ;;  %5705 = vmatpush1.bf16.msra.mxu1 %v7412_v35 }
 0xae5   :  { %5675 = vmatprep.subr.bf16.mxu0 %v7416_v18  ;;  %5707 = vmatprep.subr.bf16.mxu1 %v7419_v26 }
 0xae8   :  { %5677 = vmatpush1.bf16.msra.mxu0 %v7421_v16  ;;  %5709 = vmatpush1.bf16.msra.mxu1 %v7424_v27 }
 0xae9   :  { %5679 = vmatprep.subr.bf16.mxu0 %v7427_v28  ;;  %5711 = vmatprep.subr.bf16.mxu1 %v7429_v13 }
 0xaec   :  { %5681 = vmatpush1.bf16.msra.mxu0 %v7432_v52  ;;  %5713 = vmatpush1.bf16.msra.mxu1 %v7436_v29 }
 0xaed   :  { %5683 = vmatprep.subr.bf16.mxu0 %v7438_v51  ;;  %5715 = vmatprep.subr.bf16.mxu1 %v7441_v56 }
 0xaf0   :  { %5685 = vmatpush1.bf16.msra.mxu0 %v7444_v10  ;;  %5717 = vmatpush1.bf16.msra.mxu1 %v7448_v44 }
 0xaf1   :  { %5687 = vmatprep.subr.bf16.mxu0 %v7450_v58  ;;  %5719 = vmatprep.subr.bf16.mxu1 %v7453_v41 }
 0xaf4   :  { %5689 = vmatpush1.bf16.msra.mxu0 %v7456_v33  ;;  %5721 = vmatpush1.bf16.msra.mxu1 %v7460_v7 }
 0xaf5   :  { %5691 = vmatprep.subr.bf16.mxu0 %v7465_v38  ;;  %5723 = vmatprep.subr.bf16.mxu1 %v7467_v53 }
 0xaf8   :  { %5693 = vmatpush1.bf16.msra.mxu0 %v7469_v63  ;;  %5725 = vmatpush1.bf16.msra.mxu1 %v7472_v50 }
 0xaf9   :  { %5727 = vmatprep.subr.bf16.mxu0 %v7381_v43  ;;  %5759 = vmatprep.subr.bf16.mxu1 %v7383_v55 }
 0xbae   :  { %v3412_v3 = vpop.f32.mrb[20].mxu0  ;;  %v3483_v14 = vpop.f32.mrb[20].mxu1 }
 0xbaf   :  { %v6082_v4 = vadd.f32 %v3412_v3, %v7529_v46  ;;  %v3414_v17 = vpop.f32.mrb[21].mxu0  ;;  %v3485_v20 = vpop.f32.mrb[21].mxu1  ;;  %v6098_v1 = vadd.f32 %v3483_v14, %v7543_v37  ;;  %v7643_v3 = vadd.f32 %v3337_v40, %v3330_v57 }
 0xbb0   :  { %v6083_v15 = vadd.f32 %v3414_v17, %v7532_v19  ;;  %v6099_v61 = vadd.f32 %v3485_v20, %v7538_v2 }
 0xbb1   :  { %v4771_v39 = vmul.f32 -1.442695, %v6082_v4 }
 0xbb2   :  { %v4772_v60 = vmul.f32 -1.442695, %v6083_v15  ;;  %v4773_v59 = vmul.f32 -1.442695, %v6099_v61 }
 0xbb3   :  { %6347 = vpow2.f32 %v4771_v39 }
 0xbb4   :  { %6349 = vpow2.f32 %v4772_v60  ;;  %v7649_v60 = vpop.permute.xlu0 %3526 }
 0xbb5   :  { %6351 = vpow2.f32 %v4773_v59  ;;  %v3532_v61 = vmul.f32 %v7649_v60, %v7598_v8 }
 0xbb6   :  { %6353 = vtanh.f32 %v6098_v1 }
 0xbbd   :  { %v6348_v49 = vpop.eup %6347 }
 0xbbe   :  { %v6350_v24 = vpop.eup %6349  ;;  %v3496_v23 = vadd.f32 1.0, %v6348_v49 }
 0xbbf   :  { %v3502_v22 = vadd.f32 1.0, %v6350_v24  ;;  %v6352_v25 = vpop.eup %6351 }
 0xbc0   :  { %6355 = vrcp.f32 %v3496_v23  ;;  %v6354_v21 = vpop.eup %6353  ;;  %v3509_v17 = vadd.f32 1.0, %v6352_v25 }
 0xbc1   :  { %6357 = vrcp.f32 %v3502_v22 }
 0xbc2   :  { %6359 = vrcp.f32 %v3509_v17 }
 0xbca   :  { %v6356_v31 = vpop.eup %6355 }
 0xbcb   :  { %v6358_v4 = vpop.eup %6357  ;;  %v3513_v14 = vmul.f32 %v6356_v31, %v6354_v21 }
 0xbcc   :  { %v3512_v20 = vmul.f32 %v6358_v4, %v7643_v3  ;;  %v6360_v39 = vpop.eup %6359 }
 0xbce   :  { %v7646_v15 = vadd.f32 %v3513_v14, %v3512_v20 }
 0xbd0   :  { %6361 = vtanh.f32 %v7646_v15 }
 0xbda   :  { %v6362_v11 = vpop.eup %6361 }
 0xbdb   :  { %v3516_v32 = vmul.f32 %v6362_v11, %v6360_v39  ;;  %v3522_v39 = vmul.f32 %v3520_v12, %v7646_v15 }
 0xbdd   :  { %v3531_v48 = vmul.f32 %v3520_v12, %v3516_v32  ;;  %v3529_v32 = vmul.f32 %v7649_v60, %v7643_v3  ;;  %v3712_v3 = vpop.permute.xlu1 %3711 }
 0xbdf   :  { %v7653_v59 = vadd.f32 %v3532_v61, %v3531_v48 }
 0xbe1   :  { %3603 = vmatmul.mubr.f32.vlgmr.msra.gmra.mrb[22].mxu0 %v7653_v59  ;;  %3674 = vmatmul.mubr.f32.vlgmr.msra.gmra.mrb[22].mxu1 %v7653_v59 }
 0xbe2   :  { %5729 = vmatpush1.bf16.msra.mxu0 %v7385_v36  ;;  %5761 = vmatpush1.bf16.msra.mxu1 %v7388_v34 }
 0xbe3   :  { %5731 = vmatprep.subr.bf16.mxu0 %v7393_v6  ;;  %5763 = vmatprep.subr.bf16.mxu1 %v7395_v5 }
 0xbe4   :  { %3794 = vmatprep.mubr.f32.mxu0 %v6568_v0  ;;  %3865 = vmatprep.mubr.f32.mxu1 %v6568_v0 }
 0xbe6   :  { %5733 = vmatpush1.bf16.msra.mxu0 %v7397_v47  ;;  %5765 = vmatpush1.bf16.msra.mxu1 %v7400_v9 }
 0xbe7   :  { %5735 = vmatprep.subr.bf16.mxu0 %v7405_v54  ;;  %5767 = vmatprep.subr.bf16.mxu1 %v7407_v30 }
 0xbea   :  { %5737 = vmatpush1.bf16.msra.mxu0 %v7409_v45  ;;  %5769 = vmatpush1.bf16.msra.mxu1 %v7412_v35 }
 0xbeb   :  { %5739 = vmatprep.subr.bf16.mxu0 %v7416_v18  ;;  %5771 = vmatprep.subr.bf16.mxu1 %v7419_v26 }
 0xbee   :  { %5741 = vmatpush1.bf16.msra.mxu0 %v7421_v16  ;;  %5773 = vmatpush1.bf16.msra.mxu1 %v7424_v27 }
 0xbef   :  { %5743 = vmatprep.subr.bf16.mxu0 %v7427_v28  ;;  %5775 = vmatprep.subr.bf16.mxu1 %v7429_v13 }
 0xbf2   :  { %5745 = vmatpush1.bf16.msra.mxu0 %v7432_v52  ;;  %5777 = vmatpush1.bf16.msra.mxu1 %v7436_v29 }
 0xbf3   :  { %5747 = vmatprep.subr.bf16.mxu0 %v7438_v51  ;;  %5779 = vmatprep.subr.bf16.mxu1 %v7441_v56 }
 0xbf6   :  { %5749 = vmatpush1.bf16.msra.mxu0 %v7444_v10  ;;  %5781 = vmatpush1.bf16.msra.mxu1 %v7448_v44 }
 0xbf7   :  { %5751 = vmatprep.subr.bf16.mxu0 %v7450_v58  ;;  %5783 = vmatprep.subr.bf16.mxu1 %v7453_v41 }
 0xbfa   :  { %5753 = vmatpush1.bf16.msra.mxu0 %v7456_v33  ;;  %5785 = vmatpush1.bf16.msra.mxu1 %v7460_v7 }
 0xbfb   :  { %5755 = vmatprep.subr.bf16.mxu0 %v7465_v38  ;;  %5787 = vmatprep.subr.bf16.mxu1 %v7467_v53 }
 0xbfe   :  { %5757 = vmatpush1.bf16.msra.mxu0 %v7469_v63  ;;  %5789 = vmatpush1.bf16.msra.mxu1 %v7472_v50 }
 0xbff   :  { %5791 = vmatprep.subr.bf16.mxu0 %v7381_v43  ;;  %5823 = vmatprep.subr.bf16.mxu1 %v7383_v55 }
 0xcb4   :  { %v3604_v8 = vpop.f32.mrb[22].mxu0  ;;  %v3675_v1 = vpop.f32.mrb[22].mxu1 }
 0xcb5   :  { %v6084_v49 = vadd.f32 %v3604_v8, %v7529_v46  ;;  %v3606_v24 = vpop.f32.mrb[23].mxu0  ;;  %v3677_v23 = vpop.f32.mrb[23].mxu1  ;;  %v6100_v31 = vadd.f32 %v3675_v1, %v7543_v37  ;;  %v7698_v8 = vadd.f32 %v3529_v32, %v3522_v39 }
 0xcb6   :  { %v6085_v22 = vadd.f32 %v3606_v24, %v7532_v19  ;;  %v6101_v40 = vadd.f32 %v3677_v23, %v7538_v2 }
 0xcb7   :  { %v4775_v57 = vmul.f32 -1.442695, %v6084_v49 }
 0xcb8   :  { %v4776_v25 = vmul.f32 -1.442695, %v6085_v22  ;;  %v4777_v21 = vmul.f32 -1.442695, %v6101_v40 }
 0xcb9   :  { %6363 = vpow2.f32 %v4775_v57 }
 0xcba   :  { %6365 = vpow2.f32 %v4776_v25  ;;  %v7704_v25 = vpop.permute.xlu0 %3718 }
 0xcbb   :  { %6367 = vpow2.f32 %v4777_v21  ;;  %v3724_v40 = vmul.f32 %v7704_v25, %v7653_v59 }
 0xcbc   :  { %6369 = vtanh.f32 %v6100_v31 }
 0xcc3   :  { %v6364_v4 = vpop.eup %6363 }
 0xcc4   :  { %v6366_v14 = vpop.eup %6365  ;;  %v3688_v17 = vadd.f32 1.0, %v6364_v4 }
 0xcc5   :  { %v3694_v20 = vadd.f32 1.0, %v6366_v14  ;;  %v6368_v11 = vpop.eup %6367 }
 0xcc6   :  { %6371 = vrcp.f32 %v3688_v17  ;;  %v6370_v48 = vpop.eup %6369  ;;  %v3701_v24 = vadd.f32 1.0, %v6368_v11 }
 0xcc7   :  { %6373 = vrcp.f32 %v3694_v20 }
 0xcc8   :  { %6375 = vrcp.f32 %v3701_v24 }
 0xcd0   :  { %v6372_v61 = vpop.eup %6371 }
 0xcd1   :  { %v6374_v49 = vpop.eup %6373  ;;  %v3705_v1 = vmul.f32 %v6372_v61, %v6370_v48 }
 0xcd2   :  { %v3704_v23 = vmul.f32 %v6374_v49, %v7698_v8  ;;  %v6376_v57 = vpop.eup %6375 }
 0xcd4   :  { %v7701_v22 = vadd.f32 %v3705_v1, %v3704_v23 }
 0xcd6   :  { %6377 = vtanh.f32 %v7701_v22 }
 0xce0   :  { %v6378_v15 = vpop.eup %6377 }
 0xce1   :  { %v3708_v12 = vmul.f32 %v6378_v15, %v6376_v57  ;;  %v3714_v57 = vmul.f32 %v3712_v3, %v7701_v22 }
 0xce3   :  { %v3723_v60 = vmul.f32 %v3712_v3, %v3708_v12  ;;  %v3721_v12 = vmul.f32 %v7704_v25, %v7698_v8  ;;  %v3904_v8 = vpop.permute.xlu1 %3903 }
 0xce5   :  { %v7708_v21 = vadd.f32 %v3724_v40, %v3723_v60 }
 0xce7   :  { %3795 = vmatmul.mubr.f32.vlgmr.msra.gmra.mrb[24].mxu0 %v7708_v21  ;;  %3866 = vmatmul.mubr.f32.vlgmr.msra.gmra.mrb[24].mxu1 %v7708_v21 }
 0xce8   :  { %5793 = vmatpush1.bf16.msra.mxu0 %v7385_v36  ;;  %5825 = vmatpush1.bf16.msra.mxu1 %v7388_v34 }
 0xce9   :  { %5795 = vmatprep.subr.bf16.mxu0 %v7393_v6  ;;  %5827 = vmatprep.subr.bf16.mxu1 %v7395_v5 }
 0xcea   :  { %3986 = vmatprep.mubr.f32.mxu0 %v6568_v0  ;;  %4057 = vmatprep.mubr.f32.mxu1 %v6568_v0 }
 0xcec   :  { %5797 = vmatpush1.bf16.msra.mxu0 %v7397_v47  ;;  %5829 = vmatpush1.bf16.msra.mxu1 %v7400_v9 }
 0xced   :  { %5799 = vmatprep.subr.bf16.mxu0 %v7405_v54  ;;  %5831 = vmatprep.subr.bf16.mxu1 %v7407_v30 }
 0xcf0   :  { %5801 = vmatpush1.bf16.msra.mxu0 %v7409_v45  ;;  %5833 = vmatpush1.bf16.msra.mxu1 %v7412_v35 }
 0xcf1   :  { %5803 = vmatprep.subr.bf16.mxu0 %v7416_v18  ;;  %5835 = vmatprep.subr.bf16.mxu1 %v7419_v26 }
 0xcf4   :  { %5805 = vmatpush1.bf16.msra.mxu0 %v7421_v16  ;;  %5837 = vmatpush1.bf16.msra.mxu1 %v7424_v27 }
 0xcf5   :  { %5807 = vmatprep.subr.bf16.mxu0 %v7427_v28  ;;  %5839 = vmatprep.subr.bf16.mxu1 %v7429_v13 }
 0xcf8   :  { %5809 = vmatpush1.bf16.msra.mxu0 %v7432_v52  ;;  %5841 = vmatpush1.bf16.msra.mxu1 %v7436_v29 }
 0xcf9   :  { %5811 = vmatprep.subr.bf16.mxu0 %v7438_v51  ;;  %5843 = vmatprep.subr.bf16.mxu1 %v7441_v56 }
 0xcfc   :  { %5813 = vmatpush1.bf16.msra.mxu0 %v7444_v10  ;;  %5845 = vmatpush1.bf16.msra.mxu1 %v7448_v44 }
 0xcfd   :  { %5815 = vmatprep.subr.bf16.mxu0 %v7450_v58  ;;  %5847 = vmatprep.subr.bf16.mxu1 %v7453_v41 }
 0xd00   :  { %5817 = vmatpush1.bf16.msra.mxu0 %v7456_v33  ;;  %5849 = vmatpush1.bf16.msra.mxu1 %v7460_v7 }
 0xd01   :  { %5819 = vmatprep.subr.bf16.mxu0 %v7465_v38  ;;  %5851 = vmatprep.subr.bf16.mxu1 %v7467_v53 }
 0xd04   :  { %5821 = vmatpush1.bf16.msra.mxu0 %v7469_v63  ;;  %5853 = vmatpush1.bf16.msra.mxu1 %v7472_v50 }
 0xd05   :  { %5855 = vmatprep.subr.bf16.mxu0 %v7381_v43  ;;  %5887 = vmatprep.subr.bf16.mxu1 %v7383_v55 }
 0xdba   :  { %v3796_v59 = vpop.f32.mrb[24].mxu0  ;;  %v3867_v31 = vpop.f32.mrb[24].mxu1 }
 0xdbb   :  { %v6086_v4 = vadd.f32 %v3796_v59, %v7529_v46  ;;  %v3798_v14 = vpop.f32.mrb[25].mxu0  ;;  %v3869_v17 = vpop.f32.mrb[25].mxu1  ;;  %v6102_v61 = vadd.f32 %v3867_v31, %v7543_v37  ;;  %v7753_v59 = vadd.f32 %v3721_v12, %v3714_v57 }
 0xdbc   :  { %v6087_v20 = vadd.f32 %v3798_v14, %v7532_v19  ;;  %v6103_v32 = vadd.f32 %v3869_v17, %v7538_v2 }
 0xdbd   :  { %v4779_v39 = vmul.f32 -1.442695, %v6086_v4 }
 0xdbe   :  { %v4780_v11 = vmul.f32 -1.442695, %v6087_v20  ;;  %v4781_v48 = vmul.f32 -1.442695, %v6103_v32 }
 0xdbf   :  { %6379 = vpow2.f32 %v4779_v39 }
 0xdc0   :  { %6381 = vpow2.f32 %v4780_v11  ;;  %v7759_v11 = vpop.permute.xlu0 %3910 }
 0xdc1   :  { %6383 = vpow2.f32 %v4781_v48  ;;  %v3916_v32 = vmul.f32 %v7759_v11, %v7708_v21 }
 0xdc2   :  { %6385 = vtanh.f32 %v6102_v61 }
 0xdc9   :  { %v6380_v49 = vpop.eup %6379 }
 0xdca   :  { %v6382_v1 = vpop.eup %6381  ;;  %v3880_v24 = vadd.f32 1.0, %v6380_v49 }
 0xdcb   :  { %v3886_v23 = vadd.f32 1.0, %v6382_v1  ;;  %v6384_v15 = vpop.eup %6383 }
 0xdcc   :  { %6387 = vrcp.f32 %v3880_v24  ;;  %v6386_v60 = vpop.eup %6385  ;;  %v3893_v14 = vadd.f32 1.0, %v6384_v15 }
 0xdcd   :  { %6389 = vrcp.f32 %v3886_v23 }
 0xdce   :  { %6391 = vrcp.f32 %v3893_v14 }
 0xdd6   :  { %v6388_v40 = vpop.eup %6387 }
 0xdd7   :  { %v6390_v4 = vpop.eup %6389  ;;  %v3897_v31 = vmul.f32 %v6388_v40, %v6386_v60 }
 0xdd8   :  { %v3896_v17 = vmul.f32 %v6390_v4, %v7753_v59  ;;  %v6392_v39 = vpop.eup %6391 }
 0xdda   :  { %v7756_v20 = vadd.f32 %v3897_v31, %v3896_v17 }
 0xddc   :  { %6393 = vtanh.f32 %v7756_v20  ;;  %v3906_v14 = vmul.f32 %v3904_v8, %v7756_v20 }
 0xde6   :  { %v6394_v22 = vpop.eup %6393 }
 0xde7   :  { %v3900_v3 = vmul.f32 %v6394_v22, %v6392_v39  ;;  %v3913_v39 = vmul.f32 %v7759_v11, %v7753_v59 }
 0xde9   :  { %v3915_v25 = vmul.f32 %v3904_v8, %v3900_v3 }
 0xdeb   :  { %v7763_v48 = vadd.f32 %v3916_v32, %v3915_v25  ;;  %v7808_v25 = vadd.f32 %v3913_v39, %v3906_v14  ;;  %v4493_v14 = vld [vmem:[#allocation11 + $0x10] sm:$0xff]  ;;  %v4496_v39 = vld [vmem:[#allocation11 + $0x28] sm:$0xff] }
 0xded   :  { %3987 = vmatmul.mubr.f32.vlgmr.msra.gmra.mrb[26].mxu0 %v7763_v48  ;;  %4058 = vmatmul.mubr.f32.vlgmr.msra.gmra.mrb[26].mxu1 %v7763_v48 }
 0xdee   :  { %5857 = vmatpush1.bf16.msra.mxu0 %v7385_v36  ;;  %5889 = vmatpush1.bf16.msra.mxu1 %v7388_v34 }
 0xdef   :  { %5859 = vmatprep.subr.bf16.mxu0 %v7393_v6  ;;  %5891 = vmatprep.subr.bf16.mxu1 %v7395_v5 }
 0xdf0   :  { %4178 = vmatprep.mubr.f32.mxu0 %v6568_v0  ;;  %4249 = vmatprep.mubr.f32.mxu1 %v6568_v0 }
 0xdf2   :  { %5861 = vmatpush1.bf16.msra.mxu0 %v7397_v47  ;;  %5893 = vmatpush1.bf16.msra.mxu1 %v7400_v9 }
 0xdf3   :  { %5863 = vmatprep.subr.bf16.mxu0 %v7405_v54  ;;  %5895 = vmatprep.subr.bf16.mxu1 %v7407_v30 }
 0xdf6   :  { %5865 = vmatpush1.bf16.msra.mxu0 %v7409_v45  ;;  %5897 = vmatpush1.bf16.msra.mxu1 %v7412_v35 }
 0xdf7   :  { %5867 = vmatprep.subr.bf16.mxu0 %v7416_v18  ;;  %5899 = vmatprep.subr.bf16.mxu1 %v7419_v26 }
 0xdfa   :  { %5869 = vmatpush1.bf16.msra.mxu0 %v7421_v16  ;;  %5901 = vmatpush1.bf16.msra.mxu1 %v7424_v27 }
 0xdfb   :  { %5871 = vmatprep.subr.bf16.mxu0 %v7427_v28  ;;  %5903 = vmatprep.subr.bf16.mxu1 %v7429_v13 }
 0xdfe   :  { %5873 = vmatpush1.bf16.msra.mxu0 %v7432_v52  ;;  %5905 = vmatpush1.bf16.msra.mxu1 %v7436_v29 }
 0xdff   :  { %5875 = vmatprep.subr.bf16.mxu0 %v7438_v51  ;;  %5907 = vmatprep.subr.bf16.mxu1 %v7441_v56 }
 0xe02   :  { %5877 = vmatpush1.bf16.msra.mxu0 %v7444_v10  ;;  %5909 = vmatpush1.bf16.msra.mxu1 %v7448_v44 }
 0xe03   :  { %5879 = vmatprep.subr.bf16.mxu0 %v7450_v58  ;;  %5911 = vmatprep.subr.bf16.mxu1 %v7453_v41 }
 0xe06   :  { %5881 = vmatpush1.bf16.msra.mxu0 %v7456_v33  ;;  %5913 = vmatpush1.bf16.msra.mxu1 %v7460_v7 }
 0xe07   :  { %5883 = vmatprep.subr.bf16.mxu0 %v7465_v38  ;;  %5915 = vmatprep.subr.bf16.mxu1 %v7467_v53 }
 0xe0a   :  { %5885 = vmatpush1.bf16.msra.mxu0 %v7469_v63  ;;  %5917 = vmatpush1.bf16.msra.mxu1 %v7472_v50 }
 0xe0b   :  { %5919 = vmatprep.subr.bf16.mxu0 %v7381_v43  ;;  %5951 = vmatprep.subr.bf16.mxu1 %v7383_v55 }
 0xec0   :  { %v3988_v21 = vpop.f32.mrb[26].mxu0  ;;  %v4059_v61 = vpop.f32.mrb[26].mxu1 }
 0xec1   :  { %v6088_v49 = vadd.f32 %v3988_v21, %v7529_v46  ;;  %v3990_v1 = vpop.f32.mrb[27].mxu0  ;;  %v4061_v24 = vpop.f32.mrb[27].mxu1  ;;  %v6104_v40 = vadd.f32 %v4059_v61, %v7543_v37 }
 0xec2   :  { %v6089_v23 = vadd.f32 %v3990_v1, %v7532_v19  ;;  %v6105_v12 = vadd.f32 %v4061_v24, %v7538_v2 }
 0xec3   :  { %v4783_v57 = vmul.f32 -1.442695, %v6088_v49 }
 0xec4   :  { %v4784_v15 = vmul.f32 -1.442695, %v6089_v23  ;;  %v4785_v60 = vmul.f32 -1.442695, %v6105_v12  ;;  %v4103_v23 = vpop.permute.xlu0 %4102 }
 0xec5   :  { %6395 = vpow2.f32 %v4783_v57  ;;  %v4096_v57 = vpop.permute.xlu1 %4095  ;;  %v4108_v11 = vmul.f32 %v4103_v23, %v7763_v48 }
 0xec6   :  { %6397 = vpow2.f32 %v4784_v15 }
 0xec7   :  { %6399 = vpow2.f32 %v4785_v60 }
 0xec8   :  { %6401 = vtanh.f32 %v6104_v40 }
 0xec9   :  { %v7865_v48 = vpop.permute.xlu1 %4287 }
 0xecf   :  { %v6396_v43 = vpop.eup %6395 }
 0xed0   :  { %v6398_v4 = vpop.eup %6397  ;;  %v4072_v55 = vadd.f32 1.0, %v6396_v43  ;;  %v4492_v43 = vld [vmem:[#allocation11 + $0x8] sm:$0xff] }
 0xed1   :  { %v4078_v31 = vadd.f32 1.0, %v6398_v4  ;;  %v6400_v17 = vpop.eup %6399  ;;  %v4494_v4 = vld [vmem:[#allocation11 + $0x18] sm:$0xff] }
 0xed2   :  { %6403 = vrcp.f32 %v4072_v55  ;;  %v6402_v22 = vpop.eup %6401  ;;  %v4085_v61 = vadd.f32 1.0, %v6400_v17  ;;  %v5982_v55 = vpack.c.bf16 %v4494_v4, %v4492_v43  ;;  %v4626_v43 = vld [vmem:[%s8001_s10 + $0x90] sm:$0xff]  ;;  %v4627_v4 = vld [vmem:[%s8001_s10 + $0x98] sm:$0xff] }
 0xed3   :  { %6405 = vrcp.f32 %v4078_v31  ;;  %v4491_v31 = vld [vmem:[#allocation11] sm:$0xff] }
 0xed4   :  { %6407 = vrcp.f32 %v4085_v61  ;;  %v5984_v17 = vpack.c.bf16 %v4493_v14, %v4491_v31  ;;  %v4500_v61 = vld [vmem:[#allocation11 + $0x48] sm:$0xff]  ;;  %v6018_v31 = vpack.c.bf16 %v4627_v4, %v4626_v43  ;;  %v4610_v14 = vld [vmem:[%s8001_s10 + $0x10] sm:$0xff] }
 0xedc   :  { %v6404_v3 = vpop.eup %6403 }
 0xedd   :  { %v6406_v32 = vpop.eup %6405  ;;  %v4089_v21 = vmul.f32 %v6404_v3, %v6402_v22  ;;  %v4498_v22 = vld [vmem:[#allocation11 + $0x38] sm:$0xff] }
 0xede   :  { %v4088_v49 = vmul.f32 %v6406_v32, %v7808_v25  ;;  %v6408_v24 = vpop.eup %6407  ;;  %v5986_v3 = vpack.c.bf16 %v4498_v22, %v4496_v39  ;;  %v4497_v32 = vld [vmem:[#allocation11 + $0x30] sm:$0xff]  ;;  %v4628_v39 = vld [vmem:[%s8001_s10 + $0xa0] sm:$0xff]  ;;  %v4629_v22 = vld [vmem:[%s8001_s10 + $0xa8] sm:$0xff] }
 0xee0   :  { %v7811_v1 = vadd.f32 %v4089_v21, %v4088_v49  ;;  %v4502_v49 = vld [vmem:[#allocation11 + $0x58] sm:$0xff] }
 0xee2   :  { %6409 = vtanh.f32 %v7811_v1 }
 0xeec   :  { %v6410_v20 = vpop.eup %6409 }
 0xeed   :  { %v4092_v8 = vmul.f32 %v6410_v20, %v6408_v24  ;;  %v4501_v24 = vld [vmem:[#allocation11 + $0x50] sm:$0xff] }
 0xeef   :  { %v4107_v59 = vmul.f32 %v4096_v57, %v4092_v8  ;;  %v4504_v8 = vld [vmem:[#allocation11 + $0x68] sm:$0xff] }
 0xef1   :  { %v7815_v15 = vadd.f32 %v4108_v11, %v4107_v59  ;;  %v4503_v59 = vld [vmem:[#allocation11 + $0x60] sm:$0xff]  ;;  %v4505_v11 = vld [vmem:[#allocation11 + $0x70] sm:$0xff] }
 0xef3   :  { %4179 = vmatmul.mubr.f32.vlgmr.msra.gmra.mrb[28].mxu0 %v7815_v15  ;;  %4250 = vmatmul.mubr.f32.vlgmr.msra.gmra.mrb[28].mxu1 %v7815_v15 }
 0xef4   :  { %5921 = vmatpush1.bf16.msra.mxu0 %v7385_v36  ;;  %5953 = vmatpush1.bf16.msra.mxu1 %v7388_v34 }
 0xef5   :  { %5923 = vmatprep.subr.bf16.mxu0 %v7393_v6  ;;  %5955 = vmatprep.subr.bf16.mxu1 %v7395_v5 }
 0xef6   :  { %4370 = vmatprep.mubr.f32.mxu0 %v6568_v0  ;;  %4441 = vmatprep.mubr.f32.mxu1 %v6568_v0 }
 0xef8   :  { %5925 = vmatpush1.bf16.msra.mxu0 %v7397_v47  ;;  %5957 = vmatpush1.bf16.msra.mxu1 %v7400_v9 }
 0xef9   :  { %5927 = vmatprep.subr.bf16.mxu0 %v7405_v54  ;;  %5959 = vmatprep.subr.bf16.mxu1 %v7407_v30 }
 0xefc   :  { %5929 = vmatpush1.bf16.msra.mxu0 %v7409_v45  ;;  %5961 = vmatpush1.bf16.msra.mxu1 %v7412_v35 }
 0xefd   :  { %5931 = vmatprep.subr.bf16.mxu0 %v7416_v18  ;;  %5963 = vmatprep.subr.bf16.mxu1 %v7419_v26 }
 0xf00   :  { %5933 = vmatpush1.bf16.msra.mxu0 %v7421_v16  ;;  %5965 = vmatpush1.bf16.msra.mxu1 %v7424_v27 }
 0xf01   :  { %5935 = vmatprep.subr.bf16.mxu0 %v7427_v28  ;;  %5967 = vmatprep.subr.bf16.mxu1 %v7429_v13  ;;  %v4098_v13 = vmul.f32 %v4096_v57, %v7811_v1  ;;  %v5990_v1 = vpack.c.bf16 %v4502_v49, %v4500_v61  ;;  %v4630_v61 = vld [vmem:[%s8001_s10 + $0xb0] sm:$0xff]  ;;  %v4631_v49 = vld [vmem:[%s8001_s10 + $0xb8] sm:$0xff] }
 0xf04   :  { %5937 = vmatpush1.bf16.msra.mxu0 %v7432_v52  ;;  %5969 = vmatpush1.bf16.msra.mxu1 %v7436_v29  ;;  %v4105_v29 = vmul.f32 %v4103_v23, %v7808_v25  ;;  %v4495_v25 = vld [vmem:[#allocation11 + $0x20] sm:$0xff]  ;;  %v4506_v23 = vld [vmem:[#allocation11 + $0x78] sm:$0xff] }
 0xf05   :  { %5939 = vmatprep.subr.bf16.mxu0 %v7438_v51  ;;  %5971 = vmatprep.subr.bf16.mxu1 %v7441_v56  ;;  %v5988_v21 = vpack.c.bf16 %v4497_v32, %v4495_v25  ;;  %v5994_v57 = vpack.c.bf16 %v4506_v23, %v4504_v8  ;;  %v6022_v25 = vpack.c.bf16 %v4629_v22, %v4628_v39  ;;  %v4612_v32 = vld [vmem:[%s8001_s10 + $0x20] sm:$0xff]  ;;  %v4633_v23 = vld [vmem:[%s8001_s10 + $0xc8] sm:$0xff]  ;;  %v4480_v22 = vpop.permute.xlu1 %4479 }
 0xf06   :  { %v4632_v8 = vld [vmem:[%s8001_s10 + $0xc0] sm:$0xff] }
 0xf08   :  { %5941 = vmatpush1.bf16.msra.mxu0 %v7444_v10  ;;  %5973 = vmatpush1.bf16.msra.mxu1 %v7448_v44  ;;  %v7857_v10 = vadd.f32 %v4105_v29, %v4098_v13  ;;  %v4515_v13 = vld [vmem:[#allocation11 + $0xc0] sm:$0xff]  ;;  %v4520_v29 = vld [vmem:[#allocation11 + $0xe8] sm:$0xff] }
 0xf09   :  { %5943 = vmatprep.subr.bf16.mxu0 %v7450_v58  ;;  %5975 = vmatprep.subr.bf16.mxu1 %v7453_v41 }
 0xf0c   :  { %5945 = vmatpush1.bf16.msra.mxu0 %v7456_v33  ;;  %5977 = vmatpush1.bf16.msra.mxu1 %v7460_v7 }
 0xf0d   :  { %5947 = vmatprep.subr.bf16.mxu0 %v7465_v38  ;;  %5979 = vmatprep.subr.bf16.mxu1 %v7467_v53 }
 0xf10   :  { %5949 = vmatpush1.bf16.msra.mxu0 %v7469_v63  ;;  %5981 = vmatpush1.bf16.msra.mxu1 %v7472_v50  ;;  %v7863_v50 = vpop.permute.xlu0 %4294 }
 0xf11   :  { %v4300_v60 = vmul.f32 %v7863_v50, %v7815_v15  ;;  %5983 = vmatprep.subr.bf16.mxu0 %v5982_v55  ;;  %v5996_v15 = vpack.c.bf16 %v4505_v11, %v4503_v59  ;;  %v6030_v59 = vpack.c.bf16 %v4633_v23, %v4632_v8  ;;  %v4616_v11 = vld [vmem:[%s8001_s10 + $0x40] sm:$0xff] }
 0xf14   :  { %v4487_v39 = vpop.permute.xlu0 %4486 }
 0xfc6   :  { %v4180_v36 = vpop.f32.mrb[28].mxu0  ;;  %v4251_v34 = vpop.f32.mrb[28].mxu1 }
 0xfc7   :  { %v6090_v6 = vadd.f32 %v4180_v36, %v7529_v46  ;;  %v4182_v5 = vpop.f32.mrb[29].mxu0  ;;  %v4253_v47 = vpop.f32.mrb[29].mxu1  ;;  %v6106_v18 = vadd.f32 %v4251_v34, %v7543_v37  ;;  %v4508_v36 = vld [vmem:[#allocation11 + $0x88] sm:$0xff]  ;;  %v4510_v34 = vld [vmem:[#allocation11 + $0x98] sm:$0xff] }
 0xfc8   :  { %v6091_v9 = vadd.f32 %v4182_v5, %v7532_v19  ;;  %v6107_v45 = vadd.f32 %v4253_v47, %v7538_v2  ;;  %v4507_v5 = vld [vmem:[#allocation11 + $0x80] sm:$0xff]  ;;  %v4509_v47 = vld [vmem:[#allocation11 + $0x90] sm:$0xff] }
 0xfc9   :  { %v4787_v54 = vmul.f32 -1.442695, %v6090_v6  ;;  %v5998_v6 = vpack.c.bf16 %v4510_v34, %v4508_v36  ;;  %v4634_v36 = vld [vmem:[%s8001_s10 + $0xd0] sm:$0xff]  ;;  %v4635_v34 = vld [vmem:[%s8001_s10 + $0xd8] sm:$0xff] }
 0xfca   :  { %v4788_v30 = vmul.f32 -1.442695, %v6091_v9  ;;  %v4789_v35 = vmul.f32 -1.442695, %v6107_v45  ;;  %v4512_v9 = vld [vmem:[#allocation11 + $0xa8] sm:$0xff]  ;;  %v4511_v45 = vld [vmem:[#allocation11 + $0xa0] sm:$0xff] }
 0xfcb   :  { %6411 = vpow2.f32 %v4787_v54  ;;  %v6000_v54 = vpack.c.bf16 %v4509_v47, %v4507_v5  ;;  %v6034_v5 = vpack.c.bf16 %v4635_v34, %v4634_v36  ;;  %v4618_v47 = vld [vmem:[%s8001_s10 + $0x50] sm:$0xff]  ;;  %v4794_v34 = vld [vmem:[%s8002_s11] ss:$0 sm:$0xff] }
 0xfcc   :  { %6413 = vpow2.f32 %v4788_v30  ;;  %v4514_v30 = vld [vmem:[#allocation11 + $0xb8] sm:$0xff] }
 0xfcd   :  { %6415 = vpow2.f32 %v4789_v35  ;;  %v4513_v35 = vld [vmem:[#allocation11 + $0xb0] sm:$0xff] }
 0xfce   :  { %6417 = vtanh.f32 %v6106_v18  ;;  %v6002_v18 = vpack.c.bf16 %v4514_v30, %v4512_v9  ;;  %v4619_v9 = vld [vmem:[%s8001_s10 + $0x58] sm:$0xff]  ;;  %v4637_v30 = vld [vmem:[%s8001_s10 + $0xe8] sm:$0xff] }
 0xfd5   :  { %v6412_v26 = vpop.eup %6411 }
 0xfd6   :  { %v6414_v16 = vpop.eup %6413  ;;  %v4264_v27 = vadd.f32 1.0, %v6412_v26  ;;  %v4516_v26 = vld [vmem:[#allocation11 + $0xc8] sm:$0xff] }
 0xfd7   :  { %v4270_v28 = vadd.f32 1.0, %v6414_v16  ;;  %v6416_v52 = vpop.eup %6415  ;;  %v4518_v16 = vld [vmem:[#allocation11 + $0xd8] sm:$0xff] }
 0xfd8   :  { %6419 = vrcp.f32 %v4264_v27  ;;  %v6418_v51 = vpop.eup %6417  ;;  %v4277_v41 = vadd.f32 1.0, %v6416_v52  ;;  %v6004_v27 = vpack.c.bf16 %v4513_v35, %v4511_v45  ;;  %v4517_v52 = vld [vmem:[#allocation11 + $0xd0] sm:$0xff]  ;;  %v6036_v45 = vpack.c.bf16 %v4619_v9, %v4618_v47 }
 0xfd9   :  { %6421 = vrcp.f32 %v4270_v28  ;;  %v6006_v28 = vpack.c.bf16 %v4518_v16, %v4516_v26 }
 0xfda   :  { %6423 = vrcp.f32 %v4277_v41  ;;  %v4521_v41 = vld [vmem:[#allocation11 + $0xf0] sm:$0xff] }
 0xfe2   :  { %v6420_v56 = vpop.eup %6419 }
 0xfe3   :  { %v6422_v44 = vpop.eup %6421  ;;  %v4281_v58 = vmul.f32 %v6420_v56, %v6418_v51  ;;  %v4522_v51 = vld [vmem:[#allocation11 + $0xf8] sm:$0xff]  ;;  %v6008_v56 = vpack.c.bf16 %v4517_v52, %v4515_v13 }
 0xfe4   :  { %v4280_v33 = vmul.f32 %v6422_v44, %v7857_v10  ;;  %v6424_v38 = vpop.eup %6423  ;;  %v6010_v44 = vpack.c.bf16 %v4522_v51, %v4520_v29 }
 0xfe6   :  { %v7860_v7 = vadd.f32 %v4281_v58, %v4280_v33  ;;  %v4519_v58 = vld [vmem:[#allocation11 + $0xe0] sm:$0xff] }
 0xfe7   :  { %v6012_v33 = vpack.c.bf16 %v4521_v41, %v4519_v58 }
 0xfe8   :  { %6425 = vtanh.f32 %v7860_v7 }
 0xff2   :  { %v6426_v53 = vpop.eup %6425 }
 0xff3   :  { %v4284_v63 = vmul.f32 %v6426_v53, %v6424_v38  ;;  %v4624_v38 = vld [vmem:[%s8001_s10 + $0x80] sm:$0xff]  ;;  %v4625_v53 = vld [vmem:[%s8001_s10 + $0x88] sm:$0xff] }
 0xff5   :  { %v4299_v12 = vmul.f32 %v7865_v48, %v4284_v63  ;;  %v4608_v63 = vld [vmem:[%s8001_s10] sm:$0xff] }
 0xff7   :  { %v7870_v40 = vadd.f32 %v4300_v60, %v4299_v12  ;;  %v6014_v12 = vpack.c.bf16 %v4625_v53, %v4624_v38  ;;  %v4609_v60 = vld [vmem:[%s8001_s10 + $0x8] sm:$0xff]  ;;  %v4297_v53 = vmul.f32 %v7863_v50, %v7857_v10  ;;  %v4620_v10 = vld [vmem:[%s8001_s10 + $0x60] sm:$0xff] }
 0xff8   :  { %v6016_v55 = vpack.c.bf16 %v4609_v60, %v4608_v63  ;;  %v4621_v50 = vld [vmem:[%s8001_s10 + $0x68] sm:$0xff] }
 0xff9   :  { %4371 = vmatmul.mubr.f32.vlgmr.msra.gmra.mrb[30].mxu0 %v7870_v40  ;;  %4442 = vmatmul.mubr.f32.vlgmr.msra.gmra.mrb[30].mxu1 %v7870_v40 }
 0xffa   :  { %4599 = vmatprep.mubr.f32.mxu0 %v6568_v0  ;;  %5985 = vmatpush1.bf16.msra.mxu0 %v5984_v17  ;;  %v4499_v0 = vld [vmem:[#allocation11 + $0x40] sm:$0xff]  ;;  %v4611_v17 = vld [vmem:[%s8001_s10 + $0x18] sm:$0xff] }
 0xffb   :  { %5987 = vmatprep.subr.bf16.mxu0 %v5986_v3  ;;  %v5992_v20 = vpack.c.bf16 %v4501_v24, %v4499_v0  ;;  %6015 = vmatprep.subr.bf16.mxu1 %v6014_v12  ;;  %v6020_v3 = vpack.c.bf16 %v4611_v17, %v4610_v14  ;;  %v6026_v0 = vpack.c.bf16 %v4631_v49, %v4630_v61  ;;  %v4614_v24 = vld [vmem:[%s8001_s10 + $0x30] sm:$0xff]  ;;  %v4623_v49 = vld [vmem:[%s8001_s10 + $0x78] sm:$0xff] }
 0xffc   :  { %6017 = vmatpush3.bf16.msra.mxu1 %v6016_v55  ;;  %v4622_v61 = vld [vmem:[%s8001_s10 + $0x70] sm:$0xff] }
 0xffd   :  { %6019 = vmatprep.subr.bf16.mxu1 %v6018_v31 }
 0xffe   :  { %5989 = vmatpush1.bf16.msra.mxu0 %v5988_v21  ;;  %v4613_v21 = vld [vmem:[%s8001_s10 + $0x28] sm:$0xff] }
 0xfff   :  { %5991 = vmatprep.subr.bf16.mxu0 %v5990_v1  ;;  %v6024_v1 = vpack.c.bf16 %v4613_v21, %v4612_v32  ;;  %v4638_v32 = vld [vmem:[%s8001_s10 + $0xf0] sm:$0xff] }
0x1000   :  { %6021 = vmatpush3.bf16.msra.mxu1 %v6020_v3 }
0x1001   :  { %6023 = vmatprep.subr.bf16.mxu1 %v6022_v25  ;;  %v6040_v25 = vpack.c.bf16 %v4621_v50, %v4620_v10 }
0x1002   :  { %5993 = vmatpush1.bf16.msra.mxu0 %v5992_v20  ;;  %v4615_v20 = vld [vmem:[%s8001_s10 + $0x38] sm:$0xff] }
0x1003   :  { %5995 = vmatprep.subr.bf16.mxu0 %v5994_v57  ;;  %v6028_v57 = vpack.c.bf16 %v4615_v20, %v4614_v24 }
0x1004   :  { %6025 = vmatpush3.bf16.msra.mxu1 %v6024_v1  ;;  %v6044_v1 = vpack.c.bf16 %v4623_v49, %v4622_v61 }
0x1005   :  { %6027 = vmatprep.subr.bf16.mxu1 %v6026_v0  ;;  %v4523_v0 = vld [vmem:[%s8000_s9] sm:$0x3] }
0x1006   :  { %5997 = vmatpush1.bf16.msra.mxu0 %v5996_v15  ;;  %v4617_v15 = vld [vmem:[%s8001_s10 + $0x48] sm:$0xff]  ;;  %v4528_v24 = vrot.slane %v4523_v0, %v6938_v42  ;;  %v4532_v20 = vrot.slane %v4523_v0, %v6944_v62 }
0x1007   :  { %5999 = vmatprep.subr.bf16.mxu0 %v5998_v6  ;;  %v6032_v6 = vpack.c.bf16 %v4617_v15, %v4616_v11 }
0x1008   :  { %6029 = vmatpush3.bf16.msra.mxu1 %v6028_v57 }
0x1009   :  { %6031 = vmatprep.subr.bf16.mxu1 %v6030_v59 }
0x100a   :  { %6001 = vmatpush1.bf16.msra.mxu0 %v6000_v54  ;;  %v4636_v54 = vld [vmem:[%s8001_s10 + $0xe0] sm:$0xff] }
0x100b   :  { %6003 = vmatprep.subr.bf16.mxu0 %v6002_v18  ;;  %v6038_v35 = vpack.c.bf16 %v4637_v30, %v4636_v54 }
0x100c   :  { %6033 = vmatpush3.bf16.msra.mxu1 %v6032_v6 }
0x100d   :  { %6035 = vmatprep.subr.bf16.mxu1 %v6034_v5 }
0x100e   :  { %6005 = vmatpush1.bf16.msra.mxu0 %v6004_v27 }
0x100f   :  { %6007 = vmatprep.subr.bf16.mxu0 %v6006_v28 }
0x1010   :  { %6037 = vmatpush3.bf16.msra.mxu1 %v6036_v45 }
0x1011   :  { %6039 = vmatprep.subr.bf16.mxu1 %v6038_v35 }
0x1012   :  { %6009 = vmatpush1.bf16.msra.mxu0 %v6008_v56 }
0x1013   :  { %6011 = vmatprep.subr.bf16.mxu0 %v6010_v44 }
0x1014   :  { %6041 = vmatpush3.bf16.msra.mxu1 %v6040_v25 }
0x1016   :  { %6013 = vmatpush1.bf16.msra.mxu0 %v6012_v33 }
0x10cc   :  { %v4372_v18 = vpop.f32.mrb[30].mxu0  ;;  %v4443_v26 = vpop.f32.mrb[30].mxu1 }
0x10cd   :  { %v6092_v16 = vadd.f32 %v4372_v18, %v7529_v46  ;;  %v4374_v27 = vpop.f32.mrb[31].mxu0  ;;  %v4445_v28 = vpop.f32.mrb[31].mxu1  ;;  %v6108_v44 = vadd.f32 %v4443_v26, %v7543_v37  ;;  %v4290_v46 = vmul.f32 %v7865_v48, %v7860_v7  ;;  %v4489_v48 = vmul.f32 %v4487_v39, %v7870_v40  ;;  %v4639_v40 = vld [vmem:[%s8001_s10 + $0xf8] sm:$0xff] }
0x10ce   :  { %v6093_v13 = vadd.f32 %v4374_v27, %v7532_v19  ;;  %v6109_v51 = vadd.f32 %v4445_v28, %v7538_v2  ;;  %v6042_v21 = vpack.c.bf16 %v4639_v40, %v4638_v32 }
0x10cf   :  { %v4791_v52 = vmul.f32 -1.442695, %v6092_v16  ;;  %v4298_v12 = vadd.f32 %v4297_v53, %v4290_v46 }
0x10d0   :  { %v4792_v29 = vmul.f32 -1.442695, %v6093_v13  ;;  %v4793_v56 = vmul.f32 -1.442695, %v6109_v51  ;;  %6043 = vmatprep.subr.bf16.mxu1 %v6042_v21 }
0x10d1   :  { %6427 = vpow2.f32 %v4791_v52  ;;  %6045 = vmatpush3.bf16.msra.mxu1 %v6044_v1 }
0x10d2   :  { %6429 = vpow2.f32 %v4792_v29 }
0x10d3   :  { %6431 = vpow2.f32 %v4793_v56 }
0x10d4   :  { %6433 = vtanh.f32 %v6108_v44 }
0x10db   :  { %v6428_v58 = vpop.eup %6427 }
0x10dc   :  { %v6430_v41 = vpop.eup %6429  ;;  %v4456_v33 = vadd.f32 1.0, %v6428_v58 }
0x10dd   :  { %v4462_v38 = vadd.f32 1.0, %v6430_v41  ;;  %v6432_v19 = vpop.eup %6431 }
0x10de   :  { %6435 = vrcp.f32 %v4456_v33  ;;  %v6434_v63 = vpop.eup %6433  ;;  %v4469_v43 = vadd.f32 1.0, %v6432_v19 }
0x10df   :  { %6437 = vrcp.f32 %v4462_v38 }
0x10e0   :  { %6439 = vrcp.f32 %v4469_v43 }
0x10e8   :  { %v6436_v2 = vpop.eup %6435 }
0x10e9   :  { %v6438_v60 = vpop.eup %6437  ;;  %v4473_v37 = vmul.f32 %v6436_v2, %v6434_v63 }
0x10ea   :  { %v4472_v4 = vmul.f32 %v6438_v60, %v4298_v12  ;;  %v6440_v31 = vpop.eup %6439 }
0x10ec   :  { %v4474_v55 = vadd.f32 %v4473_v37, %v4472_v4 }
0x10ee   :  { %6441 = vtanh.f32 %v4474_v55 }
0x10f8   :  { %v6442_v14 = vpop.eup %6441 }
0x10f9   :  { %v4476_v17 = vmul.f32 %v6442_v14, %v6440_v31 }
0x10fb   :  { %v4482_v7 = vmul.f32 %v4480_v22, %v4476_v17 }
0x10fd   :  { %v4490_v3 = vadd.f32 %v4489_v48, %v4482_v7 }
0x10ff   :  { %4600 = vmatmul.mubr.f32.vlgmr.msra.gmra.mrb[32].mxu0 %v4490_v3 }
0x11d2   :  { %v4601_v8 = vpop.f32.mrb[32].mxu0 }
0x11d3   :  { %v4602_v23 = vadd.f32 %v4601_v8, %v4528_v24  ;;  %v4603_v57 = vpop.f32.mrb[33].mxu0 }
0x11d4   :  { %v4604_v59 = vadd.f32 %v4603_v57, %v4532_v20 }
0x11d5   :  { %v4606_v15 = vmax.f32 %v4602_v23, 0.0 }
0x11d6   :  { %v4607_v11 = vmax.f32 %v4604_v59, 0.0 }
0x11d8   :  { %4711 = vmatprep.mubr.f32.mxu1 %v4607_v11 }
0x11d9   :  { %4712 = vmatmul.mubr.f32.vlgmr.msra.gmra.mrb[32].mxu1 %v4606_v15 }
0x12ac   :  { %v4827_v36 = vpop.f32.mrb[32].mxu1 }
0x12ad   :  { %v4828_v6 = vpop.f32.mrb[33].mxu1 }
0x12ae   :  { %v4829_v5 = vadd.f32 %v4828_v6, %v4827_v36 }
0x12b0   :  { %v4714_v47 = vadd.f32 %v4829_v5, %v4794_v34 }
0x12b2   :  { %4717 = vst [vmem:[%s8003_s12] sm:$0xff] %v4714_v47 }
0x12b3   :  { %4722 = vsyncpa [#allocation5], 1 }
0x12b4   :  { %4723 = vsyncpa [#allocation7], 1 }
0x12b5   :  { %4724 = vsyncpa [#allocation10], 1 }

</bundles_post_ra>
